<compile_context>
chip_gen: v6e
topology: v6e:2x2x1
jax: 0.10.0
libtpu: 0.0.40
codegen_flags: <defaults>
</compile_context>

<pallas_src>
import functools

import jax
import jax.numpy as jnp
import numpy as np
from jax.experimental import pallas as pl
from jax.experimental.pallas import tpu as pltpu


def _sablock_kernel(x_ref, w_ref, rc_ref, o_ref, *, H, W, K, PAD, TB, do_residual):
    """TB batch elements per grid step.

    x_ref  : (TB, C, H*W)  input block, lane-dense (VMEM)
    w_ref  : (2*K*K,)      flattened conv weights, avg path pre-scaled by 1/C (SMEM)
    rc_ref : (2, H*W)      int32 row / col index of every flattened pixel (VMEM)
    o_ref  : (TB, C, H*W)  output block (VMEM)
    """
    HW = H * W
    x = x_ref[...]                                  # (TB, C, HW), native dtype
    xf = x.astype(jnp.float32)

    # Channel-wise reductions. Sum instead of mean: 1/C is folded into the
    # avg-path conv weights in the wrapper.
    sum_map = jnp.sum(xf, axis=1)                   # (TB, HW) f32
    max_map = jnp.max(xf, axis=1)                   # (TB, HW) f32

    row = rc_ref[0:1, :]                            # (1, HW) int32
    col = rc_ref[1:2, :]                            # (1, HW) int32

    # Border-validity masks: K per spatial direction, shared by all taps.
    row_ok = [(row + (kh - PAD) >= 0) & (row + (kh - PAD) < H) for kh in range(K)]
    col_ok = [(col + (kw - PAD) >= 0) & (col + (kw - PAD) < W) for kw in range(K)]

    # Conv2d(2 -> 1, KxK, padding=PAD, bias=False) as rolled taps of the
    # flattened maps: pixel (h+dh, w+dw) lives at flat offset dh*W + dw, so a
    # lane roll by -(dh*W + dw) plus a border mask realizes one tap. Rolls go
    # to the XLU slot (otherwise idle here); taps/masks are VPU work on the
    # tiny per-pixel maps only.
    acc = jnp.zeros((TB, HW), jnp.float32)
    for kh in range(K):
        dh = kh - PAD
        for kw in range(K):
            dw = kw - PAD
            shift = (-(dh * W + dw)) % HW           # static python int
            if shift == 0:
                s_rolled, m_rolled = sum_map, max_map
            else:
                s_rolled = pltpu.roll(sum_map, shift=shift, axis=1)
                m_rolled = pltpu.roll(max_map, shift=shift, axis=1)
            tap = (s_rolled * w_ref[kh * K + kw]
                   + m_rolled * w_ref[K * K + kh * K + kw])
            acc = acc + jnp.where(row_ok[kh] & col_ok[kw], tap, 0.0)

    # Exact sigmoid on the tiny (TB, HW) map. Residual fused into the gate.
    gate = 1.0 / (1.0 + jnp.exp(-acc))              # (TB, HW) f32
    if do_residual:
        gate = gate + 1.0

    # Final multiply in the input dtype; broadcast the gate over channels.
    o_ref[...] = (x * gate[:, None, :].astype(x.dtype)).astype(o_ref.dtype)


def _pick_batch_tile(B, per_batch_bytes, budget_bytes=2 << 20):
    """Largest divisor of B whose block stays under ~2 MiB (amortizes grid overhead)."""
    tb = 1
    for cand in range(1, B + 1):
        if B % cand == 0 and cand * per_batch_bytes <= budget_bytes:
            tb = cand
    return tb


def sablock(x, conv_w, *, do_residual=False):
    """JAX/Pallas equivalent of SABlock.forward.

    x: (B, C, H, W); conv_w: (1, 2, K, K) (PyTorch nn.Conv2d(2,1,K,bias=False) weight).
    """
    B, C, H, W = x.shape
    out_c, two, K, K2 = conv_w.shape
    assert out_c == 1 and two == 2 and K == K2 and K in (3, 7)
    PAD = (K - 1) // 2
    HW = H * W

    # Fold the channel-mean's 1/C into the avg-path (input-channel 0) weights.
    w = conv_w.astype(jnp.float32)
    w = w.at[:, 0].multiply(1.0 / C)
    w_flat = w.reshape(-1)                          # (2*K*K,) PyTorch (o,i,kh,kw) order

    # Static row / col index of every flattened pixel (for the border masks),
    # built host-side so the kernel needs no integer div/mod. Its index_map is
    # constant, so Pallas fetches it once and keeps it resident.
    rows = np.repeat(np.arange(H, dtype=np.int32), W)
    cols = np.tile(np.arange(W, dtype=np.int32), H)
    rc = jnp.asarray(np.stack([rows, cols]))        # (2, HW) int32

    x3 = x.reshape(B, C, HW)                        # lane-dense layout (free reshape)

    per_batch_bytes = C * HW * x.dtype.itemsize
    TB = _pick_batch_tile(B, per_batch_bytes)
    grid = (B // TB,)

    kernel = functools.partial(_sablock_kernel, H=H, W=W, K=K, PAD=PAD, TB=TB,
                               do_residual=do_residual)

    # VMEM budget: one input block + one output block, each double-buffered,
    # plus small f32 temps. Only raise the scoped limit when actually needed.
    # TODO(synk): for very large C*H*W add a channel- or row-tiled grid axis
    # (two-pass: reduce maps, then apply gate) so a single (C, H*W) block is
    # not required to fit VMEM (v7x: 64 MiB).
    cp_kwargs = dict(dimension_semantics=("parallel",))   # batch elems independent
    block_bytes = TB * per_batch_bytes
    vmem_need = 4 * block_bytes + (1 << 20)
    if vmem_need > 16 * 1024 * 1024:
        cp_kwargs["vmem_limit_bytes"] = int(min(vmem_need, 64 * 1024 * 1024))

    out3 = pl.pallas_call(
        kernel,
        out_shape=jax.ShapeDtypeStruct((B, C, HW), x.dtype),
        grid=grid,
        in_specs=[
            pl.BlockSpec((TB, C, HW), lambda b: (b, 0, 0)),
            pl.BlockSpec(memory_space=pltpu.MemorySpace.SMEM),
            pl.BlockSpec((2, HW), lambda b: (0, 0)),
        ],
        out_specs=pl.BlockSpec((TB, C, HW), lambda b: (b, 0, 0)),
        compiler_params=pltpu.CompilerParams(**cp_kwargs),
    )(x3, w_flat, rc)
    return out3.reshape(B, C, H, W)


def sablock_ref(x, conv_w, do_residual=False):
    """Pure-JAX reference (same math as the PyTorch module)."""
    B, C, H, W = x.shape
    K = conv_w.shape[-1]
    PAD = (K - 1) // 2
    avg = jnp.mean(x, axis=1, keepdims=True)
    mx = jnp.max(x, axis=1, keepdims=True)
    maps = jnp.concatenate([avg, mx], axis=1)                       # (B, 2, H, W)
    padded = jnp.pad(maps, ((0, 0), (0, 0), (PAD, PAD), (PAD, PAD)))
    acc = jnp.zeros((B, H, W), jnp.float32)
    for c in range(2):
        for kh in range(K):
            for kw in range(K):
                acc = acc + padded[:, c, kh:kh + H, kw:kw + W] * conv_w[0, c, kh, kw]
    attn = (1.0 / (1.0 + jnp.exp(-acc)))[:, None]                   # (B, 1, H, W)
    out = attn * x
    if do_residual:
        out = out + x
    return out


if __name__ == "__main__":
    key = jax.random.PRNGKey(0)
    kx, kw7, kw3 = jax.random.split(key, 3)

    B, C, H, W = 2, 4, 16, 16
    x = jax.random.normal(kx, (B, C, H, W), dtype=jnp.float32)

    # nn.Conv2d(2, 1, K, bias=False) weights: shape (1, 2, K, K); deterministic
    # synthetic init (uniform, scaled by 1/sqrt(fan_in), like PyTorch default).
    def make_w(k, K):
        fan_in = 2 * K * K
        return jax.random.uniform(k, (1, 2, K, K), dtype=jnp.float32,
                                  minval=-1.0, maxval=1.0) / jnp.sqrt(float(fan_in))

    conv_w7 = make_w(kw7, 7)
    conv_w3 = make_w(kw3, 3)

    # sa_kernel_size=7 (default), do_residual=False
    out = jax.block_until_ready(sablock(x, conv_w7, do_residual=False))
    ref = sablock_ref(x, conv_w7, do_residual=False)
    np.testing.assert_allclose(np.asarray(out), np.asarray(ref), rtol=1e-5, atol=1e-5)

    # do_residual=True (fused as x * (attn + 1))
    out_r = jax.block_until_ready(sablock(x, conv_w7, do_residual=True))
    ref_r = sablock_ref(x, conv_w7, do_residual=True)
    np.testing.assert_allclose(np.asarray(out_r), np.asarray(ref_r), rtol=1e-5, atol=1e-5)

    # sa_kernel_size=3 variant
    out3 = jax.block_until_ready(sablock(x, conv_w3, do_residual=False))
    ref3 = sablock_ref(x, conv_w3, do_residual=False)
    np.testing.assert_allclose(np.asarray(out3), np.asarray(ref3), rtol=1e-5, atol=1e-5)

    print("KERNEL_OK")
</pallas_src>

<mosaic_0001>
module attributes {stable_mosaic.version = 11 : i64} {
  func.func @_sablock_kernel(%arg0: i32, %arg1: memref<2x4x256xf32, #tpu.memory_space<vmem>>, %arg2: memref<98xf32, #tpu.memory_space<smem>>, %arg3: memref<2x256xi32, #tpu.memory_space<vmem>>, %arg4: memref<2x4x256xf32, #tpu.memory_space<vmem>>) attributes {dimension_semantics = [#tpu.dimension_semantics<parallel>], iteration_bounds = array<i64: 1>, scalar_prefetch = 0 : i64, scratch_operands = 0 : i64, tpu.core_type = #tpu.core_type<tc>, window_params = [{transform_indices = @transform_0, window_bounds = array<i64: 2, 4, 256>}, {transform_indices = @transform_1, window_bounds = array<i64: 98>}, {pipeline_mode = #tpu.pipeline_mode<synchronous>, transform_indices = @transform_2, window_bounds = array<i64: 2, 256>}, {transform_indices = @transform_3, window_bounds = array<i64: 2, 4, 256>}]} {
    %c0 = arith.constant 0 : index
    %c0_0 = arith.constant 0 : index
    %c0_1 = arith.constant 0 : index
    %0 = vector.load %arg1[%c0, %c0_0, %c0_1] : memref<2x4x256xf32, #tpu.memory_space<vmem>>, vector<2x4x256xf32>
    %cst = arith.constant dense<0.000000e+00> : vector<2x256xf32>
    %1 = vector.multi_reduction <add>, %0, %cst [1] : vector<2x4x256xf32> to vector<2x256xf32>
    %cst_2 = arith.constant dense<0xFF800000> : vector<2x256xf32>
    %2 = vector.multi_reduction <maximumf>, %0, %cst_2 [1] : vector<2x4x256xf32> to vector<2x256xf32>
    %c0_3 = arith.constant 0 : index
    %c0_4 = arith.constant 0 : index
    %3 = vector.load %arg3[%c0_3, %c0_4] : memref<2x256xi32, #tpu.memory_space<vmem>>, vector<1x256xi32>
    %c1 = arith.constant 1 : index
    %c0_5 = arith.constant 0 : index
    %4 = vector.load %arg3[%c1, %c0_5] : memref<2x256xi32, #tpu.memory_space<vmem>>, vector<1x256xi32>
    %c-3_i32 = arith.constant -3 : i32
    %5 = vector.broadcast %c-3_i32 : i32 to vector<1x256xi32>
    %6 = arith.addi %3, %5 : vector<1x256xi32>
    %c0_i32 = arith.constant 0 : i32
    %7 = vector.broadcast %c0_i32 : i32 to vector<1x256xi32>
    %8 = arith.cmpi sge, %6, %7 : vector<1x256xi32>
    %c-3_i32_6 = arith.constant -3 : i32
    %9 = vector.broadcast %c-3_i32_6 : i32 to vector<1x256xi32>
    %10 = arith.addi %3, %9 : vector<1x256xi32>
    %c16_i32 = arith.constant 16 : i32
    %11 = vector.broadcast %c16_i32 : i32 to vector<1x256xi32>
    %12 = arith.cmpi slt, %10, %11 : vector<1x256xi32>
    %13 = arith.andi %8, %12 : vector<1x256xi1>
    %c-2_i32 = arith.constant -2 : i32
    %14 = vector.broadcast %c-2_i32 : i32 to vector<1x256xi32>
    %15 = arith.addi %3, %14 : vector<1x256xi32>
    %c0_i32_7 = arith.constant 0 : i32
    %16 = vector.broadcast %c0_i32_7 : i32 to vector<1x256xi32>
    %17 = arith.cmpi sge, %15, %16 : vector<1x256xi32>
    %c-2_i32_8 = arith.constant -2 : i32
    %18 = vector.broadcast %c-2_i32_8 : i32 to vector<1x256xi32>
    %19 = arith.addi %3, %18 : vector<1x256xi32>
    %c16_i32_9 = arith.constant 16 : i32
    %20 = vector.broadcast %c16_i32_9 : i32 to vector<1x256xi32>
    %21 = arith.cmpi slt, %19, %20 : vector<1x256xi32>
    %22 = arith.andi %17, %21 : vector<1x256xi1>
    %c-1_i32 = arith.constant -1 : i32
    %23 = vector.broadcast %c-1_i32 : i32 to vector<1x256xi32>
    %24 = arith.addi %3, %23 : vector<1x256xi32>
    %c0_i32_10 = arith.constant 0 : i32
    %25 = vector.broadcast %c0_i32_10 : i32 to vector<1x256xi32>
    %26 = arith.cmpi sge, %24, %25 : vector<1x256xi32>
    %c-1_i32_11 = arith.constant -1 : i32
    %27 = vector.broadcast %c-1_i32_11 : i32 to vector<1x256xi32>
    %28 = arith.addi %3, %27 : vector<1x256xi32>
    %c16_i32_12 = arith.constant 16 : i32
    %29 = vector.broadcast %c16_i32_12 : i32 to vector<1x256xi32>
    %30 = arith.cmpi slt, %28, %29 : vector<1x256xi32>
    %31 = arith.andi %26, %30 : vector<1x256xi1>
    %c0_i32_13 = arith.constant 0 : i32
    %32 = vector.broadcast %c0_i32_13 : i32 to vector<1x256xi32>
    %33 = arith.addi %3, %32 : vector<1x256xi32>
    %c0_i32_14 = arith.constant 0 : i32
    %34 = vector.broadcast %c0_i32_14 : i32 to vector<1x256xi32>
    %35 = arith.cmpi sge, %33, %34 : vector<1x256xi32>
    %c0_i32_15 = arith.constant 0 : i32
    %36 = vector.broadcast %c0_i32_15 : i32 to vector<1x256xi32>
    %37 = arith.addi %3, %36 : vector<1x256xi32>
    %c16_i32_16 = arith.constant 16 : i32
    %38 = vector.broadcast %c16_i32_16 : i32 to vector<1x256xi32>
    %39 = arith.cmpi slt, %37, %38 : vector<1x256xi32>
    %40 = arith.andi %35, %39 : vector<1x256xi1>
    %c1_i32 = arith.constant 1 : i32
    %41 = vector.broadcast %c1_i32 : i32 to vector<1x256xi32>
    %42 = arith.addi %3, %41 : vector<1x256xi32>
    %c0_i32_17 = arith.constant 0 : i32
    %43 = vector.broadcast %c0_i32_17 : i32 to vector<1x256xi32>
    %44 = arith.cmpi sge, %42, %43 : vector<1x256xi32>
    %c1_i32_18 = arith.constant 1 : i32
    %45 = vector.broadcast %c1_i32_18 : i32 to vector<1x256xi32>
    %46 = arith.addi %3, %45 : vector<1x256xi32>
    %c16_i32_19 = arith.constant 16 : i32
    %47 = vector.broadcast %c16_i32_19 : i32 to vector<1x256xi32>
    %48 = arith.cmpi slt, %46, %47 : vector<1x256xi32>
    %49 = arith.andi %44, %48 : vector<1x256xi1>
    %c2_i32 = arith.constant 2 : i32
    %50 = vector.broadcast %c2_i32 : i32 to vector<1x256xi32>
    %51 = arith.addi %3, %50 : vector<1x256xi32>
    %c0_i32_20 = arith.constant 0 : i32
    %52 = vector.broadcast %c0_i32_20 : i32 to vector<1x256xi32>
    %53 = arith.cmpi sge, %51, %52 : vector<1x256xi32>
    %c2_i32_21 = arith.constant 2 : i32
    %54 = vector.broadcast %c2_i32_21 : i32 to vector<1x256xi32>
    %55 = arith.addi %3, %54 : vector<1x256xi32>
    %c16_i32_22 = arith.constant 16 : i32
    %56 = vector.broadcast %c16_i32_22 : i32 to vector<1x256xi32>
    %57 = arith.cmpi slt, %55, %56 : vector<1x256xi32>
    %58 = arith.andi %53, %57 : vector<1x256xi1>
    %c3_i32 = arith.constant 3 : i32
    %59 = vector.broadcast %c3_i32 : i32 to vector<1x256xi32>
    %60 = arith.addi %3, %59 : vector<1x256xi32>
    %c0_i32_23 = arith.constant 0 : i32
    %61 = vector.broadcast %c0_i32_23 : i32 to vector<1x256xi32>
    %62 = arith.cmpi sge, %60, %61 : vector<1x256xi32>
    %c3_i32_24 = arith.constant 3 : i32
    %63 = vector.broadcast %c3_i32_24 : i32 to vector<1x256xi32>
    %64 = arith.addi %3, %63 : vector<1x256xi32>
    %c16_i32_25 = arith.constant 16 : i32
    %65 = vector.broadcast %c16_i32_25 : i32 to vector<1x256xi32>
    %66 = arith.cmpi slt, %64, %65 : vector<1x256xi32>
    %67 = arith.andi %62, %66 : vector<1x256xi1>
    %c-3_i32_26 = arith.constant -3 : i32
    %68 = vector.broadcast %c-3_i32_26 : i32 to vector<1x256xi32>
    %69 = arith.addi %4, %68 : vector<1x256xi32>
    %c0_i32_27 = arith.constant 0 : i32
    %70 = vector.broadcast %c0_i32_27 : i32 to vector<1x256xi32>
    %71 = arith.cmpi sge, %69, %70 : vector<1x256xi32>
    %c-3_i32_28 = arith.constant -3 : i32
    %72 = vector.broadcast %c-3_i32_28 : i32 to vector<1x256xi32>
    %73 = arith.addi %4, %72 : vector<1x256xi32>
    %c16_i32_29 = arith.constant 16 : i32
    %74 = vector.broadcast %c16_i32_29 : i32 to vector<1x256xi32>
    %75 = arith.cmpi slt, %73, %74 : vector<1x256xi32>
    %76 = arith.andi %71, %75 : vector<1x256xi1>
    %c-2_i32_30 = arith.constant -2 : i32
    %77 = vector.broadcast %c-2_i32_30 : i32 to vector<1x256xi32>
    %78 = arith.addi %4, %77 : vector<1x256xi32>
    %c0_i32_31 = arith.constant 0 : i32
    %79 = vector.broadcast %c0_i32_31 : i32 to vector<1x256xi32>
    %80 = arith.cmpi sge, %78, %79 : vector<1x256xi32>
    %c-2_i32_32 = arith.constant -2 : i32
    %81 = vector.broadcast %c-2_i32_32 : i32 to vector<1x256xi32>
    %82 = arith.addi %4, %81 : vector<1x256xi32>
    %c16_i32_33 = arith.constant 16 : i32
    %83 = vector.broadcast %c16_i32_33 : i32 to vector<1x256xi32>
    %84 = arith.cmpi slt, %82, %83 : vector<1x256xi32>
    %85 = arith.andi %80, %84 : vector<1x256xi1>
    %c-1_i32_34 = arith.constant -1 : i32
    %86 = vector.broadcast %c-1_i32_34 : i32 to vector<1x256xi32>
    %87 = arith.addi %4, %86 : vector<1x256xi32>
    %c0_i32_35 = arith.constant 0 : i32
    %88 = vector.broadcast %c0_i32_35 : i32 to vector<1x256xi32>
    %89 = arith.cmpi sge, %87, %88 : vector<1x256xi32>
    %c-1_i32_36 = arith.constant -1 : i32
    %90 = vector.broadcast %c-1_i32_36 : i32 to vector<1x256xi32>
    %91 = arith.addi %4, %90 : vector<1x256xi32>
    %c16_i32_37 = arith.constant 16 : i32
    %92 = vector.broadcast %c16_i32_37 : i32 to vector<1x256xi32>
    %93 = arith.cmpi slt, %91, %92 : vector<1x256xi32>
    %94 = arith.andi %89, %93 : vector<1x256xi1>
    %c0_i32_38 = arith.constant 0 : i32
    %95 = vector.broadcast %c0_i32_38 : i32 to vector<1x256xi32>
    %96 = arith.addi %4, %95 : vector<1x256xi32>
    %c0_i32_39 = arith.constant 0 : i32
    %97 = vector.broadcast %c0_i32_39 : i32 to vector<1x256xi32>
    %98 = arith.cmpi sge, %96, %97 : vector<1x256xi32>
    %c0_i32_40 = arith.constant 0 : i32
    %99 = vector.broadcast %c0_i32_40 : i32 to vector<1x256xi32>
    %100 = arith.addi %4, %99 : vector<1x256xi32>
    %c16_i32_41 = arith.constant 16 : i32
    %101 = vector.broadcast %c16_i32_41 : i32 to vector<1x256xi32>
    %102 = arith.cmpi slt, %100, %101 : vector<1x256xi32>
    %103 = arith.andi %98, %102 : vector<1x256xi1>
    %c1_i32_42 = arith.constant 1 : i32
    %104 = vector.broadcast %c1_i32_42 : i32 to vector<1x256xi32>
    %105 = arith.addi %4, %104 : vector<1x256xi32>
    %c0_i32_43 = arith.constant 0 : i32
    %106 = vector.broadcast %c0_i32_43 : i32 to vector<1x256xi32>
    %107 = arith.cmpi sge, %105, %106 : vector<1x256xi32>
    %c1_i32_44 = arith.constant 1 : i32
    %108 = vector.broadcast %c1_i32_44 : i32 to vector<1x256xi32>
    %109 = arith.addi %4, %108 : vector<1x256xi32>
    %c16_i32_45 = arith.constant 16 : i32
    %110 = vector.broadcast %c16_i32_45 : i32 to vector<1x256xi32>
    %111 = arith.cmpi slt, %109, %110 : vector<1x256xi32>
    %112 = arith.andi %107, %111 : vector<1x256xi1>
    %c2_i32_46 = arith.constant 2 : i32
    %113 = vector.broadcast %c2_i32_46 : i32 to vector<1x256xi32>
    %114 = arith.addi %4, %113 : vector<1x256xi32>
    %c0_i32_47 = arith.constant 0 : i32
    %115 = vector.broadcast %c0_i32_47 : i32 to vector<1x256xi32>
    %116 = arith.cmpi sge, %114, %115 : vector<1x256xi32>
    %c2_i32_48 = arith.constant 2 : i32
    %117 = vector.broadcast %c2_i32_48 : i32 to vector<1x256xi32>
    %118 = arith.addi %4, %117 : vector<1x256xi32>
    %c16_i32_49 = arith.constant 16 : i32
    %119 = vector.broadcast %c16_i32_49 : i32 to vector<1x256xi32>
    %120 = arith.cmpi slt, %118, %119 : vector<1x256xi32>
    %121 = arith.andi %116, %120 : vector<1x256xi1>
    %c3_i32_50 = arith.constant 3 : i32
    %122 = vector.broadcast %c3_i32_50 : i32 to vector<1x256xi32>
    %123 = arith.addi %4, %122 : vector<1x256xi32>
    %c0_i32_51 = arith.constant 0 : i32
    %124 = vector.broadcast %c0_i32_51 : i32 to vector<1x256xi32>
    %125 = arith.cmpi sge, %123, %124 : vector<1x256xi32>
    %c3_i32_52 = arith.constant 3 : i32
    %126 = vector.broadcast %c3_i32_52 : i32 to vector<1x256xi32>
    %127 = arith.addi %4, %126 : vector<1x256xi32>
    %c16_i32_53 = arith.constant 16 : i32
    %128 = vector.broadcast %c16_i32_53 : i32 to vector<1x256xi32>
    %129 = arith.cmpi slt, %127, %128 : vector<1x256xi32>
    %130 = arith.andi %125, %129 : vector<1x256xi1>
    %cst_54 = arith.constant 0.000000e+00 : f32
    %131 = vector.broadcast %cst_54 : f32 to vector<2x256xf32>
    %c51_i32 = arith.constant 51 : i32
    %132 = tpu.dynamic_rotate %1 by %c51_i32 dim 1 : vector<2x256xf32>, i32 -> vector<2x256xf32>
    %c51_i32_55 = arith.constant 51 : i32
    %133 = tpu.dynamic_rotate %2 by %c51_i32_55 dim 1 : vector<2x256xf32>, i32 -> vector<2x256xf32>
    %c0_56 = arith.constant 0 : index
    %134 = memref.load %arg2[%c0_56] : memref<98xf32, #tpu.memory_space<smem>>
    %135 = vector.broadcast %134 : f32 to vector<2x256xf32>
    %136 = arith.mulf %132, %135 : vector<2x256xf32>
    %c49 = arith.constant 49 : index
    %137 = memref.load %arg2[%c49] : memref<98xf32, #tpu.memory_space<smem>>
    %138 = vector.broadcast %137 : f32 to vector<2x256xf32>
    %139 = arith.mulf %133, %138 : vector<2x256xf32>
    %140 = arith.addf %136, %139 : vector<2x256xf32>
    %141 = arith.andi %13, %76 : vector<1x256xi1>
    %cst_57 = arith.constant 0.000000e+00 : f32
    %142 = vector.shape_cast %141 : vector<1x256xi1> to vector<1x256xi1>
    %143 = vector.broadcast %142 : vector<1x256xi1> to vector<2x256xi1>
    %144 = vector.broadcast %cst_57 : f32 to vector<2x256xf32>
    %145 = arith.select %143, %140, %144 : vector<2x256xi1>, vector<2x256xf32>
    %146 = arith.addf %131, %145 : vector<2x256xf32>
    %c50_i32 = arith.constant 50 : i32
    %147 = tpu.dynamic_rotate %1 by %c50_i32 dim 1 : vector<2x256xf32>, i32 -> vector<2x256xf32>
    %c50_i32_58 = arith.constant 50 : i32
    %148 = tpu.dynamic_rotate %2 by %c50_i32_58 dim 1 : vector<2x256xf32>, i32 -> vector<2x256xf32>
    %c1_59 = arith.constant 1 : index
    %149 = memref.load %arg2[%c1_59] : memref<98xf32, #tpu.memory_space<smem>>
    %150 = vector.broadcast %149 : f32 to vector<2x256xf32>
    %151 = arith.mulf %147, %150 : vector<2x256xf32>
    %c50 = arith.constant 50 : index
    %152 = memref.load %arg2[%c50] : memref<98xf32, #tpu.memory_space<smem>>
    %153 = vector.broadcast %152 : f32 to vector<2x256xf32>
    %154 = arith.mulf %148, %153 : vector<2x256xf32>
    %155 = arith.addf %151, %154 : vector<2x256xf32>
    %156 = arith.andi %13, %85 : vector<1x256xi1>
    %cst_60 = arith.constant 0.000000e+00 : f32
    %157 = vector.shape_cast %156 : vector<1x256xi1> to vector<1x256xi1>
    %158 = vector.broadcast %157 : vector<1x256xi1> to vector<2x256xi1>
    %159 = vector.broadcast %cst_60 : f32 to vector<2x256xf32>
    %160 = arith.select %158, %155, %159 : vector<2x256xi1>, vector<2x256xf32>
    %161 = arith.addf %146, %160 : vector<2x256xf32>
    %c49_i32 = arith.constant 49 : i32
    %162 = tpu.dynamic_rotate %1 by %c49_i32 dim 1 : vector<2x256xf32>, i32 -> vector<2x256xf32>
    %c49_i32_61 = arith.constant 49 : i32
    %163 = tpu.dynamic_rotate %2 by %c49_i32_61 dim 1 : vector<2x256xf32>, i32 -> vector<2x256xf32>
    %c2 = arith.constant 2 : index
    %164 = memref.load %arg2[%c2] : memref<98xf32, #tpu.memory_space<smem>>
    %165 = vector.broadcast %164 : f32 to vector<2x256xf32>
    %166 = arith.mulf %162, %165 : vector<2x256xf32>
    %c51 = arith.constant 51 : index
    %167 = memref.load %arg2[%c51] : memref<98xf32, #tpu.memory_space<smem>>
    %168 = vector.broadcast %167 : f32 to vector<2x256xf32>
    %169 = arith.mulf %163, %168 : vector<2x256xf32>
    %170 = arith.addf %166, %169 : vector<2x256xf32>
    %171 = arith.andi %13, %94 : vector<1x256xi1>
    %cst_62 = arith.constant 0.000000e+00 : f32
    %172 = vector.shape_cast %171 : vector<1x256xi1> to vector<1x256xi1>
    %173 = vector.broadcast %172 : vector<1x256xi1> to vector<2x256xi1>
    %174 = vector.broadcast %cst_62 : f32 to vector<2x256xf32>
    %175 = arith.select %173, %170, %174 : vector<2x256xi1>, vector<2x256xf32>
    %176 = arith.addf %161, %175 : vector<2x256xf32>
    %c48_i32 = arith.constant 48 : i32
    %177 = tpu.dynamic_rotate %1 by %c48_i32 dim 1 : vector<2x256xf32>, i32 -> vector<2x256xf32>
    %c48_i32_63 = arith.constant 48 : i32
    %178 = tpu.dynamic_rotate %2 by %c48_i32_63 dim 1 : vector<2x256xf32>, i32 -> vector<2x256xf32>
    %c3 = arith.constant 3 : index
    %179 = memref.load %arg2[%c3] : memref<98xf32, #tpu.memory_space<smem>>
    %180 = vector.broadcast %179 : f32 to vector<2x256xf32>
    %181 = arith.mulf %177, %180 : vector<2x256xf32>
    %c52 = arith.constant 52 : index
    %182 = memref.load %arg2[%c52] : memref<98xf32, #tpu.memory_space<smem>>
    %183 = vector.broadcast %182 : f32 to vector<2x256xf32>
    %184 = arith.mulf %178, %183 : vector<2x256xf32>
    %185 = arith.addf %181, %184 : vector<2x256xf32>
    %186 = arith.andi %13, %103 : vector<1x256xi1>
    %cst_64 = arith.constant 0.000000e+00 : f32
    %187 = vector.shape_cast %186 : vector<1x256xi1> to vector<1x256xi1>
    %188 = vector.broadcast %187 : vector<1x256xi1> to vector<2x256xi1>
    %189 = vector.broadcast %cst_64 : f32 to vector<2x256xf32>
    %190 = arith.select %188, %185, %189 : vector<2x256xi1>, vector<2x256xf32>
    %191 = arith.addf %176, %190 : vector<2x256xf32>
    %c47_i32 = arith.constant 47 : i32
    %192 = tpu.dynamic_rotate %1 by %c47_i32 dim 1 : vector<2x256xf32>, i32 -> vector<2x256xf32>
    %c47_i32_65 = arith.constant 47 : i32
    %193 = tpu.dynamic_rotate %2 by %c47_i32_65 dim 1 : vector<2x256xf32>, i32 -> vector<2x256xf32>
    %c4 = arith.constant 4 : index
    %194 = memref.load %arg2[%c4] : memref<98xf32, #tpu.memory_space<smem>>
    %195 = vector.broadcast %194 : f32 to vector<2x256xf32>
    %196 = arith.mulf %192, %195 : vector<2x256xf32>
    %c53 = arith.constant 53 : index
    %197 = memref.load %arg2[%c53] : memref<98xf32, #tpu.memory_space<smem>>
    %198 = vector.broadcast %197 : f32 to vector<2x256xf32>
    %199 = arith.mulf %193, %198 : vector<2x256xf32>
    %200 = arith.addf %196, %199 : vector<2x256xf32>
    %201 = arith.andi %13, %112 : vector<1x256xi1>
    %cst_66 = arith.constant 0.000000e+00 : f32
    %202 = vector.shape_cast %201 : vector<1x256xi1> to vector<1x256xi1>
    %203 = vector.broadcast %202 : vector<1x256xi1> to vector<2x256xi1>
    %204 = vector.broadcast %cst_66 : f32 to vector<2x256xf32>
    %205 = arith.select %203, %200, %204 : vector<2x256xi1>, vector<2x256xf32>
    %206 = arith.addf %191, %205 : vector<2x256xf32>
    %c46_i32 = arith.constant 46 : i32
    %207 = tpu.dynamic_rotate %1 by %c46_i32 dim 1 : vector<2x256xf32>, i32 -> vector<2x256xf32>
    %c46_i32_67 = arith.constant 46 : i32
    %208 = tpu.dynamic_rotate %2 by %c46_i32_67 dim 1 : vector<2x256xf32>, i32 -> vector<2x256xf32>
    %c5 = arith.constant 5 : index
    %209 = memref.load %arg2[%c5] : memref<98xf32, #tpu.memory_space<smem>>
    %210 = vector.broadcast %209 : f32 to vector<2x256xf32>
    %211 = arith.mulf %207, %210 : vector<2x256xf32>
    %c54 = arith.constant 54 : index
    %212 = memref.load %arg2[%c54] : memref<98xf32, #tpu.memory_space<smem>>
    %213 = vector.broadcast %212 : f32 to vector<2x256xf32>
    %214 = arith.mulf %208, %213 : vector<2x256xf32>
    %215 = arith.addf %211, %214 : vector<2x256xf32>
    %216 = arith.andi %13, %121 : vector<1x256xi1>
    %cst_68 = arith.constant 0.000000e+00 : f32
    %217 = vector.shape_cast %216 : vector<1x256xi1> to vector<1x256xi1>
    %218 = vector.broadcast %217 : vector<1x256xi1> to vector<2x256xi1>
    %219 = vector.broadcast %cst_68 : f32 to vector<2x256xf32>
    %220 = arith.select %218, %215, %219 : vector<2x256xi1>, vector<2x256xf32>
    %221 = arith.addf %206, %220 : vector<2x256xf32>
    %c45_i32 = arith.constant 45 : i32
    %222 = tpu.dynamic_rotate %1 by %c45_i32 dim 1 : vector<2x256xf32>, i32 -> vector<2x256xf32>
    %c45_i32_69 = arith.constant 45 : i32
    %223 = tpu.dynamic_rotate %2 by %c45_i32_69 dim 1 : vector<2x256xf32>, i32 -> vector<2x256xf32>
    %c6 = arith.constant 6 : index
    %224 = memref.load %arg2[%c6] : memref<98xf32, #tpu.memory_space<smem>>
    %225 = vector.broadcast %224 : f32 to vector<2x256xf32>
    %226 = arith.mulf %222, %225 : vector<2x256xf32>
    %c55 = arith.constant 55 : index
    %227 = memref.load %arg2[%c55] : memref<98xf32, #tpu.memory_space<smem>>
    %228 = vector.broadcast %227 : f32 to vector<2x256xf32>
    %229 = arith.mulf %223, %228 : vector<2x256xf32>
    %230 = arith.addf %226, %229 : vector<2x256xf32>
    %231 = arith.andi %13, %130 : vector<1x256xi1>
    %cst_70 = arith.constant 0.000000e+00 : f32
    %232 = vector.shape_cast %231 : vector<1x256xi1> to vector<1x256xi1>
    %233 = vector.broadcast %232 : vector<1x256xi1> to vector<2x256xi1>
    %234 = vector.broadcast %cst_70 : f32 to vector<2x256xf32>
    %235 = arith.select %233, %230, %234 : vector<2x256xi1>, vector<2x256xf32>
    %236 = arith.addf %221, %235 : vector<2x256xf32>
    %c35_i32 = arith.constant 35 : i32
    %237 = tpu.dynamic_rotate %1 by %c35_i32 dim 1 : vector<2x256xf32>, i32 -> vector<2x256xf32>
    %c35_i32_71 = arith.constant 35 : i32
    %238 = tpu.dynamic_rotate %2 by %c35_i32_71 dim 1 : vector<2x256xf32>, i32 -> vector<2x256xf32>
    %c7 = arith.constant 7 : index
    %239 = memref.load %arg2[%c7] : memref<98xf32, #tpu.memory_space<smem>>
    %240 = vector.broadcast %239 : f32 to vector<2x256xf32>
    %241 = arith.mulf %237, %240 : vector<2x256xf32>
    %c56 = arith.constant 56 : index
    %242 = memref.load %arg2[%c56] : memref<98xf32, #tpu.memory_space<smem>>
    %243 = vector.broadcast %242 : f32 to vector<2x256xf32>
    %244 = arith.mulf %238, %243 : vector<2x256xf32>
    %245 = arith.addf %241, %244 : vector<2x256xf32>
    %246 = arith.andi %22, %76 : vector<1x256xi1>
    %cst_72 = arith.constant 0.000000e+00 : f32
    %247 = vector.shape_cast %246 : vector<1x256xi1> to vector<1x256xi1>
    %248 = vector.broadcast %247 : vector<1x256xi1> to vector<2x256xi1>
    %249 = vector.broadcast %cst_72 : f32 to vector<2x256xf32>
    %250 = arith.select %248, %245, %249 : vector<2x256xi1>, vector<2x256xf32>
    %251 = arith.addf %236, %250 : vector<2x256xf32>
    %c34_i32 = arith.constant 34 : i32
    %252 = tpu.dynamic_rotate %1 by %c34_i32 dim 1 : vector<2x256xf32>, i32 -> vector<2x256xf32>
    %c34_i32_73 = arith.constant 34 : i32
    %253 = tpu.dynamic_rotate %2 by %c34_i32_73 dim 1 : vector<2x256xf32>, i32 -> vector<2x256xf32>
    %c8 = arith.constant 8 : index
    %254 = memref.load %arg2[%c8] : memref<98xf32, #tpu.memory_space<smem>>
    %255 = vector.broadcast %254 : f32 to vector<2x256xf32>
    %256 = arith.mulf %252, %255 : vector<2x256xf32>
    %c57 = arith.constant 57 : index
    %257 = memref.load %arg2[%c57] : memref<98xf32, #tpu.memory_space<smem>>
    %258 = vector.broadcast %257 : f32 to vector<2x256xf32>
    %259 = arith.mulf %253, %258 : vector<2x256xf32>
    %260 = arith.addf %256, %259 : vector<2x256xf32>
    %261 = arith.andi %22, %85 : vector<1x256xi1>
    %cst_74 = arith.constant 0.000000e+00 : f32
    %262 = vector.shape_cast %261 : vector<1x256xi1> to vector<1x256xi1>
    %263 = vector.broadcast %262 : vector<1x256xi1> to vector<2x256xi1>
    %264 = vector.broadcast %cst_74 : f32 to vector<2x256xf32>
    %265 = arith.select %263, %260, %264 : vector<2x256xi1>, vector<2x256xf32>
    %266 = arith.addf %251, %265 : vector<2x256xf32>
    %c33_i32 = arith.constant 33 : i32
    %267 = tpu.dynamic_rotate %1 by %c33_i32 dim 1 : vector<2x256xf32>, i32 -> vector<2x256xf32>
    %c33_i32_75 = arith.constant 33 : i32
    %268 = tpu.dynamic_rotate %2 by %c33_i32_75 dim 1 : vector<2x256xf32>, i32 -> vector<2x256xf32>
    %c9 = arith.constant 9 : index
    %269 = memref.load %arg2[%c9] : memref<98xf32, #tpu.memory_space<smem>>
    %270 = vector.broadcast %269 : f32 to vector<2x256xf32>
    %271 = arith.mulf %267, %270 : vector<2x256xf32>
    %c58 = arith.constant 58 : index
    %272 = memref.load %arg2[%c58] : memref<98xf32, #tpu.memory_space<smem>>
    %273 = vector.broadcast %272 : f32 to vector<2x256xf32>
    %274 = arith.mulf %268, %273 : vector<2x256xf32>
    %275 = arith.addf %271, %274 : vector<2x256xf32>
    %276 = arith.andi %22, %94 : vector<1x256xi1>
    %cst_76 = arith.constant 0.000000e+00 : f32
    %277 = vector.shape_cast %276 : vector<1x256xi1> to vector<1x256xi1>
    %278 = vector.broadcast %277 : vector<1x256xi1> to vector<2x256xi1>
    %279 = vector.broadcast %cst_76 : f32 to vector<2x256xf32>
    %280 = arith.select %278, %275, %279 : vector<2x256xi1>, vector<2x256xf32>
    %281 = arith.addf %266, %280 : vector<2x256xf32>
    %c32_i32 = arith.constant 32 : i32
    %282 = tpu.dynamic_rotate %1 by %c32_i32 dim 1 : vector<2x256xf32>, i32 -> vector<2x256xf32>
    %c32_i32_77 = arith.constant 32 : i32
    %283 = tpu.dynamic_rotate %2 by %c32_i32_77 dim 1 : vector<2x256xf32>, i32 -> vector<2x256xf32>
    %c10 = arith.constant 10 : index
    %284 = memref.load %arg2[%c10] : memref<98xf32, #tpu.memory_space<smem>>
    %285 = vector.broadcast %284 : f32 to vector<2x256xf32>
    %286 = arith.mulf %282, %285 : vector<2x256xf32>
    %c59 = arith.constant 59 : index
    %287 = memref.load %arg2[%c59] : memref<98xf32, #tpu.memory_space<smem>>
    %288 = vector.broadcast %287 : f32 to vector<2x256xf32>
    %289 = arith.mulf %283, %288 : vector<2x256xf32>
    %290 = arith.addf %286, %289 : vector<2x256xf32>
    %291 = arith.andi %22, %103 : vector<1x256xi1>
    %cst_78 = arith.constant 0.000000e+00 : f32
    %292 = vector.shape_cast %291 : vector<1x256xi1> to vector<1x256xi1>
    %293 = vector.broadcast %292 : vector<1x256xi1> to vector<2x256xi1>
    %294 = vector.broadcast %cst_78 : f32 to vector<2x256xf32>
    %295 = arith.select %293, %290, %294 : vector<2x256xi1>, vector<2x256xf32>
    %296 = arith.addf %281, %295 : vector<2x256xf32>
    %c31_i32 = arith.constant 31 : i32
    %297 = tpu.dynamic_rotate %1 by %c31_i32 dim 1 : vector<2x256xf32>, i32 -> vector<2x256xf32>
    %c31_i32_79 = arith.constant 31 : i32
    %298 = tpu.dynamic_rotate %2 by %c31_i32_79 dim 1 : vector<2x256xf32>, i32 -> vector<2x256xf32>
    %c11 = arith.constant 11 : index
    %299 = memref.load %arg2[%c11] : memref<98xf32, #tpu.memory_space<smem>>
    %300 = vector.broadcast %299 : f32 to vector<2x256xf32>
    %301 = arith.mulf %297, %300 : vector<2x256xf32>
    %c60 = arith.constant 60 : index
    %302 = memref.load %arg2[%c60] : memref<98xf32, #tpu.memory_space<smem>>
    %303 = vector.broadcast %302 : f32 to vector<2x256xf32>
    %304 = arith.mulf %298, %303 : vector<2x256xf32>
    %305 = arith.addf %301, %304 : vector<2x256xf32>
    %306 = arith.andi %22, %112 : vector<1x256xi1>
    %cst_80 = arith.constant 0.000000e+00 : f32
    %307 = vector.shape_cast %306 : vector<1x256xi1> to vector<1x256xi1>
    %308 = vector.broadcast %307 : vector<1x256xi1> to vector<2x256xi1>
    %309 = vector.broadcast %cst_80 : f32 to vector<2x256xf32>
    %310 = arith.select %308, %305, %309 : vector<2x256xi1>, vector<2x256xf32>
    %311 = arith.addf %296, %310 : vector<2x256xf32>
    %c30_i32 = arith.constant 30 : i32
    %312 = tpu.dynamic_rotate %1 by %c30_i32 dim 1 : vector<2x256xf32>, i32 -> vector<2x256xf32>
    %c30_i32_81 = arith.constant 30 : i32
    %313 = tpu.dynamic_rotate %2 by %c30_i32_81 dim 1 : vector<2x256xf32>, i32 -> vector<2x256xf32>
    %c12 = arith.constant 12 : index
    %314 = memref.load %arg2[%c12] : memref<98xf32, #tpu.memory_space<smem>>
    %315 = vector.broadcast %314 : f32 to vector<2x256xf32>
    %316 = arith.mulf %312, %315 : vector<2x256xf32>
    %c61 = arith.constant 61 : index
    %317 = memref.load %arg2[%c61] : memref<98xf32, #tpu.memory_space<smem>>
    %318 = vector.broadcast %317 : f32 to vector<2x256xf32>
    %319 = arith.mulf %313, %318 : vector<2x256xf32>
    %320 = arith.addf %316, %319 : vector<2x256xf32>
    %321 = arith.andi %22, %121 : vector<1x256xi1>
    %cst_82 = arith.constant 0.000000e+00 : f32
    %322 = vector.shape_cast %321 : vector<1x256xi1> to vector<1x256xi1>
    %323 = vector.broadcast %322 : vector<1x256xi1> to vector<2x256xi1>
    %324 = vector.broadcast %cst_82 : f32 to vector<2x256xf32>
    %325 = arith.select %323, %320, %324 : vector<2x256xi1>, vector<2x256xf32>
    %326 = arith.addf %311, %325 : vector<2x256xf32>
    %c29_i32 = arith.constant 29 : i32
    %327 = tpu.dynamic_rotate %1 by %c29_i32 dim 1 : vector<2x256xf32>, i32 -> vector<2x256xf32>
    %c29_i32_83 = arith.constant 29 : i32
    %328 = tpu.dynamic_rotate %2 by %c29_i32_83 dim 1 : vector<2x256xf32>, i32 -> vector<2x256xf32>
    %c13 = arith.constant 13 : index
    %329 = memref.load %arg2[%c13] : memref<98xf32, #tpu.memory_space<smem>>
    %330 = vector.broadcast %329 : f32 to vector<2x256xf32>
    %331 = arith.mulf %327, %330 : vector<2x256xf32>
    %c62 = arith.constant 62 : index
    %332 = memref.load %arg2[%c62] : memref<98xf32, #tpu.memory_space<smem>>
    %333 = vector.broadcast %332 : f32 to vector<2x256xf32>
    %334 = arith.mulf %328, %333 : vector<2x256xf32>
    %335 = arith.addf %331, %334 : vector<2x256xf32>
    %336 = arith.andi %22, %130 : vector<1x256xi1>
    %cst_84 = arith.constant 0.000000e+00 : f32
    %337 = vector.shape_cast %336 : vector<1x256xi1> to vector<1x256xi1>
    %338 = vector.broadcast %337 : vector<1x256xi1> to vector<2x256xi1>
    %339 = vector.broadcast %cst_84 : f32 to vector<2x256xf32>
    %340 = arith.select %338, %335, %339 : vector<2x256xi1>, vector<2x256xf32>
    %341 = arith.addf %326, %340 : vector<2x256xf32>
    %c19_i32 = arith.constant 19 : i32
    %342 = tpu.dynamic_rotate %1 by %c19_i32 dim 1 : vector<2x256xf32>, i32 -> vector<2x256xf32>
    %c19_i32_85 = arith.constant 19 : i32
    %343 = tpu.dynamic_rotate %2 by %c19_i32_85 dim 1 : vector<2x256xf32>, i32 -> vector<2x256xf32>
    %c14 = arith.constant 14 : index
    %344 = memref.load %arg2[%c14] : memref<98xf32, #tpu.memory_space<smem>>
    %345 = vector.broadcast %344 : f32 to vector<2x256xf32>
    %346 = arith.mulf %342, %345 : vector<2x256xf32>
    %c63 = arith.constant 63 : index
    %347 = memref.load %arg2[%c63] : memref<98xf32, #tpu.memory_space<smem>>
    %348 = vector.broadcast %347 : f32 to vector<2x256xf32>
    %349 = arith.mulf %343, %348 : vector<2x256xf32>
    %350 = arith.addf %346, %349 : vector<2x256xf32>
    %351 = arith.andi %31, %76 : vector<1x256xi1>
    %cst_86 = arith.constant 0.000000e+00 : f32
    %352 = vector.shape_cast %351 : vector<1x256xi1> to vector<1x256xi1>
    %353 = vector.broadcast %352 : vector<1x256xi1> to vector<2x256xi1>
    %354 = vector.broadcast %cst_86 : f32 to vector<2x256xf32>
    %355 = arith.select %353, %350, %354 : vector<2x256xi1>, vector<2x256xf32>
    %356 = arith.addf %341, %355 : vector<2x256xf32>
    %c18_i32 = arith.constant 18 : i32
    %357 = tpu.dynamic_rotate %1 by %c18_i32 dim 1 : vector<2x256xf32>, i32 -> vector<2x256xf32>
    %c18_i32_87 = arith.constant 18 : i32
    %358 = tpu.dynamic_rotate %2 by %c18_i32_87 dim 1 : vector<2x256xf32>, i32 -> vector<2x256xf32>
    %c15 = arith.constant 15 : index
    %359 = memref.load %arg2[%c15] : memref<98xf32, #tpu.memory_space<smem>>
    %360 = vector.broadcast %359 : f32 to vector<2x256xf32>
    %361 = arith.mulf %357, %360 : vector<2x256xf32>
    %c64 = arith.constant 64 : index
    %362 = memref.load %arg2[%c64] : memref<98xf32, #tpu.memory_space<smem>>
    %363 = vector.broadcast %362 : f32 to vector<2x256xf32>
    %364 = arith.mulf %358, %363 : vector<2x256xf32>
    %365 = arith.addf %361, %364 : vector<2x256xf32>
    %366 = arith.andi %31, %85 : vector<1x256xi1>
    %cst_88 = arith.constant 0.000000e+00 : f32
    %367 = vector.shape_cast %366 : vector<1x256xi1> to vector<1x256xi1>
    %368 = vector.broadcast %367 : vector<1x256xi1> to vector<2x256xi1>
    %369 = vector.broadcast %cst_88 : f32 to vector<2x256xf32>
    %370 = arith.select %368, %365, %369 : vector<2x256xi1>, vector<2x256xf32>
    %371 = arith.addf %356, %370 : vector<2x256xf32>
    %c17_i32 = arith.constant 17 : i32
    %372 = tpu.dynamic_rotate %1 by %c17_i32 dim 1 : vector<2x256xf32>, i32 -> vector<2x256xf32>
    %c17_i32_89 = arith.constant 17 : i32
    %373 = tpu.dynamic_rotate %2 by %c17_i32_89 dim 1 : vector<2x256xf32>, i32 -> vector<2x256xf32>
    %c16 = arith.constant 16 : index
    %374 = memref.load %arg2[%c16] : memref<98xf32, #tpu.memory_space<smem>>
    %375 = vector.broadcast %374 : f32 to vector<2x256xf32>
    %376 = arith.mulf %372, %375 : vector<2x256xf32>
    %c65 = arith.constant 65 : index
    %377 = memref.load %arg2[%c65] : memref<98xf32, #tpu.memory_space<smem>>
    %378 = vector.broadcast %377 : f32 to vector<2x256xf32>
    %379 = arith.mulf %373, %378 : vector<2x256xf32>
    %380 = arith.addf %376, %379 : vector<2x256xf32>
    %381 = arith.andi %31, %94 : vector<1x256xi1>
    %cst_90 = arith.constant 0.000000e+00 : f32
    %382 = vector.shape_cast %381 : vector<1x256xi1> to vector<1x256xi1>
    %383 = vector.broadcast %382 : vector<1x256xi1> to vector<2x256xi1>
    %384 = vector.broadcast %cst_90 : f32 to vector<2x256xf32>
    %385 = arith.select %383, %380, %384 : vector<2x256xi1>, vector<2x256xf32>
    %386 = arith.addf %371, %385 : vector<2x256xf32>
    %c16_i32_91 = arith.constant 16 : i32
    %387 = tpu.dynamic_rotate %1 by %c16_i32_91 dim 1 : vector<2x256xf32>, i32 -> vector<2x256xf32>
    %c16_i32_92 = arith.constant 16 : i32
    %388 = tpu.dynamic_rotate %2 by %c16_i32_92 dim 1 : vector<2x256xf32>, i32 -> vector<2x256xf32>
    %c17 = arith.constant 17 : index
    %389 = memref.load %arg2[%c17] : memref<98xf32, #tpu.memory_space<smem>>
    %390 = vector.broadcast %389 : f32 to vector<2x256xf32>
    %391 = arith.mulf %387, %390 : vector<2x256xf32>
    %c66 = arith.constant 66 : index
    %392 = memref.load %arg2[%c66] : memref<98xf32, #tpu.memory_space<smem>>
    %393 = vector.broadcast %392 : f32 to vector<2x256xf32>
    %394 = arith.mulf %388, %393 : vector<2x256xf32>
    %395 = arith.addf %391, %394 : vector<2x256xf32>
    %396 = arith.andi %31, %103 : vector<1x256xi1>
    %cst_93 = arith.constant 0.000000e+00 : f32
    %397 = vector.shape_cast %396 : vector<1x256xi1> to vector<1x256xi1>
    %398 = vector.broadcast %397 : vector<1x256xi1> to vector<2x256xi1>
    %399 = vector.broadcast %cst_93 : f32 to vector<2x256xf32>
    %400 = arith.select %398, %395, %399 : vector<2x256xi1>, vector<2x256xf32>
    %401 = arith.addf %386, %400 : vector<2x256xf32>
    %c15_i32 = arith.constant 15 : i32
    %402 = tpu.dynamic_rotate %1 by %c15_i32 dim 1 : vector<2x256xf32>, i32 -> vector<2x256xf32>
    %c15_i32_94 = arith.constant 15 : i32
    %403 = tpu.dynamic_rotate %2 by %c15_i32_94 dim 1 : vector<2x256xf32>, i32 -> vector<2x256xf32>
    %c18 = arith.constant 18 : index
    %404 = memref.load %arg2[%c18] : memref<98xf32, #tpu.memory_space<smem>>
    %405 = vector.broadcast %404 : f32 to vector<2x256xf32>
    %406 = arith.mulf %402, %405 : vector<2x256xf32>
    %c67 = arith.constant 67 : index
    %407 = memref.load %arg2[%c67] : memref<98xf32, #tpu.memory_space<smem>>
    %408 = vector.broadcast %407 : f32 to vector<2x256xf32>
    %409 = arith.mulf %403, %408 : vector<2x256xf32>
    %410 = arith.addf %406, %409 : vector<2x256xf32>
    %411 = arith.andi %31, %112 : vector<1x256xi1>
    %cst_95 = arith.constant 0.000000e+00 : f32
    %412 = vector.shape_cast %411 : vector<1x256xi1> to vector<1x256xi1>
    %413 = vector.broadcast %412 : vector<1x256xi1> to vector<2x256xi1>
    %414 = vector.broadcast %cst_95 : f32 to vector<2x256xf32>
    %415 = arith.select %413, %410, %414 : vector<2x256xi1>, vector<2x256xf32>
    %416 = arith.addf %401, %415 : vector<2x256xf32>
    %c14_i32 = arith.constant 14 : i32
    %417 = tpu.dynamic_rotate %1 by %c14_i32 dim 1 : vector<2x256xf32>, i32 -> vector<2x256xf32>
    %c14_i32_96 = arith.constant 14 : i32
    %418 = tpu.dynamic_rotate %2 by %c14_i32_96 dim 1 : vector<2x256xf32>, i32 -> vector<2x256xf32>
    %c19 = arith.constant 19 : index
    %419 = memref.load %arg2[%c19] : memref<98xf32, #tpu.memory_space<smem>>
    %420 = vector.broadcast %419 : f32 to vector<2x256xf32>
    %421 = arith.mulf %417, %420 : vector<2x256xf32>
    %c68 = arith.constant 68 : index
    %422 = memref.load %arg2[%c68] : memref<98xf32, #tpu.memory_space<smem>>
    %423 = vector.broadcast %422 : f32 to vector<2x256xf32>
    %424 = arith.mulf %418, %423 : vector<2x256xf32>
    %425 = arith.addf %421, %424 : vector<2x256xf32>
    %426 = arith.andi %31, %121 : vector<1x256xi1>
    %cst_97 = arith.constant 0.000000e+00 : f32
    %427 = vector.shape_cast %426 : vector<1x256xi1> to vector<1x256xi1>
    %428 = vector.broadcast %427 : vector<1x256xi1> to vector<2x256xi1>
    %429 = vector.broadcast %cst_97 : f32 to vector<2x256xf32>
    %430 = arith.select %428, %425, %429 : vector<2x256xi1>, vector<2x256xf32>
    %431 = arith.addf %416, %430 : vector<2x256xf32>
    %c13_i32 = arith.constant 13 : i32
    %432 = tpu.dynamic_rotate %1 by %c13_i32 dim 1 : vector<2x256xf32>, i32 -> vector<2x256xf32>
    %c13_i32_98 = arith.constant 13 : i32
    %433 = tpu.dynamic_rotate %2 by %c13_i32_98 dim 1 : vector<2x256xf32>, i32 -> vector<2x256xf32>
    %c20 = arith.constant 20 : index
    %434 = memref.load %arg2[%c20] : memref<98xf32, #tpu.memory_space<smem>>
    %435 = vector.broadcast %434 : f32 to vector<2x256xf32>
    %436 = arith.mulf %432, %435 : vector<2x256xf32>
    %c69 = arith.constant 69 : index
    %437 = memref.load %arg2[%c69] : memref<98xf32, #tpu.memory_space<smem>>
    %438 = vector.broadcast %437 : f32 to vector<2x256xf32>
    %439 = arith.mulf %433, %438 : vector<2x256xf32>
    %440 = arith.addf %436, %439 : vector<2x256xf32>
    %441 = arith.andi %31, %130 : vector<1x256xi1>
    %cst_99 = arith.constant 0.000000e+00 : f32
    %442 = vector.shape_cast %441 : vector<1x256xi1> to vector<1x256xi1>
    %443 = vector.broadcast %442 : vector<1x256xi1> to vector<2x256xi1>
    %444 = vector.broadcast %cst_99 : f32 to vector<2x256xf32>
    %445 = arith.select %443, %440, %444 : vector<2x256xi1>, vector<2x256xf32>
    %446 = arith.addf %431, %445 : vector<2x256xf32>
    %c3_i32_100 = arith.constant 3 : i32
    %447 = tpu.dynamic_rotate %1 by %c3_i32_100 dim 1 : vector<2x256xf32>, i32 -> vector<2x256xf32>
    %c3_i32_101 = arith.constant 3 : i32
    %448 = tpu.dynamic_rotate %2 by %c3_i32_101 dim 1 : vector<2x256xf32>, i32 -> vector<2x256xf32>
    %c21 = arith.constant 21 : index
    %449 = memref.load %arg2[%c21] : memref<98xf32, #tpu.memory_space<smem>>
    %450 = vector.broadcast %449 : f32 to vector<2x256xf32>
    %451 = arith.mulf %447, %450 : vector<2x256xf32>
    %c70 = arith.constant 70 : index
    %452 = memref.load %arg2[%c70] : memref<98xf32, #tpu.memory_space<smem>>
    %453 = vector.broadcast %452 : f32 to vector<2x256xf32>
    %454 = arith.mulf %448, %453 : vector<2x256xf32>
    %455 = arith.addf %451, %454 : vector<2x256xf32>
    %456 = arith.andi %40, %76 : vector<1x256xi1>
    %cst_102 = arith.constant 0.000000e+00 : f32
    %457 = vector.shape_cast %456 : vector<1x256xi1> to vector<1x256xi1>
    %458 = vector.broadcast %457 : vector<1x256xi1> to vector<2x256xi1>
    %459 = vector.broadcast %cst_102 : f32 to vector<2x256xf32>
    %460 = arith.select %458, %455, %459 : vector<2x256xi1>, vector<2x256xf32>
    %461 = arith.addf %446, %460 : vector<2x256xf32>
    %c2_i32_103 = arith.constant 2 : i32
    %462 = tpu.dynamic_rotate %1 by %c2_i32_103 dim 1 : vector<2x256xf32>, i32 -> vector<2x256xf32>
    %c2_i32_104 = arith.constant 2 : i32
    %463 = tpu.dynamic_rotate %2 by %c2_i32_104 dim 1 : vector<2x256xf32>, i32 -> vector<2x256xf32>
    %c22 = arith.constant 22 : index
    %464 = memref.load %arg2[%c22] : memref<98xf32, #tpu.memory_space<smem>>
    %465 = vector.broadcast %464 : f32 to vector<2x256xf32>
    %466 = arith.mulf %462, %465 : vector<2x256xf32>
    %c71 = arith.constant 71 : index
    %467 = memref.load %arg2[%c71] : memref<98xf32, #tpu.memory_space<smem>>
    %468 = vector.broadcast %467 : f32 to vector<2x256xf32>
    %469 = arith.mulf %463, %468 : vector<2x256xf32>
    %470 = arith.addf %466, %469 : vector<2x256xf32>
    %471 = arith.andi %40, %85 : vector<1x256xi1>
    %cst_105 = arith.constant 0.000000e+00 : f32
    %472 = vector.shape_cast %471 : vector<1x256xi1> to vector<1x256xi1>
    %473 = vector.broadcast %472 : vector<1x256xi1> to vector<2x256xi1>
    %474 = vector.broadcast %cst_105 : f32 to vector<2x256xf32>
    %475 = arith.select %473, %470, %474 : vector<2x256xi1>, vector<2x256xf32>
    %476 = arith.addf %461, %475 : vector<2x256xf32>
    %c1_i32_106 = arith.constant 1 : i32
    %477 = tpu.dynamic_rotate %1 by %c1_i32_106 dim 1 : vector<2x256xf32>, i32 -> vector<2x256xf32>
    %c1_i32_107 = arith.constant 1 : i32
    %478 = tpu.dynamic_rotate %2 by %c1_i32_107 dim 1 : vector<2x256xf32>, i32 -> vector<2x256xf32>
    %c23 = arith.constant 23 : index
    %479 = memref.load %arg2[%c23] : memref<98xf32, #tpu.memory_space<smem>>
    %480 = vector.broadcast %479 : f32 to vector<2x256xf32>
    %481 = arith.mulf %477, %480 : vector<2x256xf32>
    %c72 = arith.constant 72 : index
    %482 = memref.load %arg2[%c72] : memref<98xf32, #tpu.memory_space<smem>>
    %483 = vector.broadcast %482 : f32 to vector<2x256xf32>
    %484 = arith.mulf %478, %483 : vector<2x256xf32>
    %485 = arith.addf %481, %484 : vector<2x256xf32>
    %486 = arith.andi %40, %94 : vector<1x256xi1>
    %cst_108 = arith.constant 0.000000e+00 : f32
    %487 = vector.shape_cast %486 : vector<1x256xi1> to vector<1x256xi1>
    %488 = vector.broadcast %487 : vector<1x256xi1> to vector<2x256xi1>
    %489 = vector.broadcast %cst_108 : f32 to vector<2x256xf32>
    %490 = arith.select %488, %485, %489 : vector<2x256xi1>, vector<2x256xf32>
    %491 = arith.addf %476, %490 : vector<2x256xf32>
    %c24 = arith.constant 24 : index
    %492 = memref.load %arg2[%c24] : memref<98xf32, #tpu.memory_space<smem>>
    %493 = vector.broadcast %492 : f32 to vector<2x256xf32>
    %494 = arith.mulf %1, %493 : vector<2x256xf32>
    %c73 = arith.constant 73 : index
    %495 = memref.load %arg2[%c73] : memref<98xf32, #tpu.memory_space<smem>>
    %496 = vector.broadcast %495 : f32 to vector<2x256xf32>
    %497 = arith.mulf %2, %496 : vector<2x256xf32>
    %498 = arith.addf %494, %497 : vector<2x256xf32>
    %499 = arith.andi %40, %103 : vector<1x256xi1>
    %cst_109 = arith.constant 0.000000e+00 : f32
    %500 = vector.shape_cast %499 : vector<1x256xi1> to vector<1x256xi1>
    %501 = vector.broadcast %500 : vector<1x256xi1> to vector<2x256xi1>
    %502 = vector.broadcast %cst_109 : f32 to vector<2x256xf32>
    %503 = arith.select %501, %498, %502 : vector<2x256xi1>, vector<2x256xf32>
    %504 = arith.addf %491, %503 : vector<2x256xf32>
    %c255_i32 = arith.constant 255 : i32
    %505 = tpu.dynamic_rotate %1 by %c255_i32 dim 1 : vector<2x256xf32>, i32 -> vector<2x256xf32>
    %c255_i32_110 = arith.constant 255 : i32
    %506 = tpu.dynamic_rotate %2 by %c255_i32_110 dim 1 : vector<2x256xf32>, i32 -> vector<2x256xf32>
    %c25 = arith.constant 25 : index
    %507 = memref.load %arg2[%c25] : memref<98xf32, #tpu.memory_space<smem>>
    %508 = vector.broadcast %507 : f32 to vector<2x256xf32>
    %509 = arith.mulf %505, %508 : vector<2x256xf32>
    %c74 = arith.constant 74 : index
    %510 = memref.load %arg2[%c74] : memref<98xf32, #tpu.memory_space<smem>>
    %511 = vector.broadcast %510 : f32 to vector<2x256xf32>
    %512 = arith.mulf %506, %511 : vector<2x256xf32>
    %513 = arith.addf %509, %512 : vector<2x256xf32>
    %514 = arith.andi %40, %112 : vector<1x256xi1>
    %cst_111 = arith.constant 0.000000e+00 : f32
    %515 = vector.shape_cast %514 : vector<1x256xi1> to vector<1x256xi1>
    %516 = vector.broadcast %515 : vector<1x256xi1> to vector<2x256xi1>
    %517 = vector.broadcast %cst_111 : f32 to vector<2x256xf32>
    %518 = arith.select %516, %513, %517 : vector<2x256xi1>, vector<2x256xf32>
    %519 = arith.addf %504, %518 : vector<2x256xf32>
    %c254_i32 = arith.constant 254 : i32
    %520 = tpu.dynamic_rotate %1 by %c254_i32 dim 1 : vector<2x256xf32>, i32 -> vector<2x256xf32>
    %c254_i32_112 = arith.constant 254 : i32
    %521 = tpu.dynamic_rotate %2 by %c254_i32_112 dim 1 : vector<2x256xf32>, i32 -> vector<2x256xf32>
    %c26 = arith.constant 26 : index
    %522 = memref.load %arg2[%c26] : memref<98xf32, #tpu.memory_space<smem>>
    %523 = vector.broadcast %522 : f32 to vector<2x256xf32>
    %524 = arith.mulf %520, %523 : vector<2x256xf32>
    %c75 = arith.constant 75 : index
    %525 = memref.load %arg2[%c75] : memref<98xf32, #tpu.memory_space<smem>>
    %526 = vector.broadcast %525 : f32 to vector<2x256xf32>
    %527 = arith.mulf %521, %526 : vector<2x256xf32>
    %528 = arith.addf %524, %527 : vector<2x256xf32>
    %529 = arith.andi %40, %121 : vector<1x256xi1>
    %cst_113 = arith.constant 0.000000e+00 : f32
    %530 = vector.shape_cast %529 : vector<1x256xi1> to vector<1x256xi1>
    %531 = vector.broadcast %530 : vector<1x256xi1> to vector<2x256xi1>
    %532 = vector.broadcast %cst_113 : f32 to vector<2x256xf32>
    %533 = arith.select %531, %528, %532 : vector<2x256xi1>, vector<2x256xf32>
    %534 = arith.addf %519, %533 : vector<2x256xf32>
    %c253_i32 = arith.constant 253 : i32
    %535 = tpu.dynamic_rotate %1 by %c253_i32 dim 1 : vector<2x256xf32>, i32 -> vector<2x256xf32>
    %c253_i32_114 = arith.constant 253 : i32
    %536 = tpu.dynamic_rotate %2 by %c253_i32_114 dim 1 : vector<2x256xf32>, i32 -> vector<2x256xf32>
    %c27 = arith.constant 27 : index
    %537 = memref.load %arg2[%c27] : memref<98xf32, #tpu.memory_space<smem>>
    %538 = vector.broadcast %537 : f32 to vector<2x256xf32>
    %539 = arith.mulf %535, %538 : vector<2x256xf32>
    %c76 = arith.constant 76 : index
    %540 = memref.load %arg2[%c76] : memref<98xf32, #tpu.memory_space<smem>>
    %541 = vector.broadcast %540 : f32 to vector<2x256xf32>
    %542 = arith.mulf %536, %541 : vector<2x256xf32>
    %543 = arith.addf %539, %542 : vector<2x256xf32>
    %544 = arith.andi %40, %130 : vector<1x256xi1>
    %cst_115 = arith.constant 0.000000e+00 : f32
    %545 = vector.shape_cast %544 : vector<1x256xi1> to vector<1x256xi1>
    %546 = vector.broadcast %545 : vector<1x256xi1> to vector<2x256xi1>
    %547 = vector.broadcast %cst_115 : f32 to vector<2x256xf32>
    %548 = arith.select %546, %543, %547 : vector<2x256xi1>, vector<2x256xf32>
    %549 = arith.addf %534, %548 : vector<2x256xf32>
    %c243_i32 = arith.constant 243 : i32
    %550 = tpu.dynamic_rotate %1 by %c243_i32 dim 1 : vector<2x256xf32>, i32 -> vector<2x256xf32>
    %c243_i32_116 = arith.constant 243 : i32
    %551 = tpu.dynamic_rotate %2 by %c243_i32_116 dim 1 : vector<2x256xf32>, i32 -> vector<2x256xf32>
    %c28 = arith.constant 28 : index
    %552 = memref.load %arg2[%c28] : memref<98xf32, #tpu.memory_space<smem>>
    %553 = vector.broadcast %552 : f32 to vector<2x256xf32>
    %554 = arith.mulf %550, %553 : vector<2x256xf32>
    %c77 = arith.constant 77 : index
    %555 = memref.load %arg2[%c77] : memref<98xf32, #tpu.memory_space<smem>>
    %556 = vector.broadcast %555 : f32 to vector<2x256xf32>
    %557 = arith.mulf %551, %556 : vector<2x256xf32>
    %558 = arith.addf %554, %557 : vector<2x256xf32>
    %559 = arith.andi %49, %76 : vector<1x256xi1>
    %cst_117 = arith.constant 0.000000e+00 : f32
    %560 = vector.shape_cast %559 : vector<1x256xi1> to vector<1x256xi1>
    %561 = vector.broadcast %560 : vector<1x256xi1> to vector<2x256xi1>
    %562 = vector.broadcast %cst_117 : f32 to vector<2x256xf32>
    %563 = arith.select %561, %558, %562 : vector<2x256xi1>, vector<2x256xf32>
    %564 = arith.addf %549, %563 : vector<2x256xf32>
    %c242_i32 = arith.constant 242 : i32
    %565 = tpu.dynamic_rotate %1 by %c242_i32 dim 1 : vector<2x256xf32>, i32 -> vector<2x256xf32>
    %c242_i32_118 = arith.constant 242 : i32
    %566 = tpu.dynamic_rotate %2 by %c242_i32_118 dim 1 : vector<2x256xf32>, i32 -> vector<2x256xf32>
    %c29 = arith.constant 29 : index
    %567 = memref.load %arg2[%c29] : memref<98xf32, #tpu.memory_space<smem>>
    %568 = vector.broadcast %567 : f32 to vector<2x256xf32>
    %569 = arith.mulf %565, %568 : vector<2x256xf32>
    %c78 = arith.constant 78 : index
    %570 = memref.load %arg2[%c78] : memref<98xf32, #tpu.memory_space<smem>>
    %571 = vector.broadcast %570 : f32 to vector<2x256xf32>
    %572 = arith.mulf %566, %571 : vector<2x256xf32>
    %573 = arith.addf %569, %572 : vector<2x256xf32>
    %574 = arith.andi %49, %85 : vector<1x256xi1>
    %cst_119 = arith.constant 0.000000e+00 : f32
    %575 = vector.shape_cast %574 : vector<1x256xi1> to vector<1x256xi1>
    %576 = vector.broadcast %575 : vector<1x256xi1> to vector<2x256xi1>
    %577 = vector.broadcast %cst_119 : f32 to vector<2x256xf32>
    %578 = arith.select %576, %573, %577 : vector<2x256xi1>, vector<2x256xf32>
    %579 = arith.addf %564, %578 : vector<2x256xf32>
    %c241_i32 = arith.constant 241 : i32
    %580 = tpu.dynamic_rotate %1 by %c241_i32 dim 1 : vector<2x256xf32>, i32 -> vector<2x256xf32>
    %c241_i32_120 = arith.constant 241 : i32
    %581 = tpu.dynamic_rotate %2 by %c241_i32_120 dim 1 : vector<2x256xf32>, i32 -> vector<2x256xf32>
    %c30 = arith.constant 30 : index
    %582 = memref.load %arg2[%c30] : memref<98xf32, #tpu.memory_space<smem>>
    %583 = vector.broadcast %582 : f32 to vector<2x256xf32>
    %584 = arith.mulf %580, %583 : vector<2x256xf32>
    %c79 = arith.constant 79 : index
    %585 = memref.load %arg2[%c79] : memref<98xf32, #tpu.memory_space<smem>>
    %586 = vector.broadcast %585 : f32 to vector<2x256xf32>
    %587 = arith.mulf %581, %586 : vector<2x256xf32>
    %588 = arith.addf %584, %587 : vector<2x256xf32>
    %589 = arith.andi %49, %94 : vector<1x256xi1>
    %cst_121 = arith.constant 0.000000e+00 : f32
    %590 = vector.shape_cast %589 : vector<1x256xi1> to vector<1x256xi1>
    %591 = vector.broadcast %590 : vector<1x256xi1> to vector<2x256xi1>
    %592 = vector.broadcast %cst_121 : f32 to vector<2x256xf32>
    %593 = arith.select %591, %588, %592 : vector<2x256xi1>, vector<2x256xf32>
    %594 = arith.addf %579, %593 : vector<2x256xf32>
    %c240_i32 = arith.constant 240 : i32
    %595 = tpu.dynamic_rotate %1 by %c240_i32 dim 1 : vector<2x256xf32>, i32 -> vector<2x256xf32>
    %c240_i32_122 = arith.constant 240 : i32
    %596 = tpu.dynamic_rotate %2 by %c240_i32_122 dim 1 : vector<2x256xf32>, i32 -> vector<2x256xf32>
    %c31 = arith.constant 31 : index
    %597 = memref.load %arg2[%c31] : memref<98xf32, #tpu.memory_space<smem>>
    %598 = vector.broadcast %597 : f32 to vector<2x256xf32>
    %599 = arith.mulf %595, %598 : vector<2x256xf32>
    %c80 = arith.constant 80 : index
    %600 = memref.load %arg2[%c80] : memref<98xf32, #tpu.memory_space<smem>>
    %601 = vector.broadcast %600 : f32 to vector<2x256xf32>
    %602 = arith.mulf %596, %601 : vector<2x256xf32>
    %603 = arith.addf %599, %602 : vector<2x256xf32>
    %604 = arith.andi %49, %103 : vector<1x256xi1>
    %cst_123 = arith.constant 0.000000e+00 : f32
    %605 = vector.shape_cast %604 : vector<1x256xi1> to vector<1x256xi1>
    %606 = vector.broadcast %605 : vector<1x256xi1> to vector<2x256xi1>
    %607 = vector.broadcast %cst_123 : f32 to vector<2x256xf32>
    %608 = arith.select %606, %603, %607 : vector<2x256xi1>, vector<2x256xf32>
    %609 = arith.addf %594, %608 : vector<2x256xf32>
    %c239_i32 = arith.constant 239 : i32
    %610 = tpu.dynamic_rotate %1 by %c239_i32 dim 1 : vector<2x256xf32>, i32 -> vector<2x256xf32>
    %c239_i32_124 = arith.constant 239 : i32
    %611 = tpu.dynamic_rotate %2 by %c239_i32_124 dim 1 : vector<2x256xf32>, i32 -> vector<2x256xf32>
    %c32 = arith.constant 32 : index
    %612 = memref.load %arg2[%c32] : memref<98xf32, #tpu.memory_space<smem>>
    %613 = vector.broadcast %612 : f32 to vector<2x256xf32>
    %614 = arith.mulf %610, %613 : vector<2x256xf32>
    %c81 = arith.constant 81 : index
    %615 = memref.load %arg2[%c81] : memref<98xf32, #tpu.memory_space<smem>>
    %616 = vector.broadcast %615 : f32 to vector<2x256xf32>
    %617 = arith.mulf %611, %616 : vector<2x256xf32>
    %618 = arith.addf %614, %617 : vector<2x256xf32>
    %619 = arith.andi %49, %112 : vector<1x256xi1>
    %cst_125 = arith.constant 0.000000e+00 : f32
    %620 = vector.shape_cast %619 : vector<1x256xi1> to vector<1x256xi1>
    %621 = vector.broadcast %620 : vector<1x256xi1> to vector<2x256xi1>
    %622 = vector.broadcast %cst_125 : f32 to vector<2x256xf32>
    %623 = arith.select %621, %618, %622 : vector<2x256xi1>, vector<2x256xf32>
    %624 = arith.addf %609, %623 : vector<2x256xf32>
    %c238_i32 = arith.constant 238 : i32
    %625 = tpu.dynamic_rotate %1 by %c238_i32 dim 1 : vector<2x256xf32>, i32 -> vector<2x256xf32>
    %c238_i32_126 = arith.constant 238 : i32
    %626 = tpu.dynamic_rotate %2 by %c238_i32_126 dim 1 : vector<2x256xf32>, i32 -> vector<2x256xf32>
    %c33 = arith.constant 33 : index
    %627 = memref.load %arg2[%c33] : memref<98xf32, #tpu.memory_space<smem>>
    %628 = vector.broadcast %627 : f32 to vector<2x256xf32>
    %629 = arith.mulf %625, %628 : vector<2x256xf32>
    %c82 = arith.constant 82 : index
    %630 = memref.load %arg2[%c82] : memref<98xf32, #tpu.memory_space<smem>>
    %631 = vector.broadcast %630 : f32 to vector<2x256xf32>
    %632 = arith.mulf %626, %631 : vector<2x256xf32>
    %633 = arith.addf %629, %632 : vector<2x256xf32>
    %634 = arith.andi %49, %121 : vector<1x256xi1>
    %cst_127 = arith.constant 0.000000e+00 : f32
    %635 = vector.shape_cast %634 : vector<1x256xi1> to vector<1x256xi1>
    %636 = vector.broadcast %635 : vector<1x256xi1> to vector<2x256xi1>
    %637 = vector.broadcast %cst_127 : f32 to vector<2x256xf32>
    %638 = arith.select %636, %633, %637 : vector<2x256xi1>, vector<2x256xf32>
    %639 = arith.addf %624, %638 : vector<2x256xf32>
    %c237_i32 = arith.constant 237 : i32
    %640 = tpu.dynamic_rotate %1 by %c237_i32 dim 1 : vector<2x256xf32>, i32 -> vector<2x256xf32>
    %c237_i32_128 = arith.constant 237 : i32
    %641 = tpu.dynamic_rotate %2 by %c237_i32_128 dim 1 : vector<2x256xf32>, i32 -> vector<2x256xf32>
    %c34 = arith.constant 34 : index
    %642 = memref.load %arg2[%c34] : memref<98xf32, #tpu.memory_space<smem>>
    %643 = vector.broadcast %642 : f32 to vector<2x256xf32>
    %644 = arith.mulf %640, %643 : vector<2x256xf32>
    %c83 = arith.constant 83 : index
    %645 = memref.load %arg2[%c83] : memref<98xf32, #tpu.memory_space<smem>>
    %646 = vector.broadcast %645 : f32 to vector<2x256xf32>
    %647 = arith.mulf %641, %646 : vector<2x256xf32>
    %648 = arith.addf %644, %647 : vector<2x256xf32>
    %649 = arith.andi %49, %130 : vector<1x256xi1>
    %cst_129 = arith.constant 0.000000e+00 : f32
    %650 = vector.shape_cast %649 : vector<1x256xi1> to vector<1x256xi1>
    %651 = vector.broadcast %650 : vector<1x256xi1> to vector<2x256xi1>
    %652 = vector.broadcast %cst_129 : f32 to vector<2x256xf32>
    %653 = arith.select %651, %648, %652 : vector<2x256xi1>, vector<2x256xf32>
    %654 = arith.addf %639, %653 : vector<2x256xf32>
    %c227_i32 = arith.constant 227 : i32
    %655 = tpu.dynamic_rotate %1 by %c227_i32 dim 1 : vector<2x256xf32>, i32 -> vector<2x256xf32>
    %c227_i32_130 = arith.constant 227 : i32
    %656 = tpu.dynamic_rotate %2 by %c227_i32_130 dim 1 : vector<2x256xf32>, i32 -> vector<2x256xf32>
    %c35 = arith.constant 35 : index
    %657 = memref.load %arg2[%c35] : memref<98xf32, #tpu.memory_space<smem>>
    %658 = vector.broadcast %657 : f32 to vector<2x256xf32>
    %659 = arith.mulf %655, %658 : vector<2x256xf32>
    %c84 = arith.constant 84 : index
    %660 = memref.load %arg2[%c84] : memref<98xf32, #tpu.memory_space<smem>>
    %661 = vector.broadcast %660 : f32 to vector<2x256xf32>
    %662 = arith.mulf %656, %661 : vector<2x256xf32>
    %663 = arith.addf %659, %662 : vector<2x256xf32>
    %664 = arith.andi %58, %76 : vector<1x256xi1>
    %cst_131 = arith.constant 0.000000e+00 : f32
    %665 = vector.shape_cast %664 : vector<1x256xi1> to vector<1x256xi1>
    %666 = vector.broadcast %665 : vector<1x256xi1> to vector<2x256xi1>
    %667 = vector.broadcast %cst_131 : f32 to vector<2x256xf32>
    %668 = arith.select %666, %663, %667 : vector<2x256xi1>, vector<2x256xf32>
    %669 = arith.addf %654, %668 : vector<2x256xf32>
    %c226_i32 = arith.constant 226 : i32
    %670 = tpu.dynamic_rotate %1 by %c226_i32 dim 1 : vector<2x256xf32>, i32 -> vector<2x256xf32>
    %c226_i32_132 = arith.constant 226 : i32
    %671 = tpu.dynamic_rotate %2 by %c226_i32_132 dim 1 : vector<2x256xf32>, i32 -> vector<2x256xf32>
    %c36 = arith.constant 36 : index
    %672 = memref.load %arg2[%c36] : memref<98xf32, #tpu.memory_space<smem>>
    %673 = vector.broadcast %672 : f32 to vector<2x256xf32>
    %674 = arith.mulf %670, %673 : vector<2x256xf32>
    %c85 = arith.constant 85 : index
    %675 = memref.load %arg2[%c85] : memref<98xf32, #tpu.memory_space<smem>>
    %676 = vector.broadcast %675 : f32 to vector<2x256xf32>
    %677 = arith.mulf %671, %676 : vector<2x256xf32>
    %678 = arith.addf %674, %677 : vector<2x256xf32>
    %679 = arith.andi %58, %85 : vector<1x256xi1>
    %cst_133 = arith.constant 0.000000e+00 : f32
    %680 = vector.shape_cast %679 : vector<1x256xi1> to vector<1x256xi1>
    %681 = vector.broadcast %680 : vector<1x256xi1> to vector<2x256xi1>
    %682 = vector.broadcast %cst_133 : f32 to vector<2x256xf32>
    %683 = arith.select %681, %678, %682 : vector<2x256xi1>, vector<2x256xf32>
    %684 = arith.addf %669, %683 : vector<2x256xf32>
    %c225_i32 = arith.constant 225 : i32
    %685 = tpu.dynamic_rotate %1 by %c225_i32 dim 1 : vector<2x256xf32>, i32 -> vector<2x256xf32>
    %c225_i32_134 = arith.constant 225 : i32
    %686 = tpu.dynamic_rotate %2 by %c225_i32_134 dim 1 : vector<2x256xf32>, i32 -> vector<2x256xf32>
    %c37 = arith.constant 37 : index
    %687 = memref.load %arg2[%c37] : memref<98xf32, #tpu.memory_space<smem>>
    %688 = vector.broadcast %687 : f32 to vector<2x256xf32>
    %689 = arith.mulf %685, %688 : vector<2x256xf32>
    %c86 = arith.constant 86 : index
    %690 = memref.load %arg2[%c86] : memref<98xf32, #tpu.memory_space<smem>>
    %691 = vector.broadcast %690 : f32 to vector<2x256xf32>
    %692 = arith.mulf %686, %691 : vector<2x256xf32>
    %693 = arith.addf %689, %692 : vector<2x256xf32>
    %694 = arith.andi %58, %94 : vector<1x256xi1>
    %cst_135 = arith.constant 0.000000e+00 : f32
    %695 = vector.shape_cast %694 : vector<1x256xi1> to vector<1x256xi1>
    %696 = vector.broadcast %695 : vector<1x256xi1> to vector<2x256xi1>
    %697 = vector.broadcast %cst_135 : f32 to vector<2x256xf32>
    %698 = arith.select %696, %693, %697 : vector<2x256xi1>, vector<2x256xf32>
    %699 = arith.addf %684, %698 : vector<2x256xf32>
    %c224_i32 = arith.constant 224 : i32
    %700 = tpu.dynamic_rotate %1 by %c224_i32 dim 1 : vector<2x256xf32>, i32 -> vector<2x256xf32>
    %c224_i32_136 = arith.constant 224 : i32
    %701 = tpu.dynamic_rotate %2 by %c224_i32_136 dim 1 : vector<2x256xf32>, i32 -> vector<2x256xf32>
    %c38 = arith.constant 38 : index
    %702 = memref.load %arg2[%c38] : memref<98xf32, #tpu.memory_space<smem>>
    %703 = vector.broadcast %702 : f32 to vector<2x256xf32>
    %704 = arith.mulf %700, %703 : vector<2x256xf32>
    %c87 = arith.constant 87 : index
    %705 = memref.load %arg2[%c87] : memref<98xf32, #tpu.memory_space<smem>>
    %706 = vector.broadcast %705 : f32 to vector<2x256xf32>
    %707 = arith.mulf %701, %706 : vector<2x256xf32>
    %708 = arith.addf %704, %707 : vector<2x256xf32>
    %709 = arith.andi %58, %103 : vector<1x256xi1>
    %cst_137 = arith.constant 0.000000e+00 : f32
    %710 = vector.shape_cast %709 : vector<1x256xi1> to vector<1x256xi1>
    %711 = vector.broadcast %710 : vector<1x256xi1> to vector<2x256xi1>
    %712 = vector.broadcast %cst_137 : f32 to vector<2x256xf32>
    %713 = arith.select %711, %708, %712 : vector<2x256xi1>, vector<2x256xf32>
    %714 = arith.addf %699, %713 : vector<2x256xf32>
    %c223_i32 = arith.constant 223 : i32
    %715 = tpu.dynamic_rotate %1 by %c223_i32 dim 1 : vector<2x256xf32>, i32 -> vector<2x256xf32>
    %c223_i32_138 = arith.constant 223 : i32
    %716 = tpu.dynamic_rotate %2 by %c223_i32_138 dim 1 : vector<2x256xf32>, i32 -> vector<2x256xf32>
    %c39 = arith.constant 39 : index
    %717 = memref.load %arg2[%c39] : memref<98xf32, #tpu.memory_space<smem>>
    %718 = vector.broadcast %717 : f32 to vector<2x256xf32>
    %719 = arith.mulf %715, %718 : vector<2x256xf32>
    %c88 = arith.constant 88 : index
    %720 = memref.load %arg2[%c88] : memref<98xf32, #tpu.memory_space<smem>>
    %721 = vector.broadcast %720 : f32 to vector<2x256xf32>
    %722 = arith.mulf %716, %721 : vector<2x256xf32>
    %723 = arith.addf %719, %722 : vector<2x256xf32>
    %724 = arith.andi %58, %112 : vector<1x256xi1>
    %cst_139 = arith.constant 0.000000e+00 : f32
    %725 = vector.shape_cast %724 : vector<1x256xi1> to vector<1x256xi1>
    %726 = vector.broadcast %725 : vector<1x256xi1> to vector<2x256xi1>
    %727 = vector.broadcast %cst_139 : f32 to vector<2x256xf32>
    %728 = arith.select %726, %723, %727 : vector<2x256xi1>, vector<2x256xf32>
    %729 = arith.addf %714, %728 : vector<2x256xf32>
    %c222_i32 = arith.constant 222 : i32
    %730 = tpu.dynamic_rotate %1 by %c222_i32 dim 1 : vector<2x256xf32>, i32 -> vector<2x256xf32>
    %c222_i32_140 = arith.constant 222 : i32
    %731 = tpu.dynamic_rotate %2 by %c222_i32_140 dim 1 : vector<2x256xf32>, i32 -> vector<2x256xf32>
    %c40 = arith.constant 40 : index
    %732 = memref.load %arg2[%c40] : memref<98xf32, #tpu.memory_space<smem>>
    %733 = vector.broadcast %732 : f32 to vector<2x256xf32>
    %734 = arith.mulf %730, %733 : vector<2x256xf32>
    %c89 = arith.constant 89 : index
    %735 = memref.load %arg2[%c89] : memref<98xf32, #tpu.memory_space<smem>>
    %736 = vector.broadcast %735 : f32 to vector<2x256xf32>
    %737 = arith.mulf %731, %736 : vector<2x256xf32>
    %738 = arith.addf %734, %737 : vector<2x256xf32>
    %739 = arith.andi %58, %121 : vector<1x256xi1>
    %cst_141 = arith.constant 0.000000e+00 : f32
    %740 = vector.shape_cast %739 : vector<1x256xi1> to vector<1x256xi1>
    %741 = vector.broadcast %740 : vector<1x256xi1> to vector<2x256xi1>
    %742 = vector.broadcast %cst_141 : f32 to vector<2x256xf32>
    %743 = arith.select %741, %738, %742 : vector<2x256xi1>, vector<2x256xf32>
    %744 = arith.addf %729, %743 : vector<2x256xf32>
    %c221_i32 = arith.constant 221 : i32
    %745 = tpu.dynamic_rotate %1 by %c221_i32 dim 1 : vector<2x256xf32>, i32 -> vector<2x256xf32>
    %c221_i32_142 = arith.constant 221 : i32
    %746 = tpu.dynamic_rotate %2 by %c221_i32_142 dim 1 : vector<2x256xf32>, i32 -> vector<2x256xf32>
    %c41 = arith.constant 41 : index
    %747 = memref.load %arg2[%c41] : memref<98xf32, #tpu.memory_space<smem>>
    %748 = vector.broadcast %747 : f32 to vector<2x256xf32>
    %749 = arith.mulf %745, %748 : vector<2x256xf32>
    %c90 = arith.constant 90 : index
    %750 = memref.load %arg2[%c90] : memref<98xf32, #tpu.memory_space<smem>>
    %751 = vector.broadcast %750 : f32 to vector<2x256xf32>
    %752 = arith.mulf %746, %751 : vector<2x256xf32>
    %753 = arith.addf %749, %752 : vector<2x256xf32>
    %754 = arith.andi %58, %130 : vector<1x256xi1>
    %cst_143 = arith.constant 0.000000e+00 : f32
    %755 = vector.shape_cast %754 : vector<1x256xi1> to vector<1x256xi1>
    %756 = vector.broadcast %755 : vector<1x256xi1> to vector<2x256xi1>
    %757 = vector.broadcast %cst_143 : f32 to vector<2x256xf32>
    %758 = arith.select %756, %753, %757 : vector<2x256xi1>, vector<2x256xf32>
    %759 = arith.addf %744, %758 : vector<2x256xf32>
    %c211_i32 = arith.constant 211 : i32
    %760 = tpu.dynamic_rotate %1 by %c211_i32 dim 1 : vector<2x256xf32>, i32 -> vector<2x256xf32>
    %c211_i32_144 = arith.constant 211 : i32
    %761 = tpu.dynamic_rotate %2 by %c211_i32_144 dim 1 : vector<2x256xf32>, i32 -> vector<2x256xf32>
    %c42 = arith.constant 42 : index
    %762 = memref.load %arg2[%c42] : memref<98xf32, #tpu.memory_space<smem>>
    %763 = vector.broadcast %762 : f32 to vector<2x256xf32>
    %764 = arith.mulf %760, %763 : vector<2x256xf32>
    %c91 = arith.constant 91 : index
    %765 = memref.load %arg2[%c91] : memref<98xf32, #tpu.memory_space<smem>>
    %766 = vector.broadcast %765 : f32 to vector<2x256xf32>
    %767 = arith.mulf %761, %766 : vector<2x256xf32>
    %768 = arith.addf %764, %767 : vector<2x256xf32>
    %769 = arith.andi %67, %76 : vector<1x256xi1>
    %cst_145 = arith.constant 0.000000e+00 : f32
    %770 = vector.shape_cast %769 : vector<1x256xi1> to vector<1x256xi1>
    %771 = vector.broadcast %770 : vector<1x256xi1> to vector<2x256xi1>
    %772 = vector.broadcast %cst_145 : f32 to vector<2x256xf32>
    %773 = arith.select %771, %768, %772 : vector<2x256xi1>, vector<2x256xf32>
    %774 = arith.addf %759, %773 : vector<2x256xf32>
    %c210_i32 = arith.constant 210 : i32
    %775 = tpu.dynamic_rotate %1 by %c210_i32 dim 1 : vector<2x256xf32>, i32 -> vector<2x256xf32>
    %c210_i32_146 = arith.constant 210 : i32
    %776 = tpu.dynamic_rotate %2 by %c210_i32_146 dim 1 : vector<2x256xf32>, i32 -> vector<2x256xf32>
    %c43 = arith.constant 43 : index
    %777 = memref.load %arg2[%c43] : memref<98xf32, #tpu.memory_space<smem>>
    %778 = vector.broadcast %777 : f32 to vector<2x256xf32>
    %779 = arith.mulf %775, %778 : vector<2x256xf32>
    %c92 = arith.constant 92 : index
    %780 = memref.load %arg2[%c92] : memref<98xf32, #tpu.memory_space<smem>>
    %781 = vector.broadcast %780 : f32 to vector<2x256xf32>
    %782 = arith.mulf %776, %781 : vector<2x256xf32>
    %783 = arith.addf %779, %782 : vector<2x256xf32>
    %784 = arith.andi %67, %85 : vector<1x256xi1>
    %cst_147 = arith.constant 0.000000e+00 : f32
    %785 = vector.shape_cast %784 : vector<1x256xi1> to vector<1x256xi1>
    %786 = vector.broadcast %785 : vector<1x256xi1> to vector<2x256xi1>
    %787 = vector.broadcast %cst_147 : f32 to vector<2x256xf32>
    %788 = arith.select %786, %783, %787 : vector<2x256xi1>, vector<2x256xf32>
    %789 = arith.addf %774, %788 : vector<2x256xf32>
    %c209_i32 = arith.constant 209 : i32
    %790 = tpu.dynamic_rotate %1 by %c209_i32 dim 1 : vector<2x256xf32>, i32 -> vector<2x256xf32>
    %c209_i32_148 = arith.constant 209 : i32
    %791 = tpu.dynamic_rotate %2 by %c209_i32_148 dim 1 : vector<2x256xf32>, i32 -> vector<2x256xf32>
    %c44 = arith.constant 44 : index
    %792 = memref.load %arg2[%c44] : memref<98xf32, #tpu.memory_space<smem>>
    %793 = vector.broadcast %792 : f32 to vector<2x256xf32>
    %794 = arith.mulf %790, %793 : vector<2x256xf32>
    %c93 = arith.constant 93 : index
    %795 = memref.load %arg2[%c93] : memref<98xf32, #tpu.memory_space<smem>>
    %796 = vector.broadcast %795 : f32 to vector<2x256xf32>
    %797 = arith.mulf %791, %796 : vector<2x256xf32>
    %798 = arith.addf %794, %797 : vector<2x256xf32>
    %799 = arith.andi %67, %94 : vector<1x256xi1>
    %cst_149 = arith.constant 0.000000e+00 : f32
    %800 = vector.shape_cast %799 : vector<1x256xi1> to vector<1x256xi1>
    %801 = vector.broadcast %800 : vector<1x256xi1> to vector<2x256xi1>
    %802 = vector.broadcast %cst_149 : f32 to vector<2x256xf32>
    %803 = arith.select %801, %798, %802 : vector<2x256xi1>, vector<2x256xf32>
    %804 = arith.addf %789, %803 : vector<2x256xf32>
    %c208_i32 = arith.constant 208 : i32
    %805 = tpu.dynamic_rotate %1 by %c208_i32 dim 1 : vector<2x256xf32>, i32 -> vector<2x256xf32>
    %c208_i32_150 = arith.constant 208 : i32
    %806 = tpu.dynamic_rotate %2 by %c208_i32_150 dim 1 : vector<2x256xf32>, i32 -> vector<2x256xf32>
    %c45 = arith.constant 45 : index
    %807 = memref.load %arg2[%c45] : memref<98xf32, #tpu.memory_space<smem>>
    %808 = vector.broadcast %807 : f32 to vector<2x256xf32>
    %809 = arith.mulf %805, %808 : vector<2x256xf32>
    %c94 = arith.constant 94 : index
    %810 = memref.load %arg2[%c94] : memref<98xf32, #tpu.memory_space<smem>>
    %811 = vector.broadcast %810 : f32 to vector<2x256xf32>
    %812 = arith.mulf %806, %811 : vector<2x256xf32>
    %813 = arith.addf %809, %812 : vector<2x256xf32>
    %814 = arith.andi %67, %103 : vector<1x256xi1>
    %cst_151 = arith.constant 0.000000e+00 : f32
    %815 = vector.shape_cast %814 : vector<1x256xi1> to vector<1x256xi1>
    %816 = vector.broadcast %815 : vector<1x256xi1> to vector<2x256xi1>
    %817 = vector.broadcast %cst_151 : f32 to vector<2x256xf32>
    %818 = arith.select %816, %813, %817 : vector<2x256xi1>, vector<2x256xf32>
    %819 = arith.addf %804, %818 : vector<2x256xf32>
    %c207_i32 = arith.constant 207 : i32
    %820 = tpu.dynamic_rotate %1 by %c207_i32 dim 1 : vector<2x256xf32>, i32 -> vector<2x256xf32>
    %c207_i32_152 = arith.constant 207 : i32
    %821 = tpu.dynamic_rotate %2 by %c207_i32_152 dim 1 : vector<2x256xf32>, i32 -> vector<2x256xf32>
    %c46 = arith.constant 46 : index
    %822 = memref.load %arg2[%c46] : memref<98xf32, #tpu.memory_space<smem>>
    %823 = vector.broadcast %822 : f32 to vector<2x256xf32>
    %824 = arith.mulf %820, %823 : vector<2x256xf32>
    %c95 = arith.constant 95 : index
    %825 = memref.load %arg2[%c95] : memref<98xf32, #tpu.memory_space<smem>>
    %826 = vector.broadcast %825 : f32 to vector<2x256xf32>
    %827 = arith.mulf %821, %826 : vector<2x256xf32>
    %828 = arith.addf %824, %827 : vector<2x256xf32>
    %829 = arith.andi %67, %112 : vector<1x256xi1>
    %cst_153 = arith.constant 0.000000e+00 : f32
    %830 = vector.shape_cast %829 : vector<1x256xi1> to vector<1x256xi1>
    %831 = vector.broadcast %830 : vector<1x256xi1> to vector<2x256xi1>
    %832 = vector.broadcast %cst_153 : f32 to vector<2x256xf32>
    %833 = arith.select %831, %828, %832 : vector<2x256xi1>, vector<2x256xf32>
    %834 = arith.addf %819, %833 : vector<2x256xf32>
    %c206_i32 = arith.constant 206 : i32
    %835 = tpu.dynamic_rotate %1 by %c206_i32 dim 1 : vector<2x256xf32>, i32 -> vector<2x256xf32>
    %c206_i32_154 = arith.constant 206 : i32
    %836 = tpu.dynamic_rotate %2 by %c206_i32_154 dim 1 : vector<2x256xf32>, i32 -> vector<2x256xf32>
    %c47 = arith.constant 47 : index
    %837 = memref.load %arg2[%c47] : memref<98xf32, #tpu.memory_space<smem>>
    %838 = vector.broadcast %837 : f32 to vector<2x256xf32>
    %839 = arith.mulf %835, %838 : vector<2x256xf32>
    %c96 = arith.constant 96 : index
    %840 = memref.load %arg2[%c96] : memref<98xf32, #tpu.memory_space<smem>>
    %841 = vector.broadcast %840 : f32 to vector<2x256xf32>
    %842 = arith.mulf %836, %841 : vector<2x256xf32>
    %843 = arith.addf %839, %842 : vector<2x256xf32>
    %844 = arith.andi %67, %121 : vector<1x256xi1>
    %cst_155 = arith.constant 0.000000e+00 : f32
    %845 = vector.shape_cast %844 : vector<1x256xi1> to vector<1x256xi1>
    %846 = vector.broadcast %845 : vector<1x256xi1> to vector<2x256xi1>
    %847 = vector.broadcast %cst_155 : f32 to vector<2x256xf32>
    %848 = arith.select %846, %843, %847 : vector<2x256xi1>, vector<2x256xf32>
    %849 = arith.addf %834, %848 : vector<2x256xf32>
    %c205_i32 = arith.constant 205 : i32
    %850 = tpu.dynamic_rotate %1 by %c205_i32 dim 1 : vector<2x256xf32>, i32 -> vector<2x256xf32>
    %c205_i32_156 = arith.constant 205 : i32
    %851 = tpu.dynamic_rotate %2 by %c205_i32_156 dim 1 : vector<2x256xf32>, i32 -> vector<2x256xf32>
    %c48 = arith.constant 48 : index
    %852 = memref.load %arg2[%c48] : memref<98xf32, #tpu.memory_space<smem>>
    %853 = vector.broadcast %852 : f32 to vector<2x256xf32>
    %854 = arith.mulf %850, %853 : vector<2x256xf32>
    %c97 = arith.constant 97 : index
    %855 = memref.load %arg2[%c97] : memref<98xf32, #tpu.memory_space<smem>>
    %856 = vector.broadcast %855 : f32 to vector<2x256xf32>
    %857 = arith.mulf %851, %856 : vector<2x256xf32>
    %858 = arith.addf %854, %857 : vector<2x256xf32>
    %859 = arith.andi %67, %130 : vector<1x256xi1>
    %cst_157 = arith.constant 0.000000e+00 : f32
    %860 = vector.shape_cast %859 : vector<1x256xi1> to vector<1x256xi1>
    %861 = vector.broadcast %860 : vector<1x256xi1> to vector<2x256xi1>
    %862 = vector.broadcast %cst_157 : f32 to vector<2x256xf32>
    %863 = arith.select %861, %858, %862 : vector<2x256xi1>, vector<2x256xf32>
    %864 = arith.addf %849, %863 : vector<2x256xf32>
    %cst_158 = arith.constant 0.000000e+00 : f32
    %865 = vector.broadcast %cst_158 : f32 to vector<2x256xf32>
    %866 = arith.subf %865, %864 : vector<2x256xf32>
    %867 = math.exp %866 : vector<2x256xf32>
    %cst_159 = arith.constant 1.000000e+00 : f32
    %868 = vector.broadcast %cst_159 : f32 to vector<2x256xf32>
    %869 = arith.addf %868, %867 : vector<2x256xf32>
    %cst_160 = arith.constant 1.000000e+00 : f32
    %870 = vector.broadcast %cst_160 : f32 to vector<2x256xf32>
    %871 = arith.divf %870, %869 : vector<2x256xf32>
    %872 = vector.shape_cast %871 : vector<2x256xf32> to vector<2x1x256xf32>
    %873 = vector.broadcast %872 : vector<2x1x256xf32> to vector<2x4x256xf32>
    %874 = arith.mulf %0, %873 : vector<2x4x256xf32>
    %c0_161 = arith.constant 0 : index
    %c0_162 = arith.constant 0 : index
    %c0_163 = arith.constant 0 : index
    %875 = vector.load %arg4[%c0_161, %c0_162, %c0_163] : memref<2x4x256xf32, #tpu.memory_space<vmem>>, vector<2x4x256xf32>
    tpu.vector_store %arg4[%c0_161, %c0_162, %c0_163], %874 {strides = array<i32>} : memref<2x4x256xf32, #tpu.memory_space<vmem>>, vector<2x4x256xf32>,
    return
  }
  func.func @transform_0(%arg0: i32) -> (i32, i32, i32) {
    %c0_i32 = arith.constant 0 : i32
    %c0_i32_0 = arith.constant 0 : i32
    %c0_i32_1 = arith.constant 0 : i32
    return %arg0, %c0_i32, %c0_i32_0 : i32, i32, i32
  }
  func.func @transform_1(%arg0: i32) -> i32 {
    %c0_i32 = arith.constant 0 : i32
    %c0_i32_0 = arith.constant 0 : i32
    return %c0_i32 : i32
  }
  func.func @transform_2(%arg0: i32) -> (i32, i32) {
    %c0_i32 = arith.constant 0 : i32
    %c0_i32_0 = arith.constant 0 : i32
    %c0_i32_1 = arith.constant 0 : i32
    return %c0_i32, %c0_i32_0 : i32, i32
  }
  func.func @transform_3(%arg0: i32) -> (i32, i32, i32) {
    %c0_i32 = arith.constant 0 : i32
    %c0_i32_0 = arith.constant 0 : i32
    %c0_i32_1 = arith.constant 0 : i32
    return %arg0, %c0_i32, %c0_i32_0 : i32, i32, i32
  }
}

</mosaic_0001>

<bundles_post_ra>
// kernel: tpu_custom_call.1
= control target key start
LH: loop header
LB: loop body
LE: loop exit
PB: predicated region body
PF: predicated region fallthrough
CT: control target
= control target key end

     0   :  { %s5695_s0 = inlined_call_operand.hbm [shape: f32[2,4,256], index: 0, kind: input, shape index: {}]   ;;  %s5696_s1 = inlined_call_operand.vmem [shape: f32[98], index: 1, kind: input, shape index: {}]   ;;  %s5697_s2 = inlined_call_operand.hbm [shape: s32[2,256], index: 2, kind: input, shape index: {}]   ;;  %s5698_s3 = inlined_call_operand.hbm [shape: f32[2,4,256], index: 3, kind: output, shape index: {}]  }
   0x1   :  { %5828 = sst [smem:[#allocation76_spill]] %s5698_s3 }
   0x2   :  { %8 = vsyncpa [#allocation3], 0 }
   0x3   :  { %9 = vsyncpa [#allocation5], 0 }
   0x4   :  { %10 = vsyncpa [#allocation8], 0 }
   0x5   :  { %11 = vsyncpa [#allocation4], 0  ;;  %s2433_s12 = smov [#allocation2]   ;;  %s30_s16 = sshll.u32 %s5696_s1, 4  ;;  %s31_s16 = int_to_ptr.vmem [resolvable:$true] %s30_s16 }
   0x6   :  { %s17_s13 = sshll.u32 %s2433_s12, 4  ;;  %s18_s13 = int_to_ptr.vmem [resolvable:$true] %s17_s13 }
   0x7   :  { %s2361_s17 = scalar_lea.vmem %s18_s13, 256  ;;  %p2366_p1 = scmp.lt.s32.totalorder %s18_s13, %s18_s13 }
   0x8   :  { %p2362_p0 = scmp.ne.s32.totalorder %s18_s13, %s2361_s17  ;;  %p2367_p2 = scmp.lt.s32.totalorder %s2361_s17, %s2361_s17 }
   0xa   :  { %p2368_p3 = por %p2367_p2, %p2366_p1 }
   0xc   :  { %p2369_p4 = pnand %p2368_p3, %p2362_p0 }
   0xe   :  { %2372 = shalt.err (!%p2369_p4)
}
   0xf   :  { %s5722_s18 = smov 128   ;;  %s5723_s19 = smov 8  }
  0x10   :  { %23 = dma.hbm_to_vmem [thread:$0]  %s5695_s0, 256, %s18_s13, [#allocation3], %s5722_s18, %s5722_s18, %s5723_s19  }
  0x11   :  { %s2373_s22 = scalar_lea.vmem %s31_s16, 16  ;;  %p2378_p6 = scmp.lt.s32.totalorder %s31_s16, %s31_s16 }
  0x12   :  { %p2374_p5 = scmp.ne.s32.totalorder %s31_s16, %s2373_s22  ;;  %p2379_p7 = scmp.lt.s32.totalorder %s2373_s22, %s2373_s22 }
  0x14   :  { %p2380_p8 = por %p2379_p7, %p2378_p6 }
  0x16   :  { %p2381_p9 = pnand %p2380_p8, %p2374_p5 }
  0x18   :  { %2384 = shalt.err (!%p2381_p9)
}
  0x19   :  { %s2436_s1 = smov [#allocation6]   ;;  %s2437_s23 = smov [#allocation7]  }
  0x1a   :  { %33 = dma.vmem_to_smem %s31_s16, 16, %s2436_s1, [#allocation5]  }
  0x1b   :  { %s40_s24 = sshll.u32 %s2437_s23, 4  ;;  %s41_s24 = int_to_ptr.vmem [resolvable:$true] %s40_s24 }
  0x1c   :  { %s2393_s25 = scalar_lea.vmem %s41_s24, 64  ;;  %p2398_p11 = scmp.lt.s32.totalorder %s41_s24, %s41_s24 }
  0x1d   :  { %p2394_p10 = scmp.ne.s32.totalorder %s41_s24, %s2393_s25  ;;  %p2399_p12 = scmp.lt.s32.totalorder %s2393_s25, %s2393_s25 }
  0x1f   :  { %p2400_p13 = por %p2399_p12, %p2398_p11 }
  0x21   :  { %p2401_p0 = pnand %p2400_p13, %p2394_p10 }
  0x23   :  { %2404 = shalt.err (!%p2401_p0)
}
  0x24   :  { %43 = dma.hbm_to_vmem [thread:$0]  %s5697_s2, 64, %s41_s24, [#allocation8]  }
  0x25   :  { %2425 = dma.done.wait [#allocation3], 256  }
  0x26   :  { %2426 = vsyncadd [#allocation3], 4294967040 }
  0x27   :  { %2427 = dma.done.wait [#allocation5], 16  }
  0x28   :  { %2428 = vsyncadd [#allocation5], 4294967280 }
  0x29   :  { %2429 = dma.done.wait [#allocation8], 64  }
  0x2a   :  { %2430 = vsyncadd [#allocation8], 4294967232 }
  0x2b   :  { %53 = sfence }
  0x2c   :  { %v54_v0 = vld [vmem:[#allocation2] sm:$0xff]  ;;  %v55_v1 = vld [vmem:[#allocation2 + $0x8] sm:$0xff]  ;;  %vm62_vm0 = vcmask 1043456   ;;  %vm5699_vm1 = vcmask 1041409   ;;  %s2438_s2 = smov 51   ;;  %s2439_s27 = smov 50  }
  0x2d   :  { %v91_v2 = vsel %vm62_vm0, %v54_v0, -inf  ;;  %v105_v3 = vsel %vm62_vm0, %v55_v1, -inf  ;;  %v63_v4 = vsel %vm62_vm0, %v54_v0, 0.0  ;;  %v77_v5 = vsel %vm62_vm0, %v55_v1, 0.0  ;;  %s2440_s28 = smov 49   ;;  %s2441_s29 = smov 48  }
  0x2e   :  { %v92_v6 = vrot.slane %v91_v2, 4  ;;  %v106_v7 = vrot.slane %v105_v3, 4  ;;  %v64_v8 = vrot.slane %v63_v4, 4  ;;  %v78_v9 = vrot.slane %v77_v5, 4  ;;  %s2442_s30 = smov 47   ;;  %s2443_s4 = smov 46  }
  0x2f   :  { %v58_v10 = vcombine.high %v54_v0, %v54_v0  ;;  %v59_v11 = vcombine.high %v55_v1, %v55_v1  ;;  %s2444_s5 = smov 45   ;;  %s2445_s6 = smov 35  }
  0x30   :  { %v93_v12 = vmax.f32 %v91_v2, %v92_v6  ;;  %v107_v13 = vmax.f32 %v105_v3, %v106_v7  ;;  %v65_v14 = vadd.f32 %v64_v8, %v63_v4  ;;  %v79_v15 = vadd.f32 %v78_v9, %v77_v5  ;;  %s2446_s7 = smov 34   ;;  %s2447_s8 = smov 33  }
  0x31   :  { %v98_v16 = vsel %vm62_vm0, %v58_v10, -inf  ;;  %v112_v17 = vsel %vm62_vm0, %v59_v11, -inf  ;;  %v70_v18 = vsel %vm62_vm0, %v58_v10, 0.0  ;;  %v84_v19 = vsel %vm62_vm0, %v59_v11, 0.0  ;;  %s2448_s9 = smov 32   ;;  %s2449_s10 = smov 31  }
  0x32   :  { %v94_v20 = vrot.slane %v93_v12, 2  ;;  %v108_v21 = vrot.slane %v107_v13, 2  ;;  %v66_v22 = vrot.slane %v65_v14, 2  ;;  %v80_v23 = vrot.slane %v79_v15, 2  ;;  %s2450_s11 = smov 30   ;;  %s2451_s12 = smov 29  }
  0x33   :  { %v99_v24 = vrot.slane %v98_v16, 4  ;;  %v113_v25 = vrot.slane %v112_v17, 4  ;;  %v71_v26 = vrot.slane %v70_v18, 4  ;;  %v85_v27 = vrot.slane %v84_v19, 4  ;;  %s2452_s13 = smov 19   ;;  %s2453_s14 = smov 18  }
  0x34   :  { %v95_v28 = vmax.f32 %v93_v12, %v94_v20  ;;  %v109_v29 = vmax.f32 %v107_v13, %v108_v21  ;;  %v67_v30 = vadd.f32 %v66_v22, %v65_v14  ;;  %v81_v31 = vadd.f32 %v80_v23, %v79_v15  ;;  %s2454_s15 = smov 17   ;;  %s2455_s16 = smov 16  }
  0x35   :  { %v100_v32 = vmax.f32 %v98_v16, %v99_v24  ;;  %v114_v33 = vmax.f32 %v112_v17, %v113_v25  ;;  %v72_v34 = vadd.f32 %v71_v26, %v70_v18  ;;  %v86_v35 = vadd.f32 %v85_v27, %v84_v19  ;;  %s2456_s17 = smov 15   ;;  %s2457_s20 = smov 14   ;;  %v2703_v27 = vld [vmem:[#allocation7] ss:$2 sm:$0x3] }
  0x36   :  { %v96_v36 = vrot.slane %v95_v28, 1  ;;  %v110_v37 = vrot.slane %v109_v29, 1  ;;  %v68_v38 = vrot.slane %v67_v30, 1  ;;  %v82_v39 = vrot.slane %v81_v31, 1  ;;  %s2458_s21 = smov 13   ;;  %s2459_s22 = smov 3  }
  0x37   :  { %v101_v40 = vrot.slane %v100_v32, 2  ;;  %v115_v41 = vrot.slane %v114_v33, 2  ;;  %v73_v42 = vrot.slane %v72_v34, 2  ;;  %v87_v43 = vrot.slane %v86_v35, 2  ;;  %s2712_s1 = sld [smem:[#allocation6 + $0x31]]  ;;  %s2464_s19 = smov 126  }
  0x38   :  { %v2529_v44 = vmax.f32 %v95_v28, %v96_v36  ;;  %v2531_v45 = vmax.f32 %v109_v29, %v110_v37  ;;  %v2533_v46 = vadd.f32 %v68_v38, %v67_v30  ;;  %v2535_v47 = vadd.f32 %v82_v39, %v81_v31  ;;  %v121_v29 = vld [vmem:[#allocation7 + $0x1] ss:$2 sm:$0x3]  ;;  %s2716_s23 = sld [smem:[#allocation6 + $0x1]] }
  0x39   :  { %v102_v48 = vmax.f32 %v100_v32, %v101_v40  ;;  %v116_v49 = vmax.f32 %v114_v33, %v115_v41  ;;  %v74_v50 = vadd.f32 %v73_v42, %v72_v34  ;;  %v88_v51 = vadd.f32 %v87_v43, %v86_v35  ;;  %s2719_s24 = sld [smem:[#allocation6 + $0x32]] }
  0x3a   :  { %5829 = vst [vmem:[#allocation14_spill] sm:$0xff] %v2529_v44  ;;  %5830 = vst [vmem:[#allocation15_spill] sm:$0xff] %v2531_v45  ;;  %v2540_v52 = vsel %vm5699_vm1, %v2531_v45, %v2529_v44  ;;  %v2545_v53 = vsel %vm5699_vm1, %v2535_v47, %v2533_v46  ;;  %v122_v30 = vadd.s32 4294967293, %v2703_v27  ;;  %v153_v32 = vadd.s32 4294967294, %v121_v29  ;;  %s2722_s25 = sld [smem:[#allocation6 + $0x2]] }
  0x3b   :  { %5831 = vst [vmem:[#allocation16_spill] sm:$0xff] %v2533_v46  ;;  %5832 = vst [vmem:[#allocation17_spill] sm:$0xff] %v2535_v47  ;;  %202 = vrot.lane.b32.xlu1 %v2540_v52, %s2438_s2  ;;  %185 = vrot.lane.b32.xlu0 %v2545_v53, %s2438_s2  ;;  %v103_v54 = vrot.slane %v102_v48, 1  ;;  %v117_v55 = vrot.slane %v116_v49, 1  ;;  %v75_v56 = vrot.slane %v74_v50, 1  ;;  %v89_v57 = vrot.slane %v88_v51, 1 }
  0x3c   :  { %v149_v34 = vadd.s32 4294967293, %v121_v29  ;;  %vm123_vm2 = vcmp.ge.s32.totalorder %v122_v30, 0  ;;  %vm124_vm3 = vcmp.lt.s32.totalorder %v122_v30, 16  ;;  %vm154_vm4 = vcmp.ge.s32.totalorder %v153_v32, 0  ;;  %s2726_s0 = sld [smem:[#allocation6]] }
  0x3d   :  { %v2549_v58 = vmax.f32 %v102_v48, %v103_v54  ;;  %v2551_v59 = vmax.f32 %v116_v49, %v117_v55  ;;  %v2553_v60 = vadd.f32 %v75_v56, %v74_v50  ;;  %v2555_v61 = vadd.f32 %v89_v57, %v88_v51  ;;  %s2730_s26 = sld [smem:[#allocation6 + $0x33]]  ;;  %vm2733_vm8 = vmand %vm123_vm2, %vm124_vm3 }
  0x3e   :  { %vm155_vm5 = vcmp.lt.s32.totalorder %v153_v32, 16  ;;  %vm150_vm6 = vcmp.ge.s32.totalorder %v149_v34, 0  ;;  %vm151_vm7 = vcmp.lt.s32.totalorder %v149_v34, 16  ;;  %v157_v37 = vadd.s32 4294967295, %v121_v29  ;;  %s3042_s18 = sld [smem:[#allocation6 + $0xe]] }
  0x3f   :  { %5833 = vst [vmem:[#allocation18_spill] sm:$0xff] %v2549_v58  ;;  %5834 = vst [vmem:[#allocation19_spill] sm:$0xff] %v2551_v59  ;;  %234 = vrot.lane.b32.xlu0 %v2545_v53, %s2439_s27  ;;  %v2561_v62 = vsel %vm5699_vm1, %v2551_v59, %v2549_v58  ;;  %v2567_v63 = vsel %vm5699_vm1, %v2555_v61, %v2553_v60  ;;  %v5847_v39 = vmov 0  ;;  %v164_v40 = vadd.s32 1, %v121_v29  ;;  %s3066_s3 = sld [smem:[#allocation6 + $0x3f]] }
  0x40   :  { %5835 = vst [vmem:[#allocation20_spill] sm:$0xff] %v2553_v60  ;;  %5836 = vst [vmem:[#allocation21_spill] sm:$0xff] %v2555_v61  ;;  %204 = vrot.lane.b32.xlu1 %v2561_v62, %s2438_s2  ;;  %v5851_v42 = vmov 0  ;;  %vm158_vm11 = vcmp.ge.s32.totalorder %v157_v37, 0  ;;  %vm159_vm12 = vcmp.lt.s32.totalorder %v157_v37, 16  ;;  %vm161_vm14 = vcmp.ge.s32.totalorder %v121_v29, 0 }
  0x41   :  { %vm2740_vm9 = vmand %vm154_vm4, %vm155_vm5  ;;  %vm162_vm15 = vcmp.lt.s32.totalorder %v121_v29, 16  ;;  %v189_v48 = vlaneseq  ;;  %vm165_vm2 = vcmp.ge.s32.totalorder %v164_v40, 0  ;;  %vm166_vm3 = vcmp.lt.s32.totalorder %v164_v40, 16 }
  0x42   :  { %v5848_v39 = vsel %vm2740_vm9, 4294967295, %v5847_v39  ;;  %vm2748_vm10 = vmand %vm150_vm6, %vm151_vm7  ;;  %v168_v49 = vadd.s32 2, %v121_v29  ;;  %v5856_v51 = vmov 0  ;;  %v172_v54 = vadd.s32 3, %v121_v29 }
  0x43   :  { %241 = vrot.lane.b32.xlu0 %v2540_v52, %s2439_s27  ;;  %5849 = vst [vmem:[#allocation30_spill] sm:$0xff] %v5848_v39  ;;  %v5852_v42 = vsel %vm2748_vm10, 4294967295, %v5851_v42  ;;  %vm257_vm13 = vmand %vm2733_vm8, %vm2740_vm9  ;;  %v2784_v56 = vshrl.u32 %v189_v48, 7  ;;  %v5861_v57 = vmov 0  ;;  %v126_v30 = vadd.s32 4294967294, %v2703_v27 }
  0x44   :  { %236 = vrot.lane.b32.xlu1 %v2567_v63, %s2439_s27  ;;  %5853 = vst [vmem:[#allocation32_spill] sm:$0xff] %v5852_v42  ;;  %vm218_vm0 = vmand %vm2733_vm8, %vm2748_vm10  ;;  %v5864_v32 = vmov 0  ;;  %v5708_v59 = vmov 0   ;;  %v5871_v58 = vmov 0  ;;  %v2858_v44 = vand.u32 127, %v189_v48  ;;  %5891 = sst [smem:[#allocation55_spill]] %s3042_s18 }
  0x45   :  { %vm2776_vm4 = vmand %vm158_vm11, %vm159_vm12  ;;  %5860 = vst [vmem:[#allocation37_spill] sm:$0xff] %v2784_v56  ;;  %vm169_vm11 = vcmp.ge.s32.totalorder %v168_v49, 0  ;;  %vm170_vm12 = vcmp.lt.s32.totalorder %v168_v49, 16  ;;  %v2821_v37 = vsub.s32 0, %v2784_v56  ;;  %v2824_v40 = vsub.s32 1, %v2784_v56  ;;  %s3288_s18 = sld [smem:[#allocation6 + $0x42]] }
  0x46   :  { %v5857_v51 = vsel %vm2776_vm4, 4294967295, %v5856_v51  ;;  %vm2788_vm5 = vmand %vm161_vm14, %vm162_vm15  ;;  %vm173_vm15 = vcmp.ge.s32.totalorder %v172_v54, 0  ;;  %vm127_vm1 = vcmp.ge.s32.totalorder %v126_v30, 0  ;;  %vm128_vm14 = vcmp.lt.s32.totalorder %v126_v30, 16 }
  0x47   :  { %273 = vrot.lane.b32.xlu0 %v2545_v53, %s2440_s28  ;;  %5858 = vst [vmem:[#allocation35_spill] sm:$0xff] %v5857_v51  ;;  %v5862_v57 = vsel %vm2788_vm5, 4294967295, %v5861_v57  ;;  %vm2797_vm6 = vmand %vm165_vm2, %vm166_vm3  ;;  %vm174_vm2 = vcmp.lt.s32.totalorder %v172_v54, 16  ;;  %v2839_v56 = vsel %vm257_vm13, 1, %v5708_v59  ;;  %v2847_v45 = vsel %vm218_vm0, 1, %v5708_v59 }
  0x48   :  { %243 = vrot.lane.b32.xlu1 %v2561_v62, %s2439_s27  ;;  %s2737_s27 = sld [smem:[#allocation6 + $0x3]]  ;;  %5863 = vst [vmem:[#allocation38_spill] sm:$0xff] %v5862_v57  ;;  %v5865_v32 = vsel %vm2797_vm6, 4294967295, %v5864_v32  ;;  %vm296_vm7 = vmand %vm2733_vm8, %vm2776_vm4  ;;  %v5874_v59 = vmov 0  ;;  %v5878_v46 = vmov 0   ;;  %v130_v60 = vadd.s32 4294967295, %v2703_v27 }
  0x49   :  { %5866 = vst [vmem:[#allocation39_spill] sm:$0xff] %v5865_v32  ;;  %vm2851_vm3 = vmand %vm169_vm11, %vm170_vm12  ;;  %v2881_v48 = vsel %vm296_vm7, 1, %v5878_v46 }
  0x4a   :  { %v5872_v58 = vsel %vm2851_vm3, 4294967295, %v5871_v58  ;;  %vm2865_vm13 = vmand %vm173_vm15, %vm174_vm2 }
  0x4b   :  { %187 = vrot.lane.b32.xlu0 %v2567_v63, %s2438_s2  ;;  %s2460_s2 = smov 2   ;;  %5873 = vst [vmem:[#allocation44_spill] sm:$0xff] %v5872_v58  ;;  %v5875_v59 = vsel %vm2865_vm13, 4294967295, %v5874_v59  ;;  %vm5879_vm0 = vmand %vm2733_vm8, %vm2788_vm5 }
  0x4c   :  { %275 = vrot.lane.b32.xlu1 %v2567_v63, %s2440_s28  ;;  %5876 = vst [vmem:[#allocation45_spill] sm:$0xff] %v5875_v59  ;;  %v2889_v54 = vsel %vm5879_vm0, 1, %v5878_v46  ;;  %vm2893_vm11 = vmand %vm127_vm1, %vm128_vm14  ;;  %vm131_vm0 = vcmp.ge.s32.totalorder %v130_v60, 0 }
  0x4d   :  { %vm413_vm1 = vmand %vm2733_vm8, %vm2851_vm3 }
  0x4e   :  { %vm5883_vm7 = vmand %vm2733_vm8, %vm2797_vm6  ;;  %v2961_v47 = vsel %vm413_vm1, 1, %v5878_v46  ;;  %vm132_vm1 = vcmp.lt.s32.totalorder %v130_v60, 16 }
  0x4f   :  { %280 = vrot.lane.b32.xlu0 %v2540_v52, %s2440_s28  ;;  %vm452_vm12 = vmand %vm2733_vm8, %vm2865_vm13 }
  0x50   :  { %282 = vrot.lane.b32.xlu1 %v2561_v62, %s2440_s28  ;;  %s2744_s28 = sld [smem:[#allocation6 + $0x34]]  ;;  %vm491_vm14 = vmand %vm2893_vm11, %vm2748_vm10 }
  0x51   :  { %vm530_vm15 = vmand %vm2893_vm11, %vm2740_vm9  ;;  %v2999_v38 = vsel %vm491_vm14, 1, %v5878_v46 }
  0x52   :  { %vm569_vm2 = vmand %vm2893_vm11, %vm2776_vm4  ;;  %5887 = vst [vmem:[#allocation51_spill] sm:$0xff] %v2999_v38  ;;  %v5926_v38 = vrot.slane %v2881_v48, %v2821_v37 }
  0x53   :  { %312 = vrot.lane.b32.xlu0 %v2545_v53, %s2441_s29  ;;  %vm608_vm8 = vmand %vm2893_vm11, %vm2788_vm5 }
  0x54   :  { %314 = vrot.lane.b32.xlu1 %v2567_v63, %s2441_s29  ;;  %vm3062_vm14 = vmand %vm131_vm0, %vm132_vm1 }
  0x55   :  { %vm764_vm0 = vmand %vm3062_vm14, %vm2748_vm10 }
  0x56   :  { %vm803_vm1 = vmand %vm3062_vm14, %vm2740_vm9  ;;  %vm5935_vm9 = vcmp.lt.s32.totalorder %v2858_v44, 50 }
  0x57   :  { %319 = vrot.lane.b32.xlu0 %v2540_v52, %s2441_s29 }
  0x58   :  { %321 = vrot.lane.b32.xlu1 %v2561_v62, %s2441_s29  ;;  %s2752_s29 = sld [smem:[#allocation6 + $0x4]] }
  0x5b   :  { %351 = vrot.lane.b32.xlu0 %v2545_v53, %s2442_s30 }
  0x5c   :  { %353 = vrot.lane.b32.xlu1 %v2567_v63, %s2442_s30 }
  0x5f   :  { %358 = vrot.lane.b32.xlu0 %v2540_v52, %s2442_s30 }
  0x60   :  { %360 = vrot.lane.b32.xlu1 %v2561_v62, %s2442_s30  ;;  %s2756_s30 = sld [smem:[#allocation6 + $0x35]] }
  0x63   :  { %390 = vrot.lane.b32.xlu0 %v2545_v53, %s2443_s4 }
  0x64   :  { %392 = vrot.lane.b32.xlu1 %v2567_v63, %s2443_s4 }
  0x67   :  { %397 = vrot.lane.b32.xlu0 %v2540_v52, %s2443_s4 }
  0x68   :  { %399 = vrot.lane.b32.xlu1 %v2561_v62, %s2443_s4  ;;  %s2763_s4 = sld [smem:[#allocation6 + $0x5]] }
  0x6b   :  { %429 = vrot.lane.b32.xlu0 %v2545_v53, %s2444_s5 }
  0x6c   :  { %431 = vrot.lane.b32.xlu1 %v2567_v63, %s2444_s5 }
  0x6f   :  { %436 = vrot.lane.b32.xlu0 %v2540_v52, %s2444_s5 }
  0x70   :  { %438 = vrot.lane.b32.xlu1 %v2561_v62, %s2444_s5  ;;  %s2770_s5 = sld [smem:[#allocation6 + $0x36]] }
  0x73   :  { %468 = vrot.lane.b32.xlu0 %v2545_v53, %s2445_s6 }
  0x74   :  { %470 = vrot.lane.b32.xlu1 %v2567_v63, %s2445_s6 }
  0x77   :  { %475 = vrot.lane.b32.xlu0 %v2540_v52, %s2445_s6 }
  0x78   :  { %477 = vrot.lane.b32.xlu1 %v2561_v62, %s2445_s6  ;;  %s2780_s6 = sld [smem:[#allocation6 + $0x6]] }
  0x7b   :  { %507 = vrot.lane.b32.xlu0 %v2545_v53, %s2446_s7 }
  0x7c   :  { %509 = vrot.lane.b32.xlu1 %v2567_v63, %s2446_s7 }
  0x7f   :  { %514 = vrot.lane.b32.xlu0 %v2540_v52, %s2446_s7 }
  0x80   :  { %516 = vrot.lane.b32.xlu1 %v2561_v62, %s2446_s7  ;;  %s2792_s7 = sld [smem:[#allocation6 + $0x37]] }
  0x83   :  { %546 = vrot.lane.b32.xlu0 %v2545_v53, %s2447_s8 }
  0x84   :  { %548 = vrot.lane.b32.xlu1 %v2567_v63, %s2447_s8 }
  0x87   :  { %553 = vrot.lane.b32.xlu0 %v2540_v52, %s2447_s8 }
  0x88   :  { %555 = vrot.lane.b32.xlu1 %v2561_v62, %s2447_s8  ;;  %s2461_s8 = smov 1  }
  0x8b   :  { %585 = vrot.lane.b32.xlu0 %v2545_v53, %s2448_s9 }
  0x8c   :  { %587 = vrot.lane.b32.xlu1 %v2567_v63, %s2448_s9 }
  0x8f   :  { %592 = vrot.lane.b32.xlu0 %v2540_v52, %s2448_s9 }
  0x90   :  { %594 = vrot.lane.b32.xlu1 %v2561_v62, %s2448_s9  ;;  %s2801_s9 = sld [smem:[#allocation6 + $0x7]] }
  0x93   :  { %624 = vrot.lane.b32.xlu0 %v2545_v53, %s2449_s10 }
  0x94   :  { %626 = vrot.lane.b32.xlu1 %v2567_v63, %s2449_s10 }
  0x96   :  { %5867 = sst [smem:[#allocation40_spill]] %s2801_s9 }
  0x97   :  { %631 = vrot.lane.b32.xlu0 %v2540_v52, %s2449_s10  ;;  %s3081_s9 = sld [smem:[#allocation6 + $0xf]] }
  0x98   :  { %633 = vrot.lane.b32.xlu1 %v2561_v62, %s2449_s10  ;;  %s2808_s10 = sld [smem:[#allocation6 + $0x38]] }
  0x9b   :  { %663 = vrot.lane.b32.xlu0 %v2545_v53, %s2450_s11 }
  0x9c   :  { %665 = vrot.lane.b32.xlu1 %v2567_v63, %s2450_s11 }
  0x9d   :  { %5896 = sst [smem:[#allocation58_spill]] %s3081_s9 }
  0x9e   :  { %s3256_s9 = sld [smem:[#allocation6 + $0x11]] }
  0x9f   :  { %670 = vrot.lane.b32.xlu0 %v2540_v52, %s2450_s11 }
  0xa0   :  { %672 = vrot.lane.b32.xlu1 %v2561_v62, %s2450_s11  ;;  %s2816_s11 = sld [smem:[#allocation6 + $0x8]] }
  0xa3   :  { %702 = vrot.lane.b32.xlu0 %v2545_v53, %s2451_s12 }
  0xa4   :  { %704 = vrot.lane.b32.xlu1 %v2567_v63, %s2451_s12 }
  0xa7   :  { %709 = vrot.lane.b32.xlu0 %v2540_v52, %s2451_s12 }
  0xa8   :  { %711 = vrot.lane.b32.xlu1 %v2561_v62, %s2451_s12  ;;  %s2830_s12 = sld [smem:[#allocation6 + $0x39]] }
  0xab   :  { %741 = vrot.lane.b32.xlu0 %v2545_v53, %s2452_s13 }
  0xac   :  { %743 = vrot.lane.b32.xlu1 %v2567_v63, %s2452_s13 }
  0xad   :  { %v2623_v0 = vpop.permute.xlu1 %202  ;;  %v2625_v1 = vpop.permute.xlu0 %185 }
  0xae   :  { %5870 = sst [smem:[#allocation43_spill]] %s2830_s12 }
  0xaf   :  { %748 = vrot.lane.b32.xlu0 %v2540_v52, %s2452_s13  ;;  %s3101_s12 = sld [smem:[#allocation6 + $0x40]] }
  0xb0   :  { %750 = vrot.lane.b32.xlu1 %v2561_v62, %s2452_s13  ;;  %s2855_s13 = sld [smem:[#allocation6 + $0x9]] }
  0xb1   :  { %v2629_v2 = vpop.permute.xlu0 %234 }
  0xb2   :  { %v2631_v3 = vpop.permute.xlu1 %204 }
  0xb3   :  { %780 = vrot.lane.b32.xlu0 %v2545_v53, %s2453_s14 }
  0xb4   :  { %782 = vrot.lane.b32.xlu1 %v2567_v63, %s2453_s14 }
  0xb5   :  { %v2635_v4 = vpop.permute.xlu0 %241  ;;  %5899 = sst [smem:[#allocation61_spill]] %s3101_s12  ;;  %s5934_s12 = smov 125  }
  0xb6   :  { %v2637_v5 = vpop.permute.xlu1 %236 }
  0xb7   :  { %787 = vrot.lane.b32.xlu0 %v2540_v52, %s2453_s14 }
  0xb8   :  { %789 = vrot.lane.b32.xlu1 %v2561_v62, %s2453_s14  ;;  %s2869_s14 = sld [smem:[#allocation6 + $0x3a]] }
  0xb9   :  { %v2641_v6 = vpop.permute.xlu0 %273 }
  0xba   :  { %v2643_v7 = vpop.permute.xlu1 %243 }
  0xbb   :  { %819 = vrot.lane.b32.xlu0 %v2545_v53, %s2454_s15 }
  0xbc   :  { %821 = vrot.lane.b32.xlu1 %v2567_v63, %s2454_s15 }
  0xbd   :  { %v2647_v8 = vpop.permute.xlu0 %187 }
  0xbe   :  { %v2649_v9 = vpop.permute.xlu1 %275  ;;  %v6078_v58 = vstv %s2869_s14  ;;  %s2472_s14 = smov 109  }
  0xbf   :  { %826 = vrot.lane.b32.xlu0 %v2540_v52, %s2454_s15 }
  0xc0   :  { %828 = vrot.lane.b32.xlu1 %v2561_v62, %s2454_s15  ;;  %s2899_s15 = sld [smem:[#allocation6 + $0xa]] }
  0xc1   :  { %v2653_v10 = vpop.permute.xlu0 %280 }
  0xc2   :  { %v2655_v11 = vpop.permute.xlu1 %282 }
  0xc3   :  { %858 = vrot.lane.b32.xlu0 %v2545_v53, %s2455_s16 }
  0xc4   :  { %860 = vrot.lane.b32.xlu1 %v2567_v63, %s2455_s16 }
  0xc5   :  { %v2659_v12 = vpop.permute.xlu0 %312 }
  0xc6   :  { %v2661_v13 = vpop.permute.xlu1 %314 }
  0xc7   :  { %865 = vrot.lane.b32.xlu0 %v2540_v52, %s2455_s16 }
  0xc8   :  { %867 = vrot.lane.b32.xlu1 %v2561_v62, %s2455_s16  ;;  %s2463_s16 = smov 127  }
  0xc9   :  { %v2665_v14 = vpop.permute.xlu0 %319 }
  0xca   :  { %v2667_v15 = vpop.permute.xlu1 %321 }
  0xcb   :  { %897 = vrot.lane.b32.xlu0 %v2545_v53, %s2456_s17 }
  0xcc   :  { %899 = vrot.lane.b32.xlu1 %v2567_v63, %s2456_s17 }
  0xcd   :  { %v2671_v16 = vpop.permute.xlu0 %351 }
  0xce   :  { %v2673_v17 = vpop.permute.xlu1 %353 }
  0xcf   :  { %904 = vrot.lane.b32.xlu0 %v2540_v52, %s2456_s17 }
  0xd0   :  { %906 = vrot.lane.b32.xlu1 %v2561_v62, %s2456_s17  ;;  %s2914_s17 = sld [smem:[#allocation6 + $0x3b]] }
  0xd1   :  { %v2677_v18 = vpop.permute.xlu0 %358 }
  0xd2   :  { %v2679_v19 = vpop.permute.xlu1 %360 }
  0xd3   :  { %936 = vrot.lane.b32.xlu0 %v2545_v53, %s2457_s20 }
  0xd4   :  { %938 = vrot.lane.b32.xlu1 %v2567_v63, %s2457_s20 }
  0xd5   :  { %v2683_v20 = vpop.permute.xlu0 %390 }
  0xd6   :  { %v2685_v21 = vpop.permute.xlu1 %392 }
  0xd7   :  { %943 = vrot.lane.b32.xlu0 %v2540_v52, %s2457_s20 }
  0xd8   :  { %945 = vrot.lane.b32.xlu1 %v2561_v62, %s2457_s20  ;;  %s2933_s20 = sld [smem:[#allocation6 + $0xb]] }
  0xd9   :  { %v2689_v22 = vpop.permute.xlu0 %397 }
  0xda   :  { %v2691_v23 = vpop.permute.xlu1 %399 }
  0xdb   :  { %975 = vrot.lane.b32.xlu0 %v2545_v53, %s2458_s21 }
  0xdc   :  { %977 = vrot.lane.b32.xlu1 %v2567_v63, %s2458_s21 }
  0xdd   :  { %v2695_v24 = vpop.permute.xlu0 %429 }
  0xde   :  { %5837 = vst [vmem:[#allocation22_spill] sm:$0xff] %v2695_v24  ;;  %v2697_v25 = vpop.permute.xlu1 %431  ;;  %v5947_v24 = vstv %s2716_s23 }
  0xdf   :  { %5838 = vst [vmem:[#allocation23_spill] sm:$0xff] %v2697_v25  ;;  %982 = vrot.lane.b32.xlu0 %v2540_v52, %s2458_s21 }
  0xe0   :  { %984 = vrot.lane.b32.xlu1 %v2561_v62, %s2458_s21  ;;  %s2949_s21 = sld [smem:[#allocation6 + $0x3c]] }
  0xe1   :  { %v2701_v26 = vpop.permute.xlu0 %436 }
  0xe2   :  { %5839 = vst [vmem:[#allocation24_spill] sm:$0xff] %v2701_v26  ;;  %v2705_v28 = vpop.permute.xlu1 %438 }
  0xe3   :  { %5840 = vst [vmem:[#allocation25_spill] sm:$0xff] %v2705_v28  ;;  %1014 = vrot.lane.b32.xlu0 %v2545_v53, %s2459_s22 }
  0xe4   :  { %1016 = vrot.lane.b32.xlu1 %v2567_v63, %s2459_s22 }
  0xe5   :  { %v2710_v31 = vpop.permute.xlu0 %468 }
  0xe6   :  { %5841 = vst [vmem:[#allocation26_spill] sm:$0xff] %v2710_v31  ;;  %v2714_v33 = vpop.permute.xlu1 %470 }
  0xe7   :  { %5842 = vst [vmem:[#allocation27_spill] sm:$0xff] %v2714_v33  ;;  %1021 = vrot.lane.b32.xlu0 %v2540_v52, %s2459_s22 }
  0xe8   :  { %1023 = vrot.lane.b32.xlu1 %v2561_v62, %s2459_s22  ;;  %s2969_s22 = sld [smem:[#allocation6 + $0xc]] }
  0xe9   :  { %v2724_v35 = vpop.permute.xlu0 %475 }
  0xea   :  { %5843 = vst [vmem:[#allocation28_spill] sm:$0xff] %v2724_v35  ;;  %v2728_v36 = vpop.permute.xlu1 %477 }
  0xeb   :  { %5844 = vst [vmem:[#allocation29_spill] sm:$0xff] %v2728_v36  ;;  %1053 = vrot.lane.b32.xlu0 %v2545_v53, %s2460_s2 }
  0xec   :  { %1055 = vrot.lane.b32.xlu1 %v2567_v63, %s2460_s2 }
  0xed   :  { %v2746_v41 = vpop.permute.xlu0 %507 }
  0xee   :  { %5850 = vst [vmem:[#allocation31_spill] sm:$0xff] %v2746_v41  ;;  %v2754_v43 = vpop.permute.xlu1 %509  ;;  %5886 = sst [smem:[#allocation50_spill]] %s2969_s22 }
  0xef   :  { %5854 = vst [vmem:[#allocation33_spill] sm:$0xff] %v2754_v43  ;;  %1060 = vrot.lane.b32.xlu0 %v2540_v52, %s2460_s2  ;;  %s3179_s22 = sld [smem:[#allocation6 + $0x10]] }
  0xf0   :  { %1062 = vrot.lane.b32.xlu1 %v2561_v62, %s2460_s2  ;;  %s2990_s2 = sld [smem:[#allocation6 + $0x3d]] }
  0xf1   :  { %v2772_v50 = vpop.permute.xlu0 %514 }
  0xf2   :  { %5855 = vst [vmem:[#allocation34_spill] sm:$0xff] %v2772_v50  ;;  %v2782_v55 = vpop.permute.xlu1 %516 }
  0xf3   :  { %5859 = vst [vmem:[#allocation36_spill] sm:$0xff] %v2782_v55  ;;  %1092 = vrot.lane.b32.xlu0 %v2545_v53, %s2461_s8  ;;  %v3057_v55 = vsel %vm569_vm2, 1, %v5878_v46  ;;  %vm725_vm2 = vmand %vm2893_vm11, %vm2865_vm13 }
  0xf4   :  { %1094 = vrot.lane.b32.xlu1 %v2567_v63, %s2461_s8  ;;  %5892 = vst [vmem:[#allocation56_spill] sm:$0xff] %v3057_v55  ;;  %v3169_v55 = vsel %vm803_vm1, 1, %v5878_v46  ;;  %vm3267_vm1 = vcmp.eq.s32.totalorder %v5926_v38, 1 }
  0xf5   :  { %v2810_v29 = vpop.permute.xlu0 %546  ;;  %5906 = vst [vmem:[#allocation68_spill] sm:$0xff] %v3169_v55  ;;  %v5943_v55 = vstv %s2712_s1  ;;  %s3351_s1 = sld [smem:[#allocation6 + $0x43]] }
  0xf6   :  { %5868 = vst [vmem:[#allocation41_spill] sm:$0xff] %v2810_v29  ;;  %v2818_v34 = vpop.permute.xlu1 %548  ;;  %v2982_v29 = vsel %vm452_vm12, 1, %v5878_v46  ;;  %vm686_vm12 = vmand %vm2893_vm11, %vm2851_vm3  ;;  %v5944_v51 = vmov %v5943_v55 }
  0xf7   :  { %5869 = vst [vmem:[#allocation42_spill] sm:$0xff] %v2818_v34  ;;  %1099 = vrot.lane.b32.xlu0 %v2540_v52, %s2461_s8  ;;  %v3160_v34 = vsel %vm764_vm0, 1, %v5878_v46 }
  0xf8   :  { %1101 = vrot.lane.b32.xlu1 %v2561_v62, %s2461_s8  ;;  %s3007_s8 = sld [smem:[#allocation6 + $0xd]]  ;;  %5904 = vst [vmem:[#allocation66_spill] sm:$0xff] %v3160_v34 }
  0xf9   :  { %v2871_v49 = vpop.permute.xlu0 %553 }
  0xfa   :  { %5877 = vst [vmem:[#allocation46_spill] sm:$0xff] %v2871_v49  ;;  %v2897_v61 = vpop.permute.xlu1 %555  ;;  %v2925_v49 = vsel %vm5883_vm7, 1, %v5878_v46  ;;  %vm647_vm7 = vmand %vm2893_vm11, %vm2797_vm6 }
  0xfb   :  { %5882 = vst [vmem:[#allocation47_spill] sm:$0xff] %v2897_v61  ;;  %1171 = vrot.lane.b32.xlu0 %v2545_v53, %s2463_s16  ;;  %v3095_v33 = vsel %vm647_vm7, 1, %v5878_v46 }
  0xfc   :  { %1173 = vrot.lane.b32.xlu1 %v2567_v63, %s2463_s16  ;;  %5898 = vst [vmem:[#allocation60_spill] sm:$0xff] %v3095_v33  ;;  %v5910_v33 = vrot.slane %v2847_v45, %v2821_v37 }
  0xfd   :  { %v2947_v50 = vpop.permute.xlu0 %585 }
  0xfe   :  { %5884 = vst [vmem:[#allocation48_spill] sm:$0xff] %v2947_v50  ;;  %v2967_v61 = vpop.permute.xlu1 %587  ;;  %v3020_v50 = vsel %vm530_vm15, 1, %v5878_v46  ;;  %vm5762_vm15 = vcmp.lt.s32.totalorder %v2858_v44, 50  ;;  %vm3202_vm7 = vcmp.eq.s32.totalorder %v5910_v33, 1 }
  0xff   :  { %5885 = vst [vmem:[#allocation49_spill] sm:$0xff] %v2967_v61  ;;  %1178 = vrot.lane.b32.xlu0 %v2540_v52, %s2463_s16  ;;  %5888 = vst [vmem:[#allocation52_spill] sm:$0xff] %v3020_v50  ;;  %v3117_v50 = vsel %vm686_vm12, 1, %v5878_v46  ;;  %v245_v34 = vsel %vm5762_vm15, %v2635_v4, %v2643_v7 }
 0x100   :  { %1180 = vrot.lane.b32.xlu1 %v2561_v62, %s2463_s16  ;;  %s3028_s16 = sld [smem:[#allocation6 + $0x3e]]  ;;  %5901 = vst [vmem:[#allocation63_spill] sm:$0xff] %v3117_v50 }
 0x101   :  { %v3022_v61 = vpop.permute.xlu0 %592 }
 0x102   :  { %5889 = vst [vmem:[#allocation53_spill] sm:$0xff] %v3022_v61  ;;  %v3036_v31 = vpop.permute.xlu1 %594 }
 0x103   :  { %5890 = vst [vmem:[#allocation54_spill] sm:$0xff] %v3036_v31  ;;  %1210 = vrot.lane.b32.xlu0 %v2545_v53, %s2464_s19  ;;  %v3078_v31 = vsel %vm608_vm8, 1, %v5878_v46 }
 0x104   :  { %5895 = vst [vmem:[#allocation57_spill] sm:$0xff] %v3078_v31  ;;  %1212 = vrot.lane.b32.xlu1 %v2567_v63, %s2464_s19  ;;  %v5913_v31 = vrot.slane %v2847_v45, %v2824_v40  ;;  %v5920_v45 = vrot.slane %v2839_v56, %v2824_v40 }
 0x105   :  { %v3087_v61 = vpop.permute.xlu0 %624 }
 0x106   :  { %5897 = vst [vmem:[#allocation59_spill] sm:$0xff] %v3087_v61  ;;  %v3109_v61 = vpop.permute.xlu1 %626  ;;  %vm3209_vm12 = vcmp.eq.s32.totalorder %v5913_v31, 1 }
 0x107   :  { %5900 = vst [vmem:[#allocation62_spill] sm:$0xff] %v3109_v61  ;;  %1217 = vrot.lane.b32.xlu0 %v2540_v52, %s2464_s19  ;;  %v3146_v61 = vsel %vm725_vm2, 1, %v5878_v46  ;;  %vm5916_vm2 = vcmp.lt.s32.totalorder %v2858_v44, 51 }
 0x108   :  { %1219 = vrot.lane.b32.xlu1 %v2561_v62, %s2464_s19  ;;  %5902 = vst [vmem:[#allocation64_spill] sm:$0xff] %v3146_v61  ;;  %s5750_s19 = smov 125   ;;  %vm5917_vm0 = vmmov %vm5916_vm2 }
 0x109   :  { %v3148_v43 = vpop.permute.xlu0 %631  ;;  %v193_v33 = vsel %vm5917_vm0, %v2647_v8, %v2625_v1  ;;  %vm5919_vm8 = vmmov %vm5917_vm0  ;;  %vm3244_vm0 = vcmp.eq.s32.totalorder %v5920_v45, 1  ;;  %v5925_v45 = vstv %s2719_s24 }
 0x10a   :  { %5903 = vst [vmem:[#allocation65_spill] sm:$0xff] %v3148_v43  ;;  %v3162_v60 = vpop.permute.xlu1 %633  ;;  %v246_v43 = vsel %vm5762_vm15, %v2643_v7, %v2635_v4  ;;  %v5929_v7 = vrot.slane %v2881_v48, %v2824_v40  ;;  %v5936_v48 = vstv %s2726_s0  ;;  %s2466_s0 = smov 115  }
 0x10b   :  { %5905 = vst [vmem:[#allocation67_spill] sm:$0xff] %v3162_v60  ;;  %1249 = vrot.lane.b32.xlu0 %v2545_v53, %s5750_s19  ;;  %v5907_v60 = vrot.slane %v2839_v56, %v2821_v37  ;;  %v253_v36 = vmul.f32 %v5925_v45, %v246_v43  ;;  %v239_v43 = vsel %vm5935_vm9, %v2629_v2, %v2637_v5  ;;  %vm881_vm9 = vmand %vm3062_vm14, %vm2788_vm5 }
 0x10c   :  { %1251 = vrot.lane.b32.xlu1 %v2567_v63, %s5750_s19  ;;  %s3227_s19 = sld [smem:[#allocation6 + $0x41]]  ;;  %v210_v38 = vmul.f32 %v5936_v48, %v193_v33  ;;  %v5937_v45 = vmov %v5936_v48  ;;  %v250_v28 = vmul.f32 %v5947_v24, %v239_v43  ;;  %vm920_vm5 = vmand %vm3062_vm14, %vm2797_vm6 }
 0x10d   :  { %vm3195_vm11 = vcmp.eq.s32.totalorder %v5907_v60, 1  ;;  %v192_v60 = vsel %vm5916_vm2, %v2625_v1, %v2647_v8  ;;  %v3222_v39 = vpop.permute.xlu0 %663  ;;  %v206_v1 = vsel %vm5919_vm8, %v2623_v0, %v2631_v3  ;;  %v240_v8 = vsel %vm5762_vm15, %v2637_v5, %v2629_v2  ;;  %vm5924_vm8 = vmmov %vm5916_vm2 }
 0x10e   :  { %5918 = vst [vmem:[#allocation69_spill] sm:$0xff] %v3222_v39  ;;  %v3252_v39 = vpop.permute.xlu1 %665  ;;  %v207_v56 = vsel %vm5924_vm8, %v2631_v3, %v2623_v0  ;;  %vm3274_vm2 = vcmp.eq.s32.totalorder %v5929_v7, 1  ;;  %vm5932_vm8 = vcmp.lt.s32.totalorder %v2858_v44, 49  ;;  %v211_v7 = vmul.f32 %v5937_v45, %v192_v60 }
 0x10f   :  { %5923 = vst [vmem:[#allocation70_spill] sm:$0xff] %v3252_v39  ;;  %v284_v0 = vsel %vm5932_vm8, %v2653_v10, %v2655_v11  ;;  %vm5933_vm15 = vmmov %vm5932_vm8  ;;  %1256 = vrot.lane.b32.xlu0 %v2540_v52, %s5934_s12  ;;  %v5940_v2 = vstv %s2716_s23  ;;  %v278_v33 = vsel %vm5932_vm8, %v2641_v6, %v2649_v9  ;;  %v214_v39 = vmul.f32 %v5943_v55, %v207_v56  ;;  %s3367_s23 = sld [smem:[#allocation6 + $0x13]] }
 0x110   :  { %v285_v3 = vsel %vm5933_vm15, %v2655_v11, %v2653_v10  ;;  %1258 = vrot.lane.b32.xlu1 %v2561_v62, %s5934_s12  ;;  %vm5938_vm15 = vmand %vm3062_vm14, %vm2776_vm4  ;;  %v249_v5 = vmul.f32 %v5940_v2, %v240_v8  ;;  %v5941_v11 = vstv %s2719_s24  ;;  %v215_v8 = vmul.f32 %v5944_v51, %v206_v1  ;;  %s3336_s24 = sld [smem:[#allocation6 + $0x12]]  ;;  %s2467_s12 = smov 114  }
 0x111   :  { %v3306_v10 = vsel %vm5938_vm15, 1, %v5878_v46  ;;  %v254_v60 = vmul.f32 %v5941_v11, %v245_v34  ;;  %vm5942_vm15 = vmmov %vm5932_vm8  ;;  %v3324_v45 = vpop.permute.xlu0 %670  ;;  %v5945_v2 = vstv %s2730_s26  ;;  %v5949_v51 = vstv %s2722_s25  ;;  %s3388_s25 = sld [smem:[#allocation6 + $0x44]] }
 0x112   :  { %5939 = vst [vmem:[#allocation71_spill] sm:$0xff] %v3306_v10  ;;  %v279_v48 = vsel %vm5942_vm15, %v2649_v9, %v2641_v6  ;;  %v292_v34 = vmul.f32 %v5945_v2, %v285_v3  ;;  %v5946_v11 = vmov %v5945_v2  ;;  %v3334_v25 = vpop.permute.xlu1 %672  ;;  %v255_v26 = vadd.f32 %v253_v36, %v249_v5  ;;  %s3452_s26 = sld [smem:[#allocation6 + $0x14]]  ;;  %v6095_v10 = vld [vmem:[#allocation48_spill] sm:$0xff] }
 0x113   :  { %v293_v42 = vmul.f32 %v5946_v11, %v284_v0  ;;  %1288 = vrot.lane.b32.xlu0 %v2545_v53, %s2466_s0  ;;  %v3349_v9 = vsel %vm881_vm9, 1, %v5878_v46  ;;  %v288_v55 = vmul.f32 %v5949_v51, %v279_v48  ;;  %v5950_v1 = vmov %v5949_v51 }
 0x114   :  { %5948 = vst [vmem:[#allocation72_spill] sm:$0xff] %v3349_v9  ;;  %v289_v24 = vmul.f32 %v5950_v1, %v278_v33  ;;  %v216_v36 = vadd.f32 %v214_v39, %v210_v38  ;;  %v217_v56 = vadd.f32 %v215_v8, %v211_v7  ;;  %1290 = vrot.lane.b32.xlu1 %v2567_v63, %s2466_s0  ;;  %vm5954_vm15 = vcmp.lt.s32.totalorder %v2858_v44, 48 }
 0x115   :  { %v256_v0 = vadd.f32 %v254_v60, %v250_v28  ;;  %v3360_v3 = vpop.permute.xlu0 %702  ;;  %v294_v39 = vadd.f32 %v292_v34, %v288_v55  ;;  %v5951_v7 = vrot.slane %v2889_v54, %v2821_v37  ;;  %v324_v28 = vsel %vm5954_vm15, %v2667_v15, %v2665_v14 }
 0x116   :  { %v295_v38 = vadd.f32 %v293_v42, %v289_v24  ;;  %vm394_vm8 = vcmp.lt.s32.totalorder %v2858_v44, 46  ;;  %v3381_v60 = vpop.permute.xlu1 %704  ;;  %v5955_v42 = vrot.slane %v2889_v54, %v2824_v40  ;;  %v323_v34 = vsel %vm5954_vm15, %v2665_v14, %v2667_v15 }
 0x117   :  { %vm3372_vm9 = vcmp.eq.s32.totalorder %v5951_v7, 1  ;;  %1295 = vrot.lane.b32.xlu0 %v2540_v52, %s2466_s0  ;;  %v269_v55 = vsel %vm3195_vm11, %v255_v26, 0.0  ;;  %v230_v1 = vsel %vm3202_vm7, %v216_v36, 0.0  ;;  %v231_v14 = vsel %vm3209_vm12, %v217_v56, 0.0  ;;  %vm5958_vm11 = vmmov %vm5954_vm15 }
 0x118   :  { %vm3393_vm4 = vcmp.eq.s32.totalorder %v5955_v42, 1  ;;  %v318_v15 = vsel %vm5954_vm15, %v2661_v13, %v2659_v12  ;;  %1297 = vrot.lane.b32.xlu1 %v2561_v62, %s2466_s0  ;;  %v270_v35 = vsel %vm3244_vm0, %v256_v0, 0.0  ;;  %v317_v61 = vsel %vm5958_vm11, %v2659_v12, %v2661_v13  ;;  %vm959_vm7 = vmand %vm3062_vm14, %vm2851_vm3  ;;  %5962 = sst [smem:[#allocation74_spill]] %s3452_s26 }
 0x119   :  { %v5959_v26 = vstv %s2744_s28  ;;  %v3428_v24 = vpop.permute.xlu0 %709  ;;  %v3436_v31 = vsel %vm920_vm5, 1, %v5878_v46  ;;  %v308_v12 = vsel %vm3267_vm1, %v294_v39, 0.0  ;;  %v309_v13 = vsel %vm3274_vm2, %v295_v38, 0.0  ;;  %s2468_s28 = smov 113   ;;  %s3721_s0 = sld [smem:[#allocation6 + $0x48]] }
 0x11a   :  { %v331_v41 = vmul.f32 %v5959_v26, %v324_v28  ;;  %5960 = vst [vmem:[#allocation73_spill] sm:$0xff] %v3436_v31  ;;  %v5961_v36 = vmov %v5959_v26  ;;  %vm433_vm12 = vcmp.lt.s32.totalorder %v2858_v44, 45  ;;  %v3449_v0 = vpop.permute.xlu1 %711  ;;  %v271_v28 = vadd.f32 %v269_v55, %v230_v1  ;;  %s3736_s26 = sld [smem:[#allocation6 + $0x49]] }
 0x11b   :  { %v332_v56 = vmul.f32 %v5961_v36, %v323_v34  ;;  %v272_v42 = vadd.f32 %v270_v35, %v231_v14  ;;  %v5963_v26 = vstv %s2737_s27  ;;  %1327 = vrot.lane.b32.xlu0 %v2545_v53, %s2467_s12  ;;  %v3473_v55 = vsel %vm959_vm7, 1, %v5878_v46  ;;  %s3525_s27 = sld [smem:[#allocation6 + $0x45]]  ;;  %vm998_vm7 = vmand %vm3062_vm14, %vm2865_vm13 }
 0x11c   :  { %v327_v8 = vmul.f32 %v5963_v26, %v318_v15  ;;  %v5964_v4 = vmov %v5963_v26  ;;  %1329 = vrot.lane.b32.xlu1 %v2567_v63, %s2467_s12  ;;  %5965 = vst [vmem:[#allocation75_spill] sm:$0xff] %v3473_v55  ;;  %v310_v1 = vadd.f32 %v308_v12, %v271_v28  ;;  %v5966_v26 = vrot.slane %v2925_v49, %v2821_v37  ;;  %v6091_v55 = vld [vmem:[#allocation18_spill] sm:$0xff] }
 0x11d   :  { %v328_v39 = vmul.f32 %v5964_v4, %v317_v61  ;;  %v311_v14 = vadd.f32 %v309_v13, %v272_v42  ;;  %v3475_v35 = vpop.permute.xlu0 %741  ;;  %v5969_v7 = vrot.slane %v2925_v49, %v2824_v40  ;;  %vm5972_vm2 = vcmp.lt.s32.totalorder %v2858_v44, 47 }
 0x11e   :  { %v333_v15 = vadd.f32 %v331_v41, %v327_v8  ;;  %vm3481_vm5 = vcmp.eq.s32.totalorder %v5966_v26, 1  ;;  %v362_v8 = vsel %vm5972_vm2, %v2677_v18, %v2679_v19  ;;  %vm5973_vm0 = vmmov %vm5972_vm2  ;;  %v3500_v12 = vpop.permute.xlu1 %743  ;;  %v5985_v13 = vstv %s2752_s29  ;;  %s3592_s29 = sld [smem:[#allocation6 + $0x15]] }
 0x11f   :  { %v334_v36 = vadd.f32 %v332_v56, %v328_v39  ;;  %vm3488_vm1 = vcmp.eq.s32.totalorder %v5969_v7, 1  ;;  %v363_v41 = vsel %vm5973_vm0, %v2679_v19, %v2677_v18  ;;  %vm5974_vm15 = vmmov %vm5973_vm0  ;;  %v5975_v56 = vrot.slane %v2961_v47, %v2821_v37  ;;  %1334 = vrot.lane.b32.xlu0 %v2540_v52, %s2467_s12 }
 0x120   :  { %v356_v49 = vsel %vm5974_vm15, %v2671_v16, %v2673_v17  ;;  %v402_v18 = vsel %vm394_vm8, %v2691_v23, %v2689_v22  ;;  %vm5978_vm2 = vmmov %vm5973_vm0  ;;  %v5979_v39 = vrot.slane %v2961_v47, %v2824_v40  ;;  %1336 = vrot.lane.b32.xlu1 %v2561_v62, %s2467_s12  ;;  %vm134_vm15 = vcmp.ge.s32.totalorder %v2703_v27, 0  ;;  %s2469_s12 = smov 112  }
 0x121   :  { %vm3510_vm11 = vcmp.eq.s32.totalorder %v5975_v56, 1  ;;  %v357_v42 = vsel %vm5978_vm2, %v2673_v17, %v2671_v16  ;;  %v401_v56 = vsel %vm394_vm8, %v2689_v22, %v2691_v23  ;;  %vm135_vm2 = vcmp.lt.s32.totalorder %v2703_v27, 16  ;;  %v3556_v23 = vpop.permute.xlu0 %748 }
 0x122   :  { %vm3534_vm0 = vcmp.eq.s32.totalorder %v5979_v39, 1  ;;  %v347_v47 = vsel %vm3372_vm9, %v333_v15, 0.0  ;;  %v5982_v16 = vstv %s2756_s30  ;;  %v396_v22 = vsel %vm394_vm8, %v2685_v21, %v2683_v20  ;;  %s3625_s30 = sld [smem:[#allocation6 + $0x46]] }
 0x123   :  { %v370_v17 = vmul.f32 %v5982_v16, %v363_v41  ;;  %v5983_v39 = vmov %v5982_v16  ;;  %v348_v33 = vsel %vm3393_vm4, %v334_v36, 0.0  ;;  %v395_v15 = vsel %vm394_vm8, %v2683_v20, %v2685_v21  ;;  %v3570_v16 = vpop.permute.xlu1 %750  ;;  %v5991_v20 = vld [vmem:[#allocation24_spill] sm:$0xff]  ;;  %v5992_v21 = vld [vmem:[#allocation25_spill] sm:$0xff]  ;;  %1366 = vrot.lane.b32.xlu0 %v2545_v53, %s2468_s28  ;;  %vm3598_vm8 = vmand %vm134_vm15, %vm135_vm2 }
 0x124   :  { %v371_v61 = vmul.f32 %v5983_v39, %v362_v8  ;;  %v5984_v8 = vstv %s2770_s5  ;;  %v366_v28 = vmul.f32 %v5985_v13, %v357_v42  ;;  %v5986_v19 = vmov %v5985_v13  ;;  %1368 = vrot.lane.b32.xlu1 %v2567_v63, %s2468_s28  ;;  %s3685_s5 = sld [smem:[#allocation6 + $0x47]] }
 0x125   :  { %v409_v41 = vmul.f32 %v5984_v8, %v402_v18  ;;  %v367_v34 = vmul.f32 %v5986_v19, %v356_v49  ;;  %v5987_v38 = vmov %v5984_v8  ;;  %v5988_v2 = vrot.slane %v2982_v29, %v2821_v37  ;;  %v3633_v30 = vpop.permute.xlu0 %780 }
 0x126   :  { %v410_v11 = vmul.f32 %v5987_v38, %v401_v56  ;;  %v441_v18 = vsel %vm433_vm12, %v5992_v21, %v5991_v20  ;;  %v349_v13 = vadd.f32 %v347_v47, %v310_v1  ;;  %v5995_v49 = vstv %s2763_s4  ;;  %6003 = vst [vmem:[#allocation25_spill] sm:$0xff] %v3633_v30  ;;  %s3655_s4 = sld [smem:[#allocation6 + $0x16]]  ;;  %v6115_v30 = vld [vmem:[#allocation59_spill] sm:$0xff] }
 0x127   :  { %vm3582_vm4 = vcmp.eq.s32.totalorder %v5988_v2, 1  ;;  %v405_v19 = vmul.f32 %v5995_v49, %v396_v22  ;;  %v5996_v42 = vrot.slane %v2982_v29, %v2824_v40  ;;  %v440_v27 = vsel %vm433_vm12, %v5991_v20, %v5992_v21  ;;  %v6001_v2 = vld [vmem:[#allocation22_spill] sm:$0xff]  ;;  %v6002_v20 = vld [vmem:[#allocation23_spill] sm:$0xff]  ;;  %1373 = vrot.lane.b32.xlu0 %v2540_v52, %s2468_s28 }
 0x128   :  { %v3623_v29 = vsel %vm998_vm7, 1, %v5878_v46  ;;  %v372_v1 = vadd.f32 %v370_v17, %v366_v28  ;;  %v373_v47 = vadd.f32 %v371_v61, %v367_v34  ;;  %v6000_v22 = vmov %v5995_v49  ;;  %v3642_v34 = vpop.permute.xlu1 %782  ;;  %vm1037_vm7 = vmand %vm3598_vm8, %vm2748_vm10  ;;  %1375 = vrot.lane.b32.xlu1 %v2561_v62, %s2468_s28  ;;  %s3730_s28 = sld [smem:[#allocation6 + $0x18]]  ;;  %v6075_v61 = vld [vmem:[#allocation41_spill] sm:$0xff] }
 0x129   :  { %vm3607_vm9 = vcmp.eq.s32.totalorder %v5996_v42, 1  ;;  %5999 = vst [vmem:[#allocation24_spill] sm:$0xff] %v3623_v29  ;;  %v406_v8 = vmul.f32 %v6000_v22, %v395_v15  ;;  %v435_v21 = vsel %vm433_vm12, %v6002_v20, %v6001_v2  ;;  %v350_v49 = vadd.f32 %v348_v33, %v311_v14  ;;  %6005 = vst [vmem:[#allocation22_spill] sm:$0xff] %v3642_v34 }
 0x12a   :  { %v411_v42 = vadd.f32 %v409_v41, %v405_v19  ;;  %v434_v39 = vsel %vm433_vm12, %v6001_v2, %v6002_v20  ;;  %v6004_v6 = vstv %s2792_s7  ;;  %v6008_v41 = vstv %s2780_s6  ;;  %v6009_v19 = vld [vmem:[#allocation51_spill] sm:$0xff]  ;;  %s3703_s7 = sld [smem:[#allocation6 + $0x17]] }
 0x12b   :  { %v448_v28 = vmul.f32 %v6004_v6, %v441_v18  ;;  %v412_v17 = vadd.f32 %v410_v11, %v406_v8  ;;  %v6007_v15 = vmov %v6004_v6  ;;  %v444_v18 = vmul.f32 %v6008_v41, %v435_v21  ;;  %v6016_v8 = vld [vmem:[#allocation29_spill] sm:$0xff]  ;;  %v6017_v20 = vld [vmem:[#allocation28_spill] sm:$0xff]  ;;  %v3693_v6 = vpop.permute.xlu0 %787  ;;  %s6028_s6 = sld [smem:[#allocation40_spill]]  ;;  %1405 = vrot.lane.b32.xlu0 %v2545_v53, %s2469_s12 }
 0x12c   :  { %v449_v14 = vmul.f32 %v6007_v15, %v440_v27  ;;  %v6010_v22 = vrot.slane %v6009_v19, %v2821_v37  ;;  %v6013_v11 = vrot.slane %v6009_v19, %v2824_v40  ;;  %vm6018_vm2 = vcmp.lt.s32.totalorder %v2858_v44, 35  ;;  %1407 = vrot.lane.b32.xlu1 %v2567_v63, %s2469_s12 }
 0x12d   :  { %v479_v15 = vsel %vm6018_vm2, %v6017_v20, %v6016_v8  ;;  %vm6019_vm14 = vmmov %vm6018_vm2  ;;  %v386_v19 = vsel %vm3481_vm5, %v372_v1, 0.0  ;;  %v425_v4 = vsel %vm3510_vm11, %v411_v42, 0.0  ;;  %v450_v50 = vadd.f32 %v448_v28, %v444_v18  ;;  %v6022_v1 = vld [vmem:[#allocation27_spill] sm:$0xff] }
 0x12e   :  { %vm3662_vm12 = vcmp.eq.s32.totalorder %v6010_v22, 1  ;;  %vm3669_vm15 = vcmp.eq.s32.totalorder %v6013_v11, 1  ;;  %v480_v21 = vsel %vm6019_vm14, %v6016_v8, %v6017_v20  ;;  %v387_v22 = vsel %vm3488_vm1, %v373_v47, 0.0  ;;  %v6023_v47 = vld [vmem:[#allocation26_spill] sm:$0xff]  ;;  %vm6024_vm5 = vmmov %vm6018_vm2 }
 0x12f   :  { %v6020_v11 = vmov %v6008_v41  ;;  %v3701_v8 = vsel %vm1037_vm7, 1, %v5878_v46  ;;  %vm6025_vm1 = vmmov %vm6018_vm2  ;;  %v6026_v41 = vld [vmem:[#allocation30_spill] sm:$0xff]  ;;  %v426_v7 = vsel %vm3534_vm0, %v412_v17, 0.0  ;;  %v6029_v28 = vstv %s2808_s10  ;;  %1412 = vrot.lane.b32.xlu0 %v2540_v52, %s2469_s12  ;;  %s6048_s10 = sld [smem:[#allocation43_spill]] }
 0x130   :  { %v445_v33 = vmul.f32 %v6020_v11, %v434_v39  ;;  %6021 = vst [vmem:[#allocation23_spill] sm:$0xff] %v3701_v8  ;;  %v473_v39 = vsel %vm6024_vm5, %v6023_v47, %v6022_v1  ;;  %v474_v20 = vsel %vm6025_vm1, %v6022_v1, %v6023_v47  ;;  %v3715_v11 = vpop.permute.xlu1 %789  ;;  %vm6027_vm14 = vnez %v6026_v41  ;;  %v6062_v41 = vld [vmem:[#allocation46_spill] sm:$0xff]  ;;  %v6080_v8 = vld [vmem:[#allocation57_spill] sm:$0xff] }
 0x131   :  { %vm1076_vm11 = vmand %vm3598_vm8, %vm6027_vm14  ;;  %v487_v18 = vmul.f32 %v6029_v28, %v480_v21  ;;  %v6030_v54 = vmov %v6029_v28  ;;  %v388_v47 = vadd.f32 %v386_v19, %v349_v13  ;;  %v389_v51 = vadd.f32 %v387_v22, %v350_v49  ;;  %v6035_v21 = vld [vmem:[#allocation35_spill] sm:$0xff]  ;;  %1414 = vrot.lane.b32.xlu1 %v2561_v62, %s2469_s12  ;;  %s4804_s12 = sld [smem:[#allocation6 + $0x4f]] }
 0x132   :  { %v451_v42 = vadd.f32 %v449_v14, %v445_v33  ;;  %v488_v1 = vmul.f32 %v6030_v54, %v479_v15  ;;  %vm550_vm7 = vcmp.lt.s32.totalorder %v2858_v44, 33  ;;  %v6031_v17 = vstv %s6028_s6  ;;  %v3742_v15 = vpop.permute.xlu0 %819  ;;  %s2470_s6 = smov 111  }
 0x133   :  { %v483_v14 = vmul.f32 %v6031_v17, %v474_v20  ;;  %v6032_v33 = vmov %v6031_v17  ;;  %6033 = vst [vmem:[#allocation51_spill] sm:$0xff] %v3742_v15  ;;  %v3752_v49 = vsel %vm1076_vm11, 1, %v5878_v46  ;;  %vm6036_vm0 = vnez %v6035_v21  ;;  %1444 = vrot.lane.b32.xlu0 %v2545_v53, %s2470_s6  ;;  %v6061_v21 = vld [vmem:[#allocation47_spill] sm:$0xff] }
 0x134   :  { %v484_v54 = vmul.f32 %v6032_v33, %v473_v39  ;;  %6034 = vst [vmem:[#allocation29_spill] sm:$0xff] %v3752_v49  ;;  %vm1115_vm2 = vmand %vm3598_vm8, %vm6036_vm0  ;;  %v427_v19 = vadd.f32 %v425_v4, %v388_v47  ;;  %v428_v22 = vadd.f32 %v426_v7, %v389_v51  ;;  %v464_v39 = vsel %vm3582_vm4, %v450_v50, 0.0  ;;  %v3760_v20 = vpop.permute.xlu1 %821  ;;  %v6044_v51 = vld [vmem:[#allocation36_spill] sm:$0xff]  ;;  %v6045_v50 = vld [vmem:[#allocation34_spill] sm:$0xff] }
 0x135   :  { %6037 = vst [vmem:[#allocation28_spill] sm:$0xff] %v3760_v20  ;;  %v465_v17 = vsel %vm3607_vm9, %v451_v42, 0.0  ;;  %v489_v33 = vadd.f32 %v487_v18, %v483_v14  ;;  %vm589_vm5 = vcmp.lt.s32.totalorder %v2858_v44, 32  ;;  %v3781_v56 = vsel %vm1115_vm2, 1, %v5878_v46  ;;  %v6039_v42 = vld [vmem:[#allocation33_spill] sm:$0xff]  ;;  %v6040_v18 = vld [vmem:[#allocation31_spill] sm:$0xff]  ;;  %1446 = vrot.lane.b32.xlu1 %v2567_v63, %s2470_s6 }
 0x136   :  { %v490_v43 = vadd.f32 %v488_v1, %v484_v54  ;;  %6038 = vst [vmem:[#allocation27_spill] sm:$0xff] %v3781_v56  ;;  %v466_v7 = vadd.f32 %v464_v39, %v427_v19  ;;  %vm6041_vm4 = vcmp.lt.s32.totalorder %v2858_v44, 34  ;;  %v3791_v14 = vpop.permute.xlu0 %826  ;;  %v467_v4 = vadd.f32 %v465_v17, %v428_v22  ;;  %v6050_v54 = vld [vmem:[#allocation52_spill] sm:$0xff]  ;;  %v6094_v20 = vld [vmem:[#allocation49_spill] sm:$0xff] }
 0x137   :  { %v512_v1 = vsel %vm6041_vm4, %v6040_v18, %v6039_v42  ;;  %vm6042_vm9 = vmmov %vm6041_vm4  ;;  %6043 = vst [vmem:[#allocation26_spill] sm:$0xff] %v3791_v14  ;;  %v503_v22 = vsel %vm3662_vm12, %v489_v33, 0.0  ;;  %v6051_v36 = vrot.slane %v6050_v54, %v2821_v37  ;;  %v1132_v2 = vstv %s3730_s28  ;;  %1451 = vrot.lane.b32.xlu0 %v2540_v52, %s2470_s6  ;;  %s2482_s28 = smov 81  }
 0x138   :  { %v513_v47 = vsel %vm6042_vm9, %v6039_v42, %v6040_v18  ;;  %vm6046_vm1 = vmmov %vm6041_vm4  ;;  %v3803_v42 = vpop.permute.xlu1 %828  ;;  %v504_v17 = vsel %vm3669_vm15, %v490_v43, 0.0  ;;  %v6057_v27 = vstv %s2816_s11  ;;  %v6059_v28 = vstv %s6048_s10  ;;  %s2471_s11 = smov 110   ;;  %s4833_s10 = sld [smem:[#allocation6 + $0x1f]] }
 0x139   :  { %v518_v19 = vsel %vm6046_vm1, %v6045_v50, %v6044_v51  ;;  %vm6047_vm11 = vmmov %vm6046_vm1  ;;  %6049 = vst [vmem:[#allocation33_spill] sm:$0xff] %v3803_v42  ;;  %vm3813_vm4 = vcmp.eq.s32.totalorder %v6051_v36, 1  ;;  %v522_v33 = vmul.f32 %v6057_v27, %v513_v47  ;;  %v6058_v36 = vmov %v6057_v27  ;;  %1453 = vrot.lane.b32.xlu1 %v2561_v62, %s2470_s6  ;;  %s4842_s6 = sld [smem:[#allocation6 + $0x50]] }
 0x13a   :  { %v519_v39 = vsel %vm6047_vm11, %v6044_v51, %v6045_v50  ;;  %v6054_v51 = vrot.slane %v6050_v54, %v2824_v40  ;;  %v523_v18 = vmul.f32 %v6058_v36, %v512_v1  ;;  %v6060_v48 = vmov %v6059_v28  ;;  %v3850_v47 = vpop.permute.xlu0 %858 }
 0x13b   :  { %v526_v13 = vmul.f32 %v6059_v28, %v519_v39  ;;  %v527_v5 = vmul.f32 %v6060_v48, %v518_v19  ;;  %v557_v43 = vsel %vm550_vm7, %v6062_v41, %v6061_v21  ;;  %v558_v1 = vsel %vm550_vm7, %v6061_v21, %v6062_v41  ;;  %6063 = vst [vmem:[#allocation31_spill] sm:$0xff] %v3850_v47  ;;  %v6064_v28 = vld [vmem:[#allocation56_spill] sm:$0xff] }
 0x13c   :  { %vm3820_vm9 = vcmp.eq.s32.totalorder %v6054_v51, 1  ;;  %v1138_v51 = vstv %s3736_s26  ;;  %v3852_v27 = vadd.f32 %v503_v22, %v466_v7  ;;  %v3854_v36 = vadd.f32 %v504_v17, %v467_v4  ;;  %v3870_v41 = vpop.permute.xlu1 %860  ;;  %v6072_v21 = vld [vmem:[#allocation16_spill] sm:$0xff]  ;;  %v6074_v17 = vld [vmem:[#allocation42_spill] sm:$0xff]  ;;  %1483 = vrot.lane.b32.xlu0 %v2545_v53, %s2471_s11  ;;  %s2479_s26 = smov 93  }
 0x13d   :  { %v6065_v48 = vrot.slane %v6064_v28, %v2821_v37  ;;  %v6068_v39 = vrot.slane %v6064_v28, %v2824_v40  ;;  %6071 = vst [vmem:[#allocation36_spill] sm:$0xff] %v3870_v41  ;;  %v1133_v7 = vmul.f32 %v1132_v2, %v6072_v21  ;;  %v6073_v4 = vld [vmem:[#allocation20_spill] sm:$0xff]  ;;  %v552_v28 = vsel %vm550_vm7, %v6074_v17, %v6075_v61 }
 0x13e   :  { %v1134_v22 = vmul.f32 %v1132_v2, %v6073_v4  ;;  %v6077_v4 = vld [vmem:[#allocation21_spill] sm:$0xff]  ;;  %v565_v32 = vmul.f32 %v6078_v58, %v558_v1  ;;  %v6079_v56 = vmov %v6078_v58  ;;  %v6084_v29 = vrot.slane %v6080_v8, %v2824_v40  ;;  %v6088_v58 = vld [vmem:[#allocation53_spill] sm:$0xff]  ;;  %1485 = vrot.lane.b32.xlu1 %v2567_v63, %s2471_s11  ;;  %v6131_v19 = vld [vmem:[#allocation70_spill] sm:$0xff] }
 0x13f   :  { %vm3859_vm12 = vcmp.eq.s32.totalorder %v6065_v48, 1  ;;  %vm3866_vm15 = vcmp.eq.s32.totalorder %v6068_v39, 1  ;;  %v551_v48 = vsel %vm550_vm7, %v6075_v61, %v6074_v17  ;;  %v6076_v39 = vld [vmem:[#allocation17_spill] sm:$0xff]  ;;  %v3889_v59 = vmul.f32 %v1132_v2, %v6077_v4  ;;  %v3919_v4 = vpop.permute.xlu0 %865 }
 0x140   :  { %v3886_v21 = vmul.f32 %v1132_v2, %v6076_v39  ;;  %v566_v49 = vmul.f32 %v6079_v56, %v557_v43  ;;  %v6081_v61 = vrot.slane %v6080_v8, %v2821_v37  ;;  %vm3905_vm11 = vcmp.eq.s32.totalorder %v6084_v29, 1  ;;  %v6087_v2 = vld [vmem:[#allocation54_spill] sm:$0xff]  ;;  %6089 = vst [vmem:[#allocation34_spill] sm:$0xff] %v3919_v4  ;;  %v6090_v29 = vld [vmem:[#allocation14_spill] sm:$0xff]  ;;  %1490 = vrot.lane.b32.xlu0 %v2540_v52, %s2471_s11 }
 0x141   :  { %v596_v56 = vsel %vm589_vm5, %v6088_v58, %v6087_v2  ;;  %v597_v43 = vsel %vm589_vm5, %v6087_v2, %v6088_v58  ;;  %v528_v1 = vadd.f32 %v526_v13, %v522_v33  ;;  %v529_v8 = vadd.f32 %v527_v5, %v523_v18  ;;  %v3935_v13 = vpop.permute.xlu1 %867 }
 0x142   :  { %vm3898_vm7 = vcmp.eq.s32.totalorder %v6081_v61, 1  ;;  %v1139_v61 = vmul.f32 %v1138_v51, %v6090_v29  ;;  %v1140_v31 = vmul.f32 %v1138_v51, %v6091_v55  ;;  %v6092_v47 = vstv %s2855_s13  ;;  %6096 = vst [vmem:[#allocation52_spill] sm:$0xff] %v3935_v13  ;;  %v6107_v29 = vld [vmem:[#allocation65_spill] sm:$0xff]  ;;  %1492 = vrot.lane.b32.xlu1 %v2561_v62, %s2471_s11  ;;  %s6133_s13 = sld [smem:[#allocation50_spill]]  ;;  %s2483_s11 = smov 80  }
 0x143   :  { %v561_v41 = vmul.f32 %v6092_v47, %v552_v28  ;;  %v6093_v9 = vmov %v6092_v47  ;;  %v590_v2 = vsel %vm589_vm5, %v6095_v10, %v6094_v20  ;;  %v591_v5 = vsel %vm589_vm5, %v6094_v20, %v6095_v10  ;;  %v6099_v28 = vld [vmem:[#allocation60_spill] sm:$0xff]  ;;  %v6106_v20 = vld [vmem:[#allocation67_spill] sm:$0xff] }
 0x144   :  { %v562_v15 = vmul.f32 %v6093_v9, %v551_v48  ;;  %v6097_v18 = vstv %s2914_s17  ;;  %v6100_v9 = vrot.slane %v6099_v28, %v2821_v37  ;;  %v6103_v58 = vrot.slane %v6099_v28, %v2824_v40  ;;  %v6110_v28 = vld [vmem:[#allocation15_spill] sm:$0xff]  ;;  %1522 = vrot.lane.b32.xlu0 %v2545_v53, %s2472_s14  ;;  %s6167_s17 = sld [smem:[#allocation61_spill]] }
 0x145   :  { %v604_v55 = vmul.f32 %v6097_v18, %v597_v43  ;;  %v6098_v33 = vmov %v6097_v18  ;;  %vm6108_vm5 = vcmp.lt.s32.totalorder %v2858_v44, 31  ;;  %v567_v18 = vadd.f32 %v565_v32, %v561_v41 }
 0x146   :  { %v605_v47 = vmul.f32 %v6098_v33, %v596_v56  ;;  %vm3944_vm1 = vcmp.eq.s32.totalorder %v6100_v9, 1  ;;  %vm3951_vm2 = vcmp.eq.s32.totalorder %v6103_v58, 1  ;;  %v635_v43 = vsel %vm6108_vm5, %v6107_v29, %v6106_v20  ;;  %vm6109_vm0 = vmmov %vm6108_vm5  ;;  %v6111_v58 = vld [vmem:[#allocation19_spill] sm:$0xff]  ;;  %1524 = vrot.lane.b32.xlu1 %v2567_v63, %s2472_s14 }
 0x147   :  { %v636_v56 = vsel %vm6109_vm0, %v6106_v20, %v6107_v29  ;;  %v568_v33 = vadd.f32 %v566_v49, %v562_v15  ;;  %v1141_v9 = vmul.f32 %v1138_v51, %v6110_v28  ;;  %v3968_v4 = vmul.f32 %v1138_v51, %v6111_v58  ;;  %v6114_v29 = vld [vmem:[#allocation62_spill] sm:$0xff]  ;;  %vm6116_vm5 = vmmov %vm6109_vm0  ;;  %v3982_v49 = vpop.permute.xlu0 %897  ;;  %v3992_v28 = vpop.permute.xlu1 %899 }
 0x148   :  { %v6112_v13 = vstv %s2899_s15  ;;  %v629_v32 = vsel %vm6109_vm0, %v6115_v30, %v6114_v29  ;;  %v630_v15 = vsel %vm6116_vm5, %v6114_v29, %v6115_v30  ;;  %v542_v51 = vsel %vm3813_vm4, %v528_v1, 0.0  ;;  %1529 = vrot.lane.b32.xlu0 %v2540_v52, %s2472_s14  ;;  %s6164_s15 = sld [smem:[#allocation55_spill]] }
 0x149   :  { %v600_v14 = vmul.f32 %v6112_v13, %v591_v5  ;;  %v6113_v42 = vmov %v6112_v13  ;;  %v543_v41 = vsel %vm3820_vm9, %v529_v8, 0.0  ;;  %v3996_v30 = vadd.f32 %v1139_v61, %v1133_v7 }
 0x14a   :  { %v601_v20 = vmul.f32 %v6113_v42, %v590_v2  ;;  %v6117_v42 = vstv %s2949_s21  ;;  %v3998_v29 = vadd.f32 %v1140_v31, %v1134_v22  ;;  %v6119_v26 = vstv %s2933_s20  ;;  %1531 = vrot.lane.b32.xlu1 %v2561_v62, %s2472_s14  ;;  %s2473_s20 = smov 99   ;;  %s2474_s21 = smov 98  }
 0x14b   :  { %v643_v2 = vmul.f32 %v6117_v42, %v636_v56  ;;  %v6118_v5 = vmov %v6117_v42  ;;  %v606_v58 = vadd.f32 %v604_v55, %v600_v14  ;;  %v639_v1 = vmul.f32 %v6119_v26, %v630_v15  ;;  %v6123_v55 = vld [vmem:[#allocation63_spill] sm:$0xff]  ;;  %s4880_s14 = sld [smem:[#allocation6 + $0x51]] }
 0x14c   :  { %v644_v13 = vmul.f32 %v6118_v5, %v635_v43  ;;  %v607_v34 = vadd.f32 %v605_v47, %v601_v20  ;;  %v6120_v50 = vmov %v6119_v26  ;;  %vm6121_vm4 = vcmp.lt.s32.totalorder %v2858_v44, 30  ;;  %1561 = vrot.lane.b32.xlu0 %v2545_v53, %s2473_s20 }
 0x14d   :  { %v640_v8 = vmul.f32 %v6120_v50, %v629_v32  ;;  %v674_v43 = vsel %vm6121_vm4, %v3324_v45, %v3334_v25  ;;  %vm6122_vm9 = vmmov %vm6121_vm4  ;;  %v544_v7 = vadd.f32 %v542_v51, %v3852_v27  ;;  %v545_v31 = vadd.f32 %v543_v41, %v3854_v36  ;;  %v4033_v27 = vpop.permute.xlu0 %904  ;;  %v4048_v32 = vpop.permute.xlu1 %906 }
 0x14e   :  { %v675_v14 = vsel %vm6122_vm9, %v3334_v25, %v3324_v45  ;;  %v581_v22 = vsel %vm3859_vm12, %v567_v18, 0.0  ;;  %v582_v61 = vsel %vm3866_vm15, %v568_v33, 0.0  ;;  %v6124_v47 = vrot.slane %v6123_v55, %v2821_v37  ;;  %v6132_v18 = vld [vmem:[#allocation69_spill] sm:$0xff]  ;;  %vm6134_vm0 = vmmov %vm6122_vm9  ;;  %1563 = vrot.lane.b32.xlu1 %v2567_v63, %s2473_s20 }
 0x14f   :  { %v6127_v25 = vrot.slane %v6123_v55, %v2824_v40  ;;  %vm6130_vm12 = vnez %v5862_v57  ;;  %v645_v54 = vadd.f32 %v643_v2, %v639_v1  ;;  %v646_v36 = vadd.f32 %v644_v13, %v640_v8 }
 0x150   :  { %vm4022_vm5 = vcmp.eq.s32.totalorder %v6124_v47, 1  ;;  %vm1147_vm15 = vmand %vm3598_vm8, %vm6130_vm12  ;;  %v668_v33 = vsel %vm6122_vm9, %v6132_v18, %v6131_v19  ;;  %v669_v20 = vsel %vm6134_vm0, %v6131_v19, %v6132_v18  ;;  %vm784_vm14 = vcmp.lt.s32.totalorder %v2858_v44, 18  ;;  %v6143_v47 = vld [vmem:[#allocation64_spill] sm:$0xff]  ;;  %1568 = vrot.lane.b32.xlu0 %v2540_v52, %s2473_s20 }
 0x151   :  { %vm4029_vm4 = vcmp.eq.s32.totalorder %v6127_v25, 1  ;;  %v620_v15 = vsel %vm3898_vm7, %v606_v58, 0.0  ;;  %v621_v51 = vsel %vm3905_vm11, %v607_v34, 0.0  ;;  %v6135_v41 = vstv %s2990_s2  ;;  %s4556_s2 = sld [smem:[#allocation6 + $0x19]] }
 0x152   :  { %v682_v42 = vmul.f32 %v6135_v41, %v675_v14  ;;  %v6136_v2 = vmov %v6135_v41  ;;  %v583_v13 = vadd.f32 %v581_v22, %v544_v7  ;;  %v584_v26 = vadd.f32 %v582_v61, %v545_v31  ;;  %v4090_v22 = vpop.permute.xlu1 %938  ;;  %1570 = vrot.lane.b32.xlu1 %v2561_v62, %s2473_s20  ;;  %s4918_s20 = sld [smem:[#allocation6 + $0x52]] }
 0x153   :  { %v683_v5 = vmul.f32 %v6136_v2, %v674_v43  ;;  %v4061_v1 = vadd.f32 %v1141_v9, %v3886_v21  ;;  %v4069_v34 = vsel %vm1147_vm15, 1, %v5878_v46  ;;  %v6137_v17 = vstv %s6133_s13  ;;  %v4084_v9 = vpop.permute.xlu0 %936  ;;  %s4871_s13 = sld [smem:[#allocation6 + $0x20]] }
 0x154   :  { %v678_v39 = vmul.f32 %v6137_v17, %v669_v20  ;;  %v6138_v58 = vmov %v6137_v17  ;;  %vm6139_vm7 = vcmp.lt.s32.totalorder %v2858_v44, 29  ;;  %vm823_vm0 = vcmp.lt.s32.totalorder %v2858_v44, 17  ;;  %1600 = vrot.lane.b32.xlu0 %v2545_v53, %s2474_s21 }
 0x155   :  { %v679_v50 = vmul.f32 %v6138_v58, %v668_v33  ;;  %v713_v8 = vsel %vm6139_vm7, %v3428_v24, %v3449_v0  ;;  %vm6140_vm11 = vmmov %vm6139_vm7  ;;  %v622_v43 = vadd.f32 %v620_v15, %v583_v13  ;;  %v623_v14 = vadd.f32 %v621_v51, %v584_v26  ;;  %v6154_v51 = vld [vmem:[#allocation66_spill] sm:$0xff] }
 0x156   :  { %v714_v21 = vsel %vm6140_vm11, %v3449_v0, %v3428_v24  ;;  %v659_v7 = vsel %vm3944_vm1, %v645_v54, 0.0  ;;  %v660_v31 = vsel %vm3951_vm2, %v646_v36, 0.0  ;;  %v684_v61 = vadd.f32 %v682_v42, %v678_v39  ;;  %vm6141_vm15 = vmmov %vm6139_vm7  ;;  %v6210_v13 = vld [vmem:[#allocation36_spill] sm:$0xff]  ;;  %1602 = vrot.lane.b32.xlu1 %v2567_v63, %s2474_s21 }
 0x157   :  { %v685_v55 = vadd.f32 %v683_v5, %v679_v50  ;;  %v707_v24 = vsel %vm6141_vm15, %v3360_v3, %v3381_v60  ;;  %vm6142_vm9 = vmmov %vm6139_vm7  ;;  %v6144_v48 = vrot.slane %v6143_v47, %v2821_v37  ;;  %v6147_v25 = vrot.slane %v6143_v47, %v2824_v40  ;;  %v6168_v47 = vld [vmem:[#allocation68_spill] sm:$0xff] }
 0x158   :  { %v708_v0 = vsel %vm6142_vm9, %v3381_v60, %v3360_v3  ;;  %v6150_v36 = vstv %s3028_s16  ;;  %vm6152_vm7 = vcmp.lt.s32.totalorder %v2858_v44, 19  ;;  %v661_v20 = vadd.f32 %v659_v7, %v622_v43  ;;  %1607 = vrot.lane.b32.xlu0 %v2540_v52, %s2474_s21  ;;  %s2477_s16 = smov 95  }
 0x159   :  { %vm4103_vm1 = vcmp.eq.s32.totalorder %v6144_v48, 1  ;;  %vm4110_vm2 = vcmp.eq.s32.totalorder %v6147_v25, 1  ;;  %v721_v3 = vmul.f32 %v6150_v36, %v714_v21  ;;  %v6151_v60 = vmov %v6150_v36  ;;  %vm6153_vm11 = vmmov %vm6152_vm7  ;;  %v6177_v36 = vld [vmem:[#allocation22_spill] sm:$0xff] }
 0x15a   :  { %v722_v19 = vmul.f32 %v6151_v60, %v713_v8  ;;  %v752_v18 = vsel %vm6152_vm7, %v3556_v23, %v3570_v16  ;;  %v753_v33 = vsel %vm6153_vm11, %v3570_v16, %v3556_v23  ;;  %v662_v15 = vadd.f32 %v660_v31, %v623_v14  ;;  %v4143_v23 = vpop.permute.xlu0 %943  ;;  %vm6163_vm15 = vmmov %vm6153_vm11  ;;  %1609 = vrot.lane.b32.xlu1 %v2561_v62, %s2474_s21  ;;  %s4948_s21 = sld [smem:[#allocation6 + $0x22]] }
 0x15b   :  { %v6155_v41 = vrot.slane %v6154_v51, %v2821_v37  ;;  %v6158_v2 = vrot.slane %v6154_v51, %v2824_v40  ;;  %v4147_v16 = vadd.f32 %v3968_v4, %v3889_v59  ;;  %v6161_v26 = vstv %s3007_s8  ;;  %v4163_v59 = vpop.permute.xlu1 %945  ;;  %s4575_s8 = sld [smem:[#allocation6 + $0x4a]] }
 0x15c   :  { %v717_v17 = vmul.f32 %v6161_v26, %v708_v0  ;;  %v6162_v39 = vmov %v6161_v26  ;;  %v746_v50 = vsel %vm6153_vm11, %v3475_v35, %v3500_v12  ;;  %v747_v8 = vsel %vm6163_vm15, %v3500_v12, %v3475_v35  ;;  %v6182_v26 = vld [vmem:[#allocation33_spill] sm:$0xff] }
 0x15d   :  { %vm4132_vm9 = vcmp.eq.s32.totalorder %v6155_v41, 1  ;;  %vm4139_vm7 = vcmp.eq.s32.totalorder %v6158_v2, 1  ;;  %v718_v58 = vmul.f32 %v6162_v39, %v707_v24  ;;  %v6165_v4 = vstv %s3066_s3  ;;  %s6179_s3 = sld [smem:[#allocation58_spill]] }
 0x15e   :  { %v760_v21 = vmul.f32 %v6165_v4, %v753_v33  ;;  %v6166_v43 = vmov %v6165_v4  ;;  %v791_v7 = vsel %vm784_vm14, %v3693_v6, %v3715_v11  ;;  %v792_v31 = vsel %vm784_vm14, %v3715_v11, %v3693_v6 }
 0x15f   :  { %v761_v14 = vmul.f32 %v6166_v43, %v752_v18  ;;  %v698_v35 = vsel %vm4022_vm5, %v684_v61, 0.0  ;;  %v699_v12 = vsel %vm4029_vm4, %v685_v55, 0.0  ;;  %v723_v24 = vadd.f32 %v721_v3, %v717_v17  ;;  %v6178_v3 = vld [vmem:[#allocation25_spill] sm:$0xff]  ;;  %v4212_v18 = vpop.permute.xlu0 %975  ;;  %v6183_v17 = vld [vmem:[#allocation26_spill] sm:$0xff] }
 0x160   :  { %v724_v0 = vadd.f32 %v722_v19, %v718_v58  ;;  %v6169_v48 = vrot.slane %v6168_v47, %v2821_v37  ;;  %v6172_v6 = vrot.slane %v6168_v47, %v2824_v40  ;;  %v6175_v56 = vstv %s6164_s15  ;;  %v6184_v47 = vld [vmem:[#allocation71_spill] sm:$0xff]  ;;  %s2484_s15 = smov 79  }
 0x161   :  { %v756_v45 = vmul.f32 %v6175_v56, %v747_v8  ;;  %v6176_v61 = vmov %v6175_v56  ;;  %v785_v60 = vsel %vm784_vm14, %v6178_v3, %v6177_v36  ;;  %v786_v19 = vsel %vm784_vm14, %v6177_v36, %v6178_v3 }
 0x162   :  { %vm4186_vm15 = vcmp.eq.s32.totalorder %v6169_v48, 1  ;;  %vm4193_vm11 = vcmp.eq.s32.totalorder %v6172_v6, 1  ;;  %v757_v55 = vmul.f32 %v6176_v61, %v746_v50  ;;  %v6180_v33 = vstv %s6167_s17  ;;  %v4226_v50 = vpop.permute.xlu1 %977  ;;  %s4909_s17 = sld [smem:[#allocation6 + $0x21]] }
 0x163   :  { %v799_v51 = vmul.f32 %v6180_v33, %v792_v31  ;;  %v6181_v41 = vmov %v6180_v33  ;;  %v830_v39 = vsel %vm823_vm0, %v6183_v17, %v6182_v26  ;;  %v831_v58 = vsel %vm823_vm0, %v6182_v26, %v6183_v17 }
 0x164   :  { %v800_v2 = vmul.f32 %v6181_v41, %v791_v7  ;;  %v700_v8 = vadd.f32 %v698_v35, %v661_v20  ;;  %v701_v4 = vadd.f32 %v699_v12, %v662_v15  ;;  %v762_v43 = vadd.f32 %v760_v21, %v756_v45  ;;  %v6193_v35 = vld [vmem:[#allocation28_spill] sm:$0xff] }
 0x165   :  { %v763_v31 = vadd.f32 %v761_v14, %v757_v55  ;;  %v6185_v7 = vrot.slane %v6184_v47, %v2821_v37  ;;  %v6188_v6 = vrot.slane %v6184_v47, %v2824_v40  ;;  %v6191_v20 = vstv %s6179_s3  ;;  %v6194_v12 = vld [vmem:[#allocation51_spill] sm:$0xff]  ;;  %v6204_v47 = vld [vmem:[#allocation52_spill] sm:$0xff]  ;;  %s2485_s3 = smov 78  }
 0x166   :  { %v795_v15 = vmul.f32 %v6191_v20, %v786_v19  ;;  %v6192_v21 = vmov %v6191_v20  ;;  %v824_v45 = vsel %vm823_vm0, %v6194_v12, %v6193_v35  ;;  %v825_v61 = vsel %vm823_vm0, %v6193_v35, %v6194_v12  ;;  %v6197_v19 = vld [vmem:[#allocation72_spill] sm:$0xff] }
 0x167   :  { %vm4231_vm14 = vcmp.eq.s32.totalorder %v6185_v7, 1  ;;  %vm4238_vm4 = vcmp.eq.s32.totalorder %v6188_v6, 1  ;;  %v796_v14 = vmul.f32 %v6192_v21, %v785_v60  ;;  %v6195_v55 = vstv %s3227_s19  ;;  %v6205_v7 = vld [vmem:[#allocation34_spill] sm:$0xff]  ;;  %v4285_v6 = vpop.permute.xlu0 %982  ;;  %s4624_s19 = sld [smem:[#allocation6 + $0x1a]] }
 0x168   :  { %v838_v36 = vmul.f32 %v6195_v55, %v831_v58  ;;  %v6196_v3 = vmov %v6195_v55  ;;  %v6198_v33 = vrot.slane %v6197_v19, %v2821_v37  ;;  %v6201_v26 = vrot.slane %v6197_v19, %v2824_v40  ;;  %v4291_v55 = vpop.permute.xlu1 %984 }
 0x169   :  { %v839_v60 = vmul.f32 %v6196_v3, %v830_v39  ;;  %vm6206_vm5 = vcmp.lt.s32.totalorder %v2858_v44, 16  ;;  %v737_v20 = vsel %vm4103_vm1, %v723_v24, 0.0  ;;  %v738_v21 = vsel %vm4110_vm2, %v724_v0, 0.0 }
 0x16a   :  { %vm4266_vm12 = vcmp.eq.s32.totalorder %v6198_v33, 1  ;;  %vm4273_vm0 = vcmp.eq.s32.totalorder %v6201_v26, 1  ;;  %v869_v58 = vsel %vm6206_vm5, %v6205_v7, %v6204_v47  ;;  %vm6207_vm10 = vmmov %vm6206_vm5  ;;  %v801_v35 = vadd.f32 %v799_v51, %v795_v15 }
 0x16b   :  { %v870_v39 = vsel %vm6207_vm10, %v6204_v47, %v6205_v7  ;;  %v802_v12 = vadd.f32 %v800_v2, %v796_v14  ;;  %v6208_v3 = vstv %s3179_s22  ;;  %v6211_v47 = vld [vmem:[#allocation31_spill] sm:$0xff]  ;;  %vm6212_vm10 = vmmov %vm6206_vm5  ;;  %v776_v54 = vsel %vm4132_vm9, %v762_v43, 0.0  ;;  %s2476_s22 = smov 96  }
 0x16c   :  { %v834_v19 = vmul.f32 %v6208_v3, %v825_v61  ;;  %v6209_v33 = vmov %v6208_v3  ;;  %v863_v7 = vsel %vm6212_vm10, %v6211_v47, %v6210_v13  ;;  %vm6213_vm1 = vmmov %vm6206_vm5  ;;  %v777_v24 = vsel %vm4139_vm7, %v763_v31, 0.0  ;;  %v6218_v43 = vld [vmem:[#allocation73_spill] sm:$0xff] }
 0x16d   :  { %v835_v26 = vmul.f32 %v6209_v33, %v824_v45  ;;  %v864_v10 = vsel %vm6213_vm1, %v6210_v13, %v6211_v47  ;;  %v6214_v0 = vstv %s3288_s18  ;;  %v739_v14 = vadd.f32 %v737_v20, %v700_v8  ;;  %v4315_v13 = vpop.permute.xlu0 %1014  ;;  %s2475_s18 = smov 97  }
 0x16e   :  { %v877_v51 = vmul.f32 %v6214_v0, %v870_v39  ;;  %v6215_v2 = vmov %v6214_v0  ;;  %v740_v45 = vadd.f32 %v738_v21, %v701_v4  ;;  %v840_v61 = vadd.f32 %v838_v36, %v834_v19  ;;  %v4344_v36 = vpop.permute.xlu1 %1016  ;;  %1639 = vrot.lane.b32.xlu0 %v2545_v53, %s2475_s18  ;;  %1641 = vrot.lane.b32.xlu1 %v2567_v63, %s2475_s18 }
 0x16f   :  { %v878_v15 = vmul.f32 %v6215_v2, %v869_v58  ;;  %v841_v3 = vadd.f32 %v839_v60, %v835_v26  ;;  %v6216_v33 = vstv %s3256_s9  ;;  %v6219_v5 = vrot.slane %v6218_v43, %v2821_v37  ;;  %s6265_s9 = sld [smem:[#allocation74_spill]] }
 0x170   :  { %v873_v47 = vmul.f32 %v6216_v33, %v864_v10  ;;  %v6217_v57 = vmov %v6216_v33  ;;  %v6222_v58 = vrot.slane %v6218_v43, %v2824_v40  ;;  %vm6225_vm7 = vcmp.lt.s32.totalorder %v2858_v44, 15 }
 0x171   :  { %v874_v42 = vmul.f32 %v6217_v57, %v863_v7  ;;  %vm4324_vm2 = vcmp.eq.s32.totalorder %v6219_v5, 1  ;;  %v908_v57 = vsel %vm6225_vm7, %v4033_v27, %v4048_v32  ;;  %vm6226_vm5 = vmmov %vm6225_vm7  ;;  %vm979_vm10 = vcmp.lt.s32.totalorder %v2858_v44, 13  ;;  %v6230_v7 = vld [vmem:[#allocation75_spill] sm:$0xff] }
 0x172   :  { %vm4331_vm9 = vcmp.eq.s32.totalorder %v6222_v58, 1  ;;  %v909_v4 = vsel %vm6226_vm5, %v4048_v32, %v4033_v27  ;;  %v778_v60 = vadd.f32 %v776_v54, %v739_v14  ;;  %v779_v39 = vadd.f32 %v777_v24, %v740_v45  ;;  %vm6227_vm7 = vmmov %vm6226_vm5  ;;  %v1024_v33 = vpop.permute.xlu1 %1023  ;;  %1646 = vrot.lane.b32.xlu0 %v2540_v52, %s2475_s18  ;;  %1648 = vrot.lane.b32.xlu1 %v2561_v62, %s2475_s18  ;;  %s4957_s18 = sld [smem:[#allocation6 + $0x53]] }
 0x173   :  { %v815_v20 = vsel %vm4186_vm15, %v801_v35, 0.0  ;;  %v816_v21 = vsel %vm4193_vm11, %v802_v12, 0.0  ;;  %v879_v19 = vadd.f32 %v877_v51, %v873_v47  ;;  %v880_v26 = vadd.f32 %v878_v15, %v874_v42  ;;  %v1022_v51 = vpop.permute.xlu0 %1021 }
 0x174   :  { %v902_v27 = vsel %vm6227_vm7, %v3982_v49, %v3992_v28  ;;  %v903_v32 = vsel %vm6226_vm5, %v3992_v28, %v3982_v49  ;;  %v6228_v25 = vstv %s3351_s1  ;;  %v6231_v10 = vrot.slane %v6230_v7, %v2821_v37  ;;  %s2478_s1 = smov 94  }
 0x175   :  { %v916_v11 = vmul.f32 %v6228_v25, %v909_v4  ;;  %v6229_v35 = vmov %v6228_v25  ;;  %v6234_v24 = vrot.slane %v6230_v7, %v2824_v40  ;;  %vm6237_vm7 = vcmp.lt.s32.totalorder %v2858_v44, 14 }
 0x176   :  { %v917_v12 = vmul.f32 %v6229_v35, %v908_v57  ;;  %vm4368_vm15 = vcmp.eq.s32.totalorder %v6231_v10, 1  ;;  %v947_v49 = vsel %vm6237_vm7, %v4143_v23, %v4163_v59  ;;  %vm6238_vm5 = vmmov %vm6237_vm7  ;;  %v817_v2 = vadd.f32 %v815_v20, %v778_v60  ;;  %1678 = vrot.lane.b32.xlu0 %v2545_v53, %s2476_s22  ;;  %1680 = vrot.lane.b32.xlu1 %v2567_v63, %s2476_s22 }
 0x177   :  { %vm4375_vm11 = vcmp.eq.s32.totalorder %v6234_v24, 1  ;;  %v948_v28 = vsel %vm6238_vm5, %v4163_v59, %v4143_v23  ;;  %v818_v15 = vadd.f32 %v816_v21, %v779_v39  ;;  %v854_v14 = vsel %vm4231_vm14, %v840_v61, 0.0  ;;  %vm6241_vm7 = vmmov %vm6238_vm5  ;;  %v1054_v39 = vpop.permute.xlu0 %1053 }
 0x178   :  { %v855_v45 = vsel %vm4238_vm4, %v841_v3, 0.0  ;;  %vm1057_vm1 = vcmp.lt.s32.totalorder %v2858_v44, 2  ;;  %v6239_v47 = vstv %s3336_s24  ;;  %v941_v23 = vsel %vm6241_vm7, %v4084_v9, %v4090_v22  ;;  %vm6242_vm14 = vmmov %vm6238_vm5  ;;  %s4638_s24 = sld [smem:[#allocation6 + $0x4b]] }
 0x179   :  { %v912_v42 = vmul.f32 %v6239_v47, %v903_v32  ;;  %v6240_v43 = vmov %v6239_v47  ;;  %v942_v59 = vsel %vm6242_vm14, %v4090_v22, %v4084_v9  ;;  %v893_v48 = vsel %vm4266_vm12, %v879_v19, 0.0  ;;  %v1056_v19 = vpop.permute.xlu1 %1055 }
 0x17a   :  { %v913_v5 = vmul.f32 %v6240_v43, %v902_v27  ;;  %v894_v56 = vsel %vm4273_vm0, %v880_v26, 0.0  ;;  %v6243_v61 = vstv %s3388_s25  ;;  %v856_v4 = vadd.f32 %v854_v14, %v817_v2  ;;  %1685 = vrot.lane.b32.xlu0 %v2540_v52, %s2476_s22  ;;  %1687 = vrot.lane.b32.xlu1 %v2561_v62, %s2476_s22  ;;  %s4683_s25 = sld [smem:[#allocation6 + $0x4c]] }
 0x17b   :  { %v955_v3 = vmul.f32 %v6243_v61, %v948_v28  ;;  %v6244_v58 = vmov %v6243_v61  ;;  %v857_v60 = vadd.f32 %v855_v45, %v818_v15  ;;  %v918_v9 = vadd.f32 %v916_v11, %v912_v42  ;;  %v6248_v11 = vld [vmem:[#allocation24_spill] sm:$0xff]  ;;  %v6255_v28 = vld [vmem:[#allocation23_spill] sm:$0xff]  ;;  %s4986_s22 = sld [smem:[#allocation6 + $0x23]] }
 0x17c   :  { %v956_v57 = vmul.f32 %v6244_v58, %v947_v49  ;;  %v919_v22 = vadd.f32 %v917_v12, %v913_v5  ;;  %v6245_v20 = vstv %s3367_s23  ;;  %v1156_v17 = vrot.slane %v4069_v34, %v2824_v40  ;;  %v6271_v58 = vld [vmem:[#allocation29_spill] sm:$0xff]  ;;  %s4674_s23 = sld [smem:[#allocation6 + $0x1b]] }
 0x17d   :  { %v951_v21 = vmul.f32 %v6245_v20, %v942_v59  ;;  %v6246_v27 = vmov %v6245_v20  ;;  %vm6247_vm4 = vcmask 1041409   ;;  %v895_v32 = vadd.f32 %v893_v48, %v856_v4 }
 0x17e   :  { %v952_v41 = vmul.f32 %v6246_v27, %v941_v23  ;;  %v4426_v26 = vsel %vm6247_vm4, %v4061_v1, %v3996_v30  ;;  %v896_v25 = vadd.f32 %v894_v56, %v857_v60  ;;  %v6249_v35 = vrot.slane %v6248_v11, %v2821_v37  ;;  %v1063_v56 = vpop.permute.xlu1 %1062  ;;  %1717 = vrot.lane.b32.xlu0 %v2545_v53, %s2477_s16 }
 0x17f   :  { %v6252_v7 = vrot.slane %v6248_v11, %v2824_v40  ;;  %v986_v30 = vsel %vm979_vm10, %v4285_v6, %v4291_v55  ;;  %v987_v1 = vsel %vm979_vm10, %v4291_v55, %v4285_v6  ;;  %v957_v24 = vadd.f32 %v955_v3, %v951_v21  ;;  %1719 = vrot.lane.b32.xlu1 %v2567_v63, %s2477_s16 }
 0x180   :  { %vm4431_vm0 = vcmp.eq.s32.totalorder %v6249_v35, 1  ;;  %v958_v49 = vadd.f32 %v956_v57, %v952_v41  ;;  %v6256_v2 = vrot.slane %v6255_v28, %v2821_v37  ;;  %v6259_v14 = vrot.slane %v6255_v28, %v2824_v40 }
 0x181   :  { %vm4438_vm5 = vcmp.eq.s32.totalorder %v6252_v7, 1  ;;  %vm6262_vm4 = vcmp.lt.s32.totalorder %v2858_v44, 3  ;;  %v932_v47 = vsel %vm4324_vm2, %v918_v9, 0.0  ;;  %v933_v42 = vsel %vm4331_vm9, %v919_v22, 0.0 }
 0x182   :  { %vm4455_vm7 = vcmp.eq.s32.totalorder %v6256_v2, 1  ;;  %vm4462_vm14 = vcmp.eq.s32.totalorder %v6259_v14, 1  ;;  %v1025_v6 = vsel %vm6262_vm4, %v1022_v51, %v1024_v33  ;;  %vm6263_vm12 = vmmov %vm6262_vm4  ;;  %v980_v43 = vsel %vm979_vm10, %v4212_v18, %v4226_v50  ;;  %1724 = vrot.lane.b32.xlu0 %v2540_v52, %s2477_s16 }
 0x183   :  { %v1026_v55 = vsel %vm6263_vm12, %v1024_v33, %v1022_v51  ;;  %v981_v5 = vsel %vm979_vm10, %v4226_v50, %v4212_v18  ;;  %v1061_v51 = vpop.permute.xlu0 %1060  ;;  %v6264_v33 = vstv %s3525_s27  ;;  %vm6267_vm2 = vmmov %vm6262_vm4  ;;  %v6269_v18 = vstv %s3625_s30  ;;  %1726 = vrot.lane.b32.xlu1 %v2561_v62, %s2477_s16  ;;  %s4714_s27 = sld [smem:[#allocation6 + $0x1c]]  ;;  %s2480_s30 = smov 83  }
 0x184   :  { %v994_v23 = vmul.f32 %v6264_v33, %v987_v1  ;;  %v6266_v59 = vmov %v6264_v33  ;;  %v1019_v8 = vsel %vm6267_vm2, %v4315_v13, %v4344_v36  ;;  %vm6268_vm9 = vmmov %vm6267_vm2  ;;  %v1033_v50 = vmul.f32 %v6269_v18, %v1026_v55  ;;  %v1095_v33 = vpop.permute.xlu1 %1094  ;;  %s5022_s16 = sld [smem:[#allocation6 + $0x55]] }
 0x185   :  { %v995_v31 = vmul.f32 %v6266_v59, %v986_v30  ;;  %v1020_v48 = vsel %vm6268_vm9, %v4344_v36, %v4315_v13  ;;  %v6270_v61 = vmov %v6269_v18  ;;  %v6272_v57 = vrot.slane %v6271_v58, %v2821_v37 }
 0x186   :  { %v1034_v3 = vmul.f32 %v6270_v61, %v1025_v6  ;;  %v6275_v60 = vrot.slane %v6271_v58, %v2824_v40  ;;  %v1064_v13 = vsel %vm1057_vm1, %v1061_v51, %v1063_v56  ;;  %v1065_v36 = vsel %vm1057_vm1, %v1063_v56, %v1061_v51  ;;  %1756 = vrot.lane.b32.xlu0 %v2545_v53, %s2478_s1 }
 0x187   :  { %vm4503_vm10 = vcmp.eq.s32.totalorder %v6272_v57, 1  ;;  %v971_v22 = vsel %vm4368_vm15, %v957_v24, 0.0  ;;  %v972_v20 = vsel %vm4375_vm11, %v958_v49, 0.0  ;;  %v6278_v21 = vstv %s6265_s9  ;;  %v1093_v24 = vpop.permute.xlu0 %1092  ;;  %v6282_v49 = vld [vmem:[#allocation27_spill] sm:$0xff]  ;;  %1758 = vrot.lane.b32.xlu1 %v2567_v63, %s2478_s1  ;;  %s2486_s9 = smov 77  }
 0x188   :  { %vm4510_vm12 = vcmp.eq.s32.totalorder %v6275_v60, 1  ;;  %v990_v27 = vmul.f32 %v6278_v21, %v981_v5  ;;  %v6279_v41 = vmov %v6278_v21  ;;  %v6280_v35 = vstv %s3592_s29  ;;  %s4728_s29 = sld [smem:[#allocation6 + $0x4d]] }
 0x189   :  { %v991_v11 = vmul.f32 %v6279_v41, %v980_v43  ;;  %v1029_v7 = vmul.f32 %v6280_v35, %v1020_v48  ;;  %v6281_v30 = vmov %v6280_v35  ;;  %v1058_v54 = vsel %vm1057_vm1, %v1054_v39, %v1056_v19 }
 0x18a   :  { %v1030_v1 = vmul.f32 %v6281_v30, %v1019_v8  ;;  %v1059_v0 = vsel %vm1057_vm1, %v1056_v19, %v1054_v39  ;;  %v6283_v28 = vrot.slane %v6282_v49, %v2821_v37  ;;  %v6286_v14 = vrot.slane %v6282_v49, %v2824_v40  ;;  %1763 = vrot.lane.b32.xlu0 %v2540_v52, %s2478_s1 }
 0x18b   :  { %v996_v55 = vadd.f32 %v994_v23, %v990_v27  ;;  %v997_v43 = vadd.f32 %v995_v31, %v991_v11  ;;  %v6289_v5 = vstv %s3685_s5  ;;  %v934_v59 = vadd.f32 %v932_v47, %v895_v32  ;;  %1765 = vrot.lane.b32.xlu1 %v2561_v62, %s2478_s1  ;;  %s4766_s5 = sld [smem:[#allocation6 + $0x4e]] }
 0x18c   :  { %vm4540_vm15 = vcmp.eq.s32.totalorder %v6283_v28, 1  ;;  %vm4547_vm11 = vcmp.eq.s32.totalorder %v6286_v14, 1  ;;  %v1072_v39 = vmul.f32 %v6289_v5, %v1065_v36  ;;  %v6290_v19 = vmov %v6289_v5  ;;  %v1102_v36 = vpop.permute.xlu1 %1101  ;;  %s5062_s1 = sld [smem:[#allocation6 + $0x26]] }
 0x18d   :  { %v1073_v51 = vmul.f32 %v6290_v19, %v1064_v13  ;;  %v935_v8 = vadd.f32 %v933_v42, %v896_v25  ;;  %v1035_v48 = vadd.f32 %v1033_v50, %v1029_v7  ;;  %v1036_v56 = vadd.f32 %v1034_v3, %v1030_v1  ;;  %v1100_v3 = vpop.permute.xlu0 %1099 }
 0x18e   :  { %v6291_v18 = vstv %s3655_s4  ;;  %v6293_v23 = vrot.slane %v4069_v34, %v2821_v37  ;;  %vm6296_vm2 = vcmask 1041409   ;;  %v973_v25 = vadd.f32 %v971_v22, %v934_v59  ;;  %1795 = vrot.lane.b32.xlu0 %v2545_v53, %s2479_s26  ;;  %s4757_s4 = sld [smem:[#allocation6 + $0x1d]] }
 0x18f   :  { %v1068_v61 = vmul.f32 %v6291_v18, %v1059_v0  ;;  %v6292_v58 = vmov %v6291_v18  ;;  %v4573_v32 = vsel %vm6296_vm2, %v4147_v16, %v3998_v29  ;;  %v974_v47 = vadd.f32 %v972_v20, %v935_v8  ;;  %vm1194_vm2 = vmand %vm3598_vm8, %vm2797_vm6  ;;  %1797 = vrot.lane.b32.xlu1 %v2567_v63, %s2479_s26 }
 0x190   :  { %v1069_v57 = vmul.f32 %v6292_v58, %v1058_v54  ;;  %vm4566_vm1 = vcmp.eq.s32.totalorder %v6293_v23, 1  ;;  %vm6297_vm9 = vcmp.lt.s32.totalorder %v2858_v44, 1  ;;  %v1010_v60 = vsel %vm4431_vm0, %v996_v55, 0.0 }
 0x191   :  { %v1097_v42 = vsel %vm6297_vm9, %v1093_v24, %v1095_v33  ;;  %vm6298_vm4 = vmmov %vm6297_vm9  ;;  %v1011_v29 = vsel %vm4438_vm5, %v997_v43, 0.0  ;;  %v1074_v16 = vadd.f32 %v1072_v39, %v1068_v61  ;;  %v1049_v20 = vsel %vm4455_vm7, %v1035_v48, 0.0  ;;  %v1172_v0 = vpop.permute.xlu0 %1171 }
 0x192   :  { %v1098_v50 = vsel %vm6298_vm4, %v1095_v33, %v1093_v24  ;;  %v1075_v13 = vadd.f32 %v1073_v51, %v1069_v57  ;;  %v1050_v21 = vsel %vm4462_vm14, %v1036_v56, 0.0  ;;  %v1103_v12 = vsel %vm6298_vm4, %v1100_v3, %v1102_v36  ;;  %vm6300_vm0 = vmmov %vm6298_vm4  ;;  %1802 = vrot.lane.b32.xlu0 %v2540_v52, %s2479_s26 }
 0x193   :  { %v1104_v10 = vsel %vm6300_vm0, %v1102_v36, %v1100_v3  ;;  %v6301_v27 = vstv %s3703_s7  ;;  %v6303_v7 = vstv %s3721_s0  ;;  %v1012_v45 = vadd.f32 %v1010_v60, %v973_v25  ;;  %vm1272_vm4 = vmand %vm3598_vm8, %vm2865_vm13  ;;  %1804 = vrot.lane.b32.xlu1 %v2561_v62, %s2479_s26  ;;  %s2481_s7 = smov 82   ;;  %s4795_s0 = sld [smem:[#allocation6 + $0x1e]] }
 0x194   :  { %v1107_v41 = vmul.f32 %v6301_v27, %v1098_v50  ;;  %v6302_v11 = vmov %v6301_v27  ;;  %v1111_v30 = vmul.f32 %v6303_v7, %v1104_v10  ;;  %v6304_v15 = vmov %v6303_v7  ;;  %s5122_s26 = sld [smem:[#allocation6 + $0x58]] }
 0x195   :  { %v1108_v35 = vmul.f32 %v6302_v11, %v1097_v42  ;;  %v1112_v1 = vmul.f32 %v6304_v15, %v1103_v12  ;;  %v1013_v54 = vadd.f32 %v1011_v29, %v974_v47  ;;  %vm4610_vm5 = vcmp.eq.s32.totalorder %v1156_v17, 1  ;;  %v1174_v17 = vpop.permute.xlu1 %1173  ;;  %v1179_v18 = vpop.permute.xlu0 %1178 }
 0x196   :  { %v1195_v49 = vsel %vm1194_vm2, 1, %v5878_v46  ;;  %v1088_v28 = vsel %vm4503_vm10, %v1074_v16, 0.0  ;;  %v1089_v14 = vsel %vm4510_vm12, %v1075_v13, 0.0  ;;  %v1113_v34 = vadd.f32 %v1111_v30, %v1107_v41  ;;  %vm1233_vm12 = vmand %vm3598_vm8, %vm2851_vm3  ;;  %1834 = vrot.lane.b32.xlu0 %v2545_v53, %s2480_s30 }
 0x197   :  { %v1114_v55 = vadd.f32 %v1112_v1, %v1108_v35  ;;  %v1051_v43 = vadd.f32 %v1049_v20, %v1012_v45  ;;  %v1052_v5 = vadd.f32 %v1050_v21, %v1013_v54  ;;  %vm6307_vm7 = vcmp.lt.s32.totalorder %v2858_v44, 127  ;;  %v4686_v54 = vld [vmem:[#allocation7] ss:$2 sm:$0x3]  ;;  %1836 = vrot.lane.b32.xlu1 %v2567_v63, %s2480_s30 }
 0x198   :  { %v1176_v39 = vsel %vm6307_vm7, %v1172_v0, %v1174_v17  ;;  %vm6308_vm14 = vmmov %vm6307_vm7  ;;  %v1127_v4 = vsel %vm4540_vm15, %v1113_v34, 0.0  ;;  %v1185_v51 = vstv %s4556_s2  ;;  %v1189_v33 = vstv %s4575_s8  ;;  %s5000_s2 = sld [smem:[#allocation6 + $0x54]] }
 0x199   :  { %v1177_v19 = vsel %vm6308_vm14, %v1174_v17, %v1172_v0  ;;  %v1128_v9 = vsel %vm4547_vm11, %v1114_v55, 0.0  ;;  %v1090_v59 = vadd.f32 %v1088_v28, %v1051_v43  ;;  %v1091_v8 = vadd.f32 %v1089_v14, %v1052_v5  ;;  %v1181_v61 = vpop.permute.xlu1 %1180  ;;  %vm6310_vm15 = vmmov %vm6307_vm7  ;;  %v1211_v60 = vpop.permute.xlu0 %1210  ;;  %s5018_s8 = sld [smem:[#allocation6 + $0x24]] }
 0x19a   :  { %v1199_v48 = vrot.slane %v1195_v49, %v2821_v37  ;;  %v1203_v56 = vrot.slane %v1195_v49, %v2824_v40  ;;  %v1167_v2 = vsel %vm4566_vm1, %v4426_v26, 0.0  ;;  %v1168_v6 = vsel %vm4610_vm5, %v4573_v32, 0.0  ;;  %vm6311_vm11 = vmmov %vm6307_vm7  ;;  %1841 = vrot.lane.b32.xlu0 %v2540_v52, %s2480_s30 }
 0x19b   :  { %vm1214_vm10 = vcmp.lt.s32.totalorder %v2858_v44, 126  ;;  %v1129_v57 = vadd.f32 %v1127_v4, %v1090_v59  ;;  %v1130_v23 = vadd.f32 %v1128_v9, %v1091_v8  ;;  %v1182_v25 = vsel %vm6310_vm15, %v1179_v18, %v1181_v61  ;;  %1843 = vrot.lane.b32.xlu1 %v2561_v62, %s2480_s30  ;;  %s5133_s30 = sld [smem:[#allocation6 + $0x29]] }
 0x19c   :  { %v1183_v26 = vsel %vm6311_vm11, %v1181_v61, %v1179_v18  ;;  %v1186_v31 = vmul.f32 %v1185_v51, %v1176_v39  ;;  %v1187_v32 = vmul.f32 %v1185_v51, %v1177_v19  ;;  %v1190_v47 = vmul.f32 %v1189_v33, %v1182_v25 }
 0x19d   :  { %v1191_v42 = vmul.f32 %v1189_v33, %v1183_v26  ;;  %vm4659_vm1 = vcmp.eq.s32.totalorder %v1199_v48, 1  ;;  %vm4663_vm9 = vcmp.eq.s32.totalorder %v1203_v56, 1  ;;  %v1234_v29 = vsel %vm1233_vm12, 1, %v5878_v46  ;;  %v1213_v36 = vpop.permute.xlu1 %1212  ;;  %v1218_v45 = vpop.permute.xlu0 %1217 }
 0x19e   :  { %v1192_v16 = vadd.f32 %v1190_v47, %v1186_v31  ;;  %v1224_v20 = vstv %s4624_s19  ;;  %v1169_v21 = vadd.f32 %v1167_v2, %v1129_v57  ;;  %v1170_v12 = vadd.f32 %v1168_v6, %v1130_v23  ;;  %v6323_v47 = vld [vmem:[#allocation32_spill] sm:$0xff]  ;;  %1873 = vrot.lane.b32.xlu0 %v2545_v53, %s2481_s7  ;;  %s5040_s19 = sld [smem:[#allocation6 + $0x25]] }
 0x19f   :  { %v1193_v13 = vadd.f32 %v1191_v42, %v1187_v32  ;;  %v1215_v10 = vsel %vm1214_vm10, %v1211_v60, %v1213_v36  ;;  %v1216_v27 = vsel %vm1214_vm10, %v1213_v36, %v1211_v60  ;;  %v1228_v35 = vstv %s4638_s24  ;;  %1875 = vrot.lane.b32.xlu1 %v2567_v63, %s2481_s7  ;;  %s5044_s24 = sld [smem:[#allocation6 + $0x56]] }
 0x1a0   :  { %v1206_v41 = vsel %vm4659_vm1, %v1192_v16, 0.0  ;;  %v1238_v7 = vrot.slane %v1234_v29, %v2821_v37  ;;  %v1242_v1 = vrot.slane %v1234_v29, %v2824_v40  ;;  %v137_v0 = vadd.s32 1, %v4686_v54 }
 0x1a1   :  { %v1207_v11 = vsel %vm4663_vm9, %v1193_v13, 0.0  ;;  %v1208_v30 = vadd.f32 %v1206_v41, %v1169_v21  ;;  %v1220_v24 = vpop.permute.xlu1 %1219  ;;  %vm1253_vm2 = vcmp.lt.s32.totalorder %v2858_v44, 125  ;;  %v1225_v34 = vmul.f32 %v1224_v20, %v1215_v10  ;;  %v1250_v19 = vpop.permute.xlu0 %1249 }
 0x1a2   :  { %v1209_v15 = vadd.f32 %v1207_v11, %v1170_v12  ;;  %v1221_v49 = vsel %vm1214_vm10, %v1218_v45, %v1220_v24  ;;  %v1222_v28 = vsel %vm1214_vm10, %v1220_v24, %v1218_v45  ;;  %v1226_v55 = vmul.f32 %v1224_v20, %v1216_v27  ;;  %1880 = vrot.lane.b32.xlu0 %v2540_v52, %s2481_s7 }
 0x1a3   :  { %v1229_v17 = vmul.f32 %v1228_v35, %v1221_v49  ;;  %v1230_v43 = vmul.f32 %v1228_v35, %v1222_v28  ;;  %vm4700_vm0 = vcmp.eq.s32.totalorder %v1238_v7, 1  ;;  %vm4704_vm5 = vcmp.eq.s32.totalorder %v1242_v1, 1  ;;  %1882 = vrot.lane.b32.xlu1 %v2561_v62, %s2481_s7  ;;  %s5151_s7 = sld [smem:[#allocation6 + $0x5b]] }
 0x1a4   :  { %vm138_vm7 = vcmp.ge.s32.totalorder %v137_v0, 0  ;;  %vm139_vm14 = vcmp.lt.s32.totalorder %v137_v0, 16  ;;  %v1273_v51 = vsel %vm1272_vm4, 1, %v5878_v46  ;;  %v1263_v56 = vstv %s4674_s23  ;;  %s5066_s23 = sld [smem:[#allocation6 + $0x57]] }
 0x1a5   :  { %v1231_v38 = vadd.f32 %v1229_v17, %v1225_v34  ;;  %v1232_v4 = vadd.f32 %v1230_v43, %v1226_v55  ;;  %v1252_v9 = vpop.permute.xlu1 %1251  ;;  %v1267_v18 = vstv %s4683_s25  ;;  %vm4724_vm8 = vmand %vm138_vm7, %vm139_vm14  ;;  %v1277_v57 = vrot.slane %v1273_v51, %v2821_v37  ;;  %v1257_v25 = vpop.permute.xlu0 %1256  ;;  %v6329_v34 = vld [vmem:[#allocation30_spill] sm:$0xff]  ;;  %s5120_s25 = sld [smem:[#allocation6 + $0x27]] }
 0x1a6   :  { %v1254_v33 = vsel %vm1253_vm2, %v1250_v19, %v1252_v9  ;;  %v1255_v59 = vsel %vm1253_vm2, %v1252_v9, %v1250_v19  ;;  %v1281_v23 = vrot.slane %v1273_v51, %v2824_v40  ;;  %vm1292_vm10 = vcmp.lt.s32.totalorder %v2858_v44, 115  ;;  %1912 = vrot.lane.b32.xlu0 %v2545_v53, %s2482_s28 }
 0x1a7   :  { %v1245_v8 = vsel %vm4700_vm0, %v1231_v38, 0.0  ;;  %v1246_v48 = vsel %vm4704_vm5, %v1232_v4, 0.0  ;;  %vm6324_vm12 = vnez %v6323_v47  ;;  %v1264_v42 = vmul.f32 %v1263_v56, %v1254_v33  ;;  %1914 = vrot.lane.b32.xlu1 %v2567_v63, %s2482_s28 }
 0x1a8   :  { %v1247_v2 = vadd.f32 %v1245_v8, %v1208_v30  ;;  %v1248_v6 = vadd.f32 %v1246_v48, %v1209_v15  ;;  %vm1311_vm15 = vmand %vm4724_vm8, %vm6324_vm12  ;;  %v1265_v50 = vmul.f32 %v1263_v56, %v1255_v59  ;;  %vm4743_vm11 = vcmp.eq.s32.totalorder %v1277_v57, 1 }
 0x1a9   :  { %v1259_v26 = vpop.permute.xlu1 %1258  ;;  %vm4747_vm1 = vcmp.eq.s32.totalorder %v1281_v23, 1  ;;  %v1289_v13 = vpop.permute.xlu0 %1288  ;;  %v1312_v12 = vsel %vm1311_vm15, 1, %v5878_v46  ;;  %v1302_v35 = vstv %s4714_s27  ;;  %v1306_v7 = vstv %s4728_s29  ;;  %s5127_s27 = sld [smem:[#allocation6 + $0x28]] }
 0x1aa   :  { %v1260_v31 = vsel %vm1253_vm2, %v1257_v25, %v1259_v26  ;;  %v1261_v32 = vsel %vm1253_vm2, %v1259_v26, %v1257_v25  ;;  %v1316_v1 = vrot.slane %v1312_v12, %v2821_v37  ;;  %v1320_v45 = vrot.slane %v1312_v12, %v2824_v40  ;;  %1919 = vrot.lane.b32.xlu0 %v2540_v52, %s2482_s28  ;;  %s5131_s29 = sld [smem:[#allocation6 + $0x59]] }
 0x1ab   :  { %v1268_v3 = vmul.f32 %v1267_v18, %v1260_v31  ;;  %v1269_v60 = vmul.f32 %v1267_v18, %v1261_v32  ;;  %vm1331_vm9 = vcmp.lt.s32.totalorder %v2858_v44, 114  ;;  %vm6330_vm2 = vnez %v6329_v34  ;;  %1921 = vrot.lane.b32.xlu1 %v2561_v62, %s2482_s28  ;;  %s5170_s28 = sld [smem:[#allocation6 + $0x2c]] }
 0x1ac   :  { %vm1350_vm4 = vmand %vm4724_vm8, %vm6330_vm2  ;;  %vm4781_vm0 = vcmp.eq.s32.totalorder %v1316_v1, 1  ;;  %vm4785_vm5 = vcmp.eq.s32.totalorder %v1320_v45, 1  ;;  %v1341_v18 = vstv %s4757_s4  ;;  %vm1370_vm7 = vcmp.lt.s32.totalorder %v2858_v44, 113  ;;  %s5135_s4 = sld [smem:[#allocation6 + $0x5a]] }
 0x1ad   :  { %v1270_v36 = vadd.f32 %v1268_v3, %v1264_v42  ;;  %v1271_v20 = vadd.f32 %v1269_v60, %v1265_v50  ;;  %v1291_v21 = vpop.permute.xlu1 %1290  ;;  %v1296_v0 = vpop.permute.xlu0 %1295  ;;  %v1351_v33 = vsel %vm1350_vm4, 1, %v5878_v46  ;;  %v6335_v50 = vld [vmem:[#allocation35_spill] sm:$0xff] }
 0x1ae   :  { %v1293_v10 = vsel %vm1292_vm10, %v1289_v13, %v1291_v21  ;;  %v1294_v27 = vsel %vm1292_vm10, %v1291_v21, %v1289_v13  ;;  %v1355_v23 = vrot.slane %v1351_v33, %v2821_v37  ;;  %v1359_v25 = vrot.slane %v1351_v33, %v2824_v40  ;;  %1951 = vrot.lane.b32.xlu0 %v2545_v53, %s2483_s11 }
 0x1af   :  { %v1284_v41 = vsel %vm4743_vm11, %v1270_v36, 0.0  ;;  %v1285_v11 = vsel %vm4747_vm1, %v1271_v20, 0.0  ;;  %v1303_v55 = vmul.f32 %v1302_v35, %v1293_v10  ;;  %v1304_v17 = vmul.f32 %v1302_v35, %v1294_v27  ;;  %1953 = vrot.lane.b32.xlu1 %v2567_v63, %s2483_s11 }
 0x1b0   :  { %v1286_v30 = vadd.f32 %v1284_v41, %v1247_v2  ;;  %v1287_v15 = vadd.f32 %v1285_v11, %v1248_v6  ;;  %v1345_v2 = vstv %s4766_s5  ;;  %vm6336_vm14 = vnez %v6335_v50  ;;  %s5143_s5 = sld [smem:[#allocation6 + $0x2a]] }
 0x1b1   :  { %v1298_v24 = vpop.permute.xlu1 %1297  ;;  %v1328_v38 = vpop.permute.xlu0 %1327  ;;  %vm4819_vm15 = vcmp.eq.s32.totalorder %v1355_v23, 1  ;;  %vm4823_vm11 = vcmp.eq.s32.totalorder %v1359_v25, 1  ;;  %vm1409_vm1 = vcmp.lt.s32.totalorder %v2858_v44, 112  ;;  %v1423_v23 = vstv %s4842_s6  ;;  %s5189_s6 = sld [smem:[#allocation6 + $0x2d]] }
 0x1b2   :  { %v1299_v49 = vsel %vm1292_vm10, %v1296_v0, %v1298_v24  ;;  %v1300_v28 = vsel %vm1292_vm10, %v1298_v24, %v1296_v0  ;;  %vm1389_vm10 = vmand %vm4724_vm8, %vm6336_vm14  ;;  %1958 = vrot.lane.b32.xlu0 %v2540_v52, %s2483_s11 }
 0x1b3   :  { %v1307_v43 = vmul.f32 %v1306_v7, %v1299_v49  ;;  %v1308_v5 = vmul.f32 %v1306_v7, %v1300_v28  ;;  %v1390_v27 = vsel %vm1389_vm10, 1, %v5878_v46  ;;  %1960 = vrot.lane.b32.xlu1 %v2561_v62, %s2483_s11  ;;  %vm1467_vm10 = vmand %vm4724_vm8, %vm2797_vm6  ;;  %s5201_s11 = sld [smem:[#allocation6 + $0x5e]] }
 0x1b4   :  { %v1394_v0 = vrot.slane %v1390_v27, %v2821_v37  ;;  %v1398_v24 = vrot.slane %v1390_v27, %v2824_v40 }
 0x1b5   :  { %v1309_v4 = vadd.f32 %v1307_v43, %v1303_v55  ;;  %v1310_v9 = vadd.f32 %v1308_v5, %v1304_v17  ;;  %v1330_v51 = vpop.permute.xlu1 %1329  ;;  %v1335_v26 = vpop.permute.xlu0 %1334  ;;  %v6341_v43 = vld [vmem:[#allocation38_spill] sm:$0xff] }
 0x1b6   :  { %v1332_v59 = vsel %vm1331_vm9, %v1328_v38, %v1330_v51  ;;  %v1333_v8 = vsel %vm1331_vm9, %v1330_v51, %v1328_v38  ;;  %1990 = vrot.lane.b32.xlu0 %v2545_v53, %s2484_s15 }
 0x1b7   :  { %v1323_v48 = vsel %vm4781_vm0, %v1309_v4, 0.0  ;;  %v1324_v56 = vsel %vm4785_vm5, %v1310_v9, 0.0  ;;  %v1342_v3 = vmul.f32 %v1341_v18, %v1332_v59  ;;  %v1343_v60 = vmul.f32 %v1341_v18, %v1333_v8  ;;  %1992 = vrot.lane.b32.xlu1 %v2567_v63, %s2484_s15 }
 0x1b8   :  { %v1325_v6 = vadd.f32 %v1323_v48, %v1286_v30  ;;  %v1326_v57 = vadd.f32 %v1324_v56, %v1287_v15  ;;  %v1380_v30 = vstv %s4795_s0  ;;  %v1384_v15 = vstv %s4804_s12  ;;  %s5157_s0 = sld [smem:[#allocation6 + $0x2b]] }
 0x1b9   :  { %v1337_v31 = vpop.permute.xlu1 %1336  ;;  %v1367_v20 = vpop.permute.xlu0 %1366  ;;  %vm4857_vm0 = vcmp.eq.s32.totalorder %v1394_v0, 1  ;;  %vm4861_vm5 = vcmp.eq.s32.totalorder %v1398_v24, 1  ;;  %v1462_v0 = vstv %s4880_s14  ;;  %s5165_s12 = sld [smem:[#allocation6 + $0x5c]] }
 0x1ba   :  { %v1338_v32 = vsel %vm1331_vm9, %v1335_v26, %v1337_v31  ;;  %v1339_v42 = vsel %vm1331_vm9, %v1337_v31, %v1335_v26  ;;  %vm6342_vm9 = vnez %v6341_v43  ;;  %1997 = vrot.lane.b32.xlu0 %v2540_v52, %s2484_s15  ;;  %s5255_s14 = sld [smem:[#allocation6 + $0x5f]] }
 0x1bb   :  { %v1346_v29 = vmul.f32 %v1345_v2, %v1338_v32  ;;  %v1347_v16 = vmul.f32 %v1345_v2, %v1339_v42  ;;  %vm1428_vm4 = vmand %vm4724_vm8, %vm6342_vm9  ;;  %1999 = vrot.lane.b32.xlu1 %v2561_v62, %s2484_s15  ;;  %s5346_s15 = sld [smem:[#allocation6 + $0x2f]] }
 0x1bc   :  { %v1429_v48 = vsel %vm1428_vm4, 1, %v5878_v46  ;;  %vm1487_vm4 = vcmp.lt.s32.totalorder %v2858_v44, 110 }
 0x1bd   :  { %v1348_v21 = vadd.f32 %v1346_v29, %v1342_v3  ;;  %v1349_v12 = vadd.f32 %v1347_v16, %v1343_v60  ;;  %v1369_v10 = vpop.permute.xlu1 %1368  ;;  %v1374_v49 = vpop.permute.xlu0 %1373  ;;  %v1433_v31 = vrot.slane %v1429_v48, %v2821_v37  ;;  %v1437_v32 = vrot.slane %v1429_v48, %v2824_v40 }
 0x1be   :  { %v1371_v41 = vsel %vm1370_vm7, %v1367_v20, %v1369_v10  ;;  %v1372_v11 = vsel %vm1370_vm7, %v1369_v10, %v1367_v20  ;;  %2029 = vrot.lane.b32.xlu0 %v2545_v53, %s2485_s3 }
 0x1bf   :  { %v1362_v35 = vsel %vm4819_vm15, %v1348_v21, 0.0  ;;  %v1363_v7 = vsel %vm4823_vm11, %v1349_v12, 0.0  ;;  %v1381_v5 = vmul.f32 %v1380_v30, %v1371_v41  ;;  %v1382_v39 = vmul.f32 %v1380_v30, %v1372_v11  ;;  %2031 = vrot.lane.b32.xlu1 %v2567_v63, %s2485_s3 }
 0x1c0   :  { %v1364_v1 = vadd.f32 %v1362_v35, %v1325_v6  ;;  %v1365_v45 = vadd.f32 %v1363_v7, %v1326_v57  ;;  %v1419_v57 = vstv %s4833_s10  ;;  %vm4895_vm15 = vcmp.eq.s32.totalorder %v1433_v31, 1  ;;  %s5177_s10 = sld [smem:[#allocation6 + $0x5d]] }
 0x1c1   :  { %v1376_v28 = vpop.permute.xlu1 %1375  ;;  %v1406_v51 = vpop.permute.xlu0 %1405  ;;  %vm4899_vm11 = vcmp.eq.s32.totalorder %v1437_v32, 1  ;;  %v1468_v35 = vsel %vm1467_vm10, 1, %v5878_v46  ;;  %v1501_v31 = vstv %s4918_s20  ;;  %vm1545_vm10 = vmand %vm4724_vm8, %vm2865_vm13  ;;  %s5606_s20 = sld [smem:[#allocation6 + $0x30]] }
 0x1c2   :  { %v1377_v55 = vsel %vm1370_vm7, %v1374_v49, %v1376_v28  ;;  %v1378_v17 = vsel %vm1370_vm7, %v1376_v28, %v1374_v49  ;;  %vm1448_vm7 = vcmp.lt.s32.totalorder %v2858_v44, 111  ;;  %v1472_v28 = vrot.slane %v1468_v35, %v2821_v37  ;;  %2036 = vrot.lane.b32.xlu0 %v2540_v52, %s2485_s3 }
 0x1c3   :  { %v1385_v19 = vmul.f32 %v1384_v15, %v1377_v55  ;;  %v1386_v38 = vmul.f32 %v1384_v15, %v1378_v17  ;;  %v1476_v55 = vrot.slane %v1468_v35, %v2824_v40  ;;  %2038 = vrot.lane.b32.xlu1 %v2561_v62, %s2485_s3  ;;  %s5620_s3 = sld [smem:[#allocation6 + $0x61]] }
 0x1c5   :  { %v1387_v33 = vadd.f32 %v1385_v19, %v1381_v5  ;;  %v1388_v59 = vadd.f32 %v1386_v38, %v1382_v39  ;;  %v1408_v8 = vpop.permute.xlu1 %1407  ;;  %v1413_v42 = vpop.permute.xlu0 %1412 }
 0x1c6   :  { %v1410_v56 = vsel %vm1409_vm1, %v1406_v51, %v1408_v8  ;;  %v1411_v18 = vsel %vm1409_vm1, %v1408_v8, %v1406_v51  ;;  %2068 = vrot.lane.b32.xlu0 %v2545_v53, %s2486_s9 }
 0x1c7   :  { %v1401_v2 = vsel %vm4857_vm0, %v1387_v33, 0.0  ;;  %v1402_v6 = vsel %vm4861_vm5, %v1388_v59, 0.0  ;;  %v1420_v16 = vmul.f32 %v1419_v57, %v1410_v56  ;;  %v1421_v13 = vmul.f32 %v1419_v57, %v1411_v18  ;;  %2070 = vrot.lane.b32.xlu1 %v2567_v63, %s2486_s9 }
 0x1c8   :  { %v1403_v25 = vadd.f32 %v1401_v2, %v1364_v1  ;;  %v1404_v26 = vadd.f32 %v1402_v6, %v1365_v45  ;;  %v1458_v45 = vstv %s4871_s13  ;;  %vm4933_vm0 = vcmp.eq.s32.totalorder %v1472_v28, 1  ;;  %s5216_s13 = sld [smem:[#allocation6 + $0x2e]] }
 0x1c9   :  { %v1415_v3 = vpop.permute.xlu1 %1414  ;;  %v1445_v10 = vpop.permute.xlu0 %1444  ;;  %vm4937_vm5 = vcmp.eq.s32.totalorder %v1476_v55, 1  ;;  %v1497_v6 = vstv %s4909_s17  ;;  %s5477_s17 = sld [smem:[#allocation6 + $0x60]] }
 0x1ca   :  { %v1416_v60 = vsel %vm1409_vm1, %v1413_v42, %v1415_v3  ;;  %v1417_v29 = vsel %vm1409_vm1, %v1415_v3, %v1413_v42  ;;  %vm1506_vm1 = vmand %vm4724_vm8, %vm2851_vm3  ;;  %2075 = vrot.lane.b32.xlu0 %v2540_v52, %s2486_s9 }
 0x1cb   :  { %v1424_v36 = vmul.f32 %v1423_v23, %v1416_v60  ;;  %v1425_v20 = vmul.f32 %v1423_v23, %v1417_v29  ;;  %v1507_v48 = vsel %vm1506_vm1, 1, %v5878_v46  ;;  %2077 = vrot.lane.b32.xlu1 %v2561_v62, %s2486_s9 }
 0x1cc   :  { %v1511_v32 = vrot.slane %v1507_v48, %v2821_v37  ;;  %v1515_v60 = vrot.slane %v1507_v48, %v2824_v40 }
 0x1cd   :  { %v1426_v27 = vadd.f32 %v1424_v36, %v1420_v16  ;;  %v1427_v41 = vadd.f32 %v1425_v20, %v1421_v13  ;;  %v1447_v11 = vpop.permute.xlu1 %1446  ;;  %v1452_v17 = vpop.permute.xlu0 %1451  ;;  %v141_v16 = vadd.s32 2, %v4686_v54 }
 0x1ce   :  { %v1449_v7 = vsel %vm1448_vm7, %v1445_v10, %v1447_v11  ;;  %v1450_v30 = vsel %vm1448_vm7, %v1447_v11, %v1445_v10 }
 0x1cf   :  { %v1440_v15 = vsel %vm4895_vm15, %v1426_v27, 0.0  ;;  %v1441_v1 = vsel %vm4899_vm11, %v1427_v41, 0.0  ;;  %v1459_v38 = vmul.f32 %v1458_v45, %v1449_v7  ;;  %v1460_v4 = vmul.f32 %v1458_v45, %v1450_v30 }
 0x1d0   :  { %v1442_v24 = vadd.f32 %v1440_v15, %v1403_v25  ;;  %v1443_v49 = vadd.f32 %v1441_v1, %v1404_v26  ;;  %vm4972_vm15 = vcmp.eq.s32.totalorder %v1511_v32, 1  ;;  %vm4976_vm11 = vcmp.eq.s32.totalorder %v1515_v60, 1 }
 0x1d1   :  { %v1454_v5 = vpop.permute.xlu1 %1453  ;;  %v1484_v8 = vpop.permute.xlu0 %1483  ;;  %vm142_vm1 = vcmp.ge.s32.totalorder %v141_v16, 0  ;;  %v1546_v30 = vsel %vm1545_vm10, 1, %v5878_v46 }
 0x1d2   :  { %v1455_v39 = vsel %vm1448_vm7, %v1452_v17, %v1454_v5  ;;  %v1456_v19 = vsel %vm1448_vm7, %v1454_v5, %v1452_v17  ;;  %vm1526_vm7 = vcmp.lt.s32.totalorder %v2858_v44, 109  ;;  %v1550_v55 = vrot.slane %v1546_v30, %v2821_v37 }
 0x1d3   :  { %v1463_v9 = vmul.f32 %v1462_v0, %v1455_v39  ;;  %v1464_v51 = vmul.f32 %v1462_v0, %v1456_v19  ;;  %v1536_v0 = vstv %s4948_s21  ;;  %v1554_v17 = vrot.slane %v1546_v30, %v2824_v40  ;;  %s2488_s21 = smov [#allocation9]  }
 0x1d4   :  { %vm1555_vm10 = vcmp.eq.s32.totalorder %v1550_v55, 1  ;;  %v1614_v30 = vstv %s5018_s8 }
 0x1d5   :  { %v1465_v56 = vadd.f32 %v1463_v9, %v1459_v38  ;;  %v1466_v18 = vadd.f32 %v1464_v51, %v1460_v4  ;;  %v1486_v2 = vpop.permute.xlu1 %1485  ;;  %v1491_v29 = vpop.permute.xlu0 %1490 }
 0x1d6   :  { %v1488_v57 = vsel %vm1487_vm4, %v1484_v8, %v1486_v2  ;;  %v1489_v23 = vsel %vm1487_vm4, %v1486_v2, %v1484_v8 }
 0x1d7   :  { %v1479_v25 = vsel %vm4933_vm0, %v1465_v56, 0.0  ;;  %v1480_v26 = vsel %vm4937_vm5, %v1466_v18, 0.0  ;;  %v1498_v21 = vmul.f32 %v1497_v6, %v1488_v57  ;;  %v1499_v12 = vmul.f32 %v1497_v6, %v1489_v23 }
 0x1d8   :  { %v1481_v42 = vadd.f32 %v1479_v25, %v1442_v24  ;;  %v1482_v3 = vadd.f32 %v1480_v26, %v1443_v49  ;;  %v1540_v24 = vstv %s4957_s18  ;;  %vm1565_vm0 = vcmp.lt.s32.totalorder %v2858_v44, 99  ;;  %s2173_s18 = sshll.u32 %s2488_s21, 4  ;;  %s2174_s18 = int_to_ptr.vmem [resolvable:$true] %s2173_s18 }
 0x1d9   :  { %v1493_v13 = vpop.permute.xlu1 %1492  ;;  %v1523_v11 = vpop.permute.xlu0 %1522  ;;  %v1575_v23 = vstv %s4986_s22  ;;  %v1579_v25 = vstv %s5000_s2  ;;  %v1731_v49 = vstv %s5120_s25  ;;  %s2405_s9 = scalar_lea.vmem %s2174_s18, 256  ;;  %p2410_p2 = scmp.lt.s32.totalorder %s2174_s18, %s2174_s18 }
 0x1da   :  { %v1494_v36 = vsel %vm1487_vm4, %v1491_v29, %v1493_v13  ;;  %v1495_v20 = vsel %vm1487_vm4, %v1493_v13, %v1491_v29  ;;  %vm143_vm4 = vcmp.lt.s32.totalorder %v141_v16, 16  ;;  %p2406_p1 = scmp.ne.s32.totalorder %s2174_s18, %s2405_s9  ;;  %p2411_p3 = scmp.lt.s32.totalorder %s2405_s9, %s2405_s9 }
 0x1db   :  { %v1502_v10 = vmul.f32 %v1501_v31, %v1494_v36  ;;  %v1503_v27 = vmul.f32 %v1501_v31, %v1495_v20  ;;  %vm4996_vm8 = vmand %vm142_vm1, %vm143_vm4 }
 0x1dc   :  { %vm1584_vm5 = vmand %vm4996_vm8, %vm6324_vm12  ;;  %p2412_p4 = por %p2411_p3, %p2410_p2 }
 0x1dd   :  { %v1504_v61 = vadd.f32 %v1502_v10, %v1498_v21  ;;  %v1505_v35 = vadd.f32 %v1503_v27, %v1499_v12  ;;  %v1525_v7 = vpop.permute.xlu1 %1524  ;;  %v1530_v5 = vpop.permute.xlu0 %1529  ;;  %v1585_v56 = vsel %vm1584_vm5, 1, %v5878_v46  ;;  %vm1662_vm5 = vmand %vm4996_vm8, %vm6336_vm14 }
 0x1de   :  { %v1527_v63 = vsel %vm1526_vm7, %v1523_v11, %v1525_v7  ;;  %v1528_v15 = vsel %vm1526_vm7, %v1525_v7, %v1523_v11  ;;  %v1589_v32 = vrot.slane %v1585_v56, %v2821_v37  ;;  %p2413_p5 = pnand %p2412_p4, %p2406_p1 }
 0x1df   :  { %v1518_v1 = vsel %vm4972_vm15, %v1504_v61, 0.0  ;;  %v1519_v45 = vsel %vm4976_vm11, %v1505_v35, 0.0  ;;  %v1537_v38 = vmul.f32 %v1536_v0, %v1527_v63  ;;  %v1538_v4 = vmul.f32 %v1536_v0, %v1528_v15  ;;  %vm1623_vm11 = vmand %vm4996_vm8, %vm6330_vm2 }
 0x1e0   :  { %v1520_v52 = vadd.f32 %v1518_v1, %v1481_v42  ;;  %v1521_v28 = vadd.f32 %v1519_v45, %v1482_v3  ;;  %vm1556_vm15 = vcmp.eq.s32.totalorder %v1554_v17, 1  ;;  %v1593_v42 = vrot.slane %v1585_v56, %v2824_v40 }
 0x1e1   :  { %v1532_v39 = vpop.permute.xlu1 %1531  ;;  %v1562_v33 = vpop.permute.xlu0 %1561  ;;  %vm1594_vm1 = vcmp.eq.s32.totalorder %v1589_v32, 1  ;;  %v1624_v53 = vsel %vm1623_vm11, 1, %v5878_v46  ;;  %v1618_v63 = vstv %s5022_s16  ;;  %v1653_v56 = vstv %s5040_s19  ;;  %vm1701_vm11 = vmand %vm4996_vm8, %vm6342_vm9 }
 0x1e2   :  { %v1533_v19 = vsel %vm1526_vm7, %v1530_v5, %v1532_v39  ;;  %v1534_v62 = vsel %vm1526_vm7, %v1532_v39, %v1530_v5  ;;  %vm1604_vm7 = vcmp.lt.s32.totalorder %v2858_v44, 98  ;;  %vm1595_vm4 = vcmp.eq.s32.totalorder %v1593_v42, 1 }
 0x1e3   :  { %v1541_v9 = vmul.f32 %v1540_v24, %v1533_v19  ;;  %v1542_v51 = vmul.f32 %v1540_v24, %v1534_v62  ;;  %v1628_v45 = vrot.slane %v1624_v53, %v2821_v37  ;;  %v1632_v0 = vrot.slane %v1624_v53, %v2824_v40 }
 0x1e4   :  { %v1692_v53 = vstv %s5062_s1 }
 0x1e5   :  { %v1543_v59 = vadd.f32 %v1541_v9, %v1537_v38  ;;  %v1544_v8 = vadd.f32 %v1542_v51, %v1538_v4  ;;  %v1564_v48 = vpop.permute.xlu1 %1563  ;;  %v1569_v3 = vpop.permute.xlu0 %1568  ;;  %v1663_v51 = vsel %vm1662_vm5, 1, %v5878_v46 }
 0x1e6   :  { %v1566_v18 = vsel %vm1565_vm0, %v1562_v33, %v1564_v48  ;;  %v1567_v2 = vsel %vm1565_vm0, %v1564_v48, %v1562_v33 }
 0x1e7   :  { %v1557_v6 = vsel %vm1555_vm10, %v1543_v59, 0.0  ;;  %v1558_v57 = vsel %vm1556_vm15, %v1544_v8, 0.0  ;;  %v1576_v13 = vmul.f32 %v1575_v23, %v1566_v18  ;;  %v1577_v36 = vmul.f32 %v1575_v23, %v1567_v2 }
 0x1e8   :  { %v1559_v26 = vadd.f32 %v1557_v6, %v1520_v52  ;;  %v1560_v31 = vadd.f32 %v1558_v57, %v1521_v28  ;;  %vm1633_vm10 = vcmp.eq.s32.totalorder %v1628_v45, 1  ;;  %vm1634_vm15 = vcmp.eq.s32.totalorder %v1632_v0, 1 }
 0x1e9   :  { %v1571_v60 = vpop.permute.xlu1 %1570  ;;  %v1601_v12 = vpop.permute.xlu0 %1600  ;;  %v1657_v18 = vstv %s5044_s24  ;;  %v1667_v57 = vrot.slane %v1663_v51, %v2821_v37  ;;  %v1671_v23 = vrot.slane %v1663_v51, %v2824_v40 }
 0x1ea   :  { %v1572_v29 = vsel %vm1565_vm0, %v1569_v3, %v1571_v60  ;;  %v1573_v16 = vsel %vm1565_vm0, %v1571_v60, %v1569_v3  ;;  %vm1643_vm0 = vcmp.lt.s32.totalorder %v2858_v44, 97 }
 0x1eb   :  { %v1580_v20 = vmul.f32 %v1579_v25, %v1572_v29  ;;  %v1581_v21 = vmul.f32 %v1579_v25, %v1573_v16 }
 0x1ed   :  { %v1582_v10 = vadd.f32 %v1580_v20, %v1576_v13  ;;  %v1583_v27 = vadd.f32 %v1581_v21, %v1577_v36  ;;  %v1603_v41 = vpop.permute.xlu1 %1602  ;;  %v1608_v24 = vpop.permute.xlu0 %1607  ;;  %v1702_v21 = vsel %vm1701_vm11, 1, %v5878_v46  ;;  %vm1779_vm11 = vmand %vm4996_vm8, %vm2851_vm3 }
 0x1ee   :  { %v1605_v11 = vsel %vm1604_vm7, %v1601_v12, %v1603_v41  ;;  %v1606_v61 = vsel %vm1604_vm7, %v1603_v41, %v1601_v12 }
 0x1ef   :  { %v1596_v35 = vsel %vm1594_vm1, %v1582_v10, 0.0  ;;  %v1597_v7 = vsel %vm1595_vm4, %v1583_v27, 0.0  ;;  %v1615_v17 = vmul.f32 %v1614_v30, %v1605_v11  ;;  %v1616_v5 = vmul.f32 %v1614_v30, %v1606_v61 }
 0x1f0   :  { %v1598_v15 = vadd.f32 %v1596_v35, %v1559_v26  ;;  %v1599_v1 = vadd.f32 %v1597_v7, %v1560_v31  ;;  %vm1672_vm1 = vcmp.eq.s32.totalorder %v1667_v57, 1  ;;  %vm1673_vm4 = vcmp.eq.s32.totalorder %v1671_v23, 1 }
 0x1f1   :  { %v1610_v52 = vpop.permute.xlu1 %1609  ;;  %v1640_v62 = vpop.permute.xlu0 %1639  ;;  %v1696_v11 = vstv %s5066_s23  ;;  %v1706_v7 = vrot.slane %v1702_v21, %v2821_v37  ;;  %v1710_v30 = vrot.slane %v1702_v21, %v2824_v40  ;;  %v145_v23 = vadd.s32 3, %v4686_v54 }
 0x1f2   :  { %v1611_v28 = vsel %vm1604_vm7, %v1608_v24, %v1610_v52  ;;  %v1612_v55 = vsel %vm1604_vm7, %v1610_v52, %v1608_v24  ;;  %vm1682_vm7 = vcmp.lt.s32.totalorder %v2858_v44, 96 }
 0x1f3   :  { %v1619_v39 = vmul.f32 %v1618_v63, %v1611_v28  ;;  %v1620_v19 = vmul.f32 %v1618_v63, %v1612_v55  ;;  %vm1712_vm5 = vcmp.eq.s32.totalorder %v1710_v30, 1  ;;  %v1848_v30 = vstv %s5143_s5 }
 0x1f5   :  { %v1621_v38 = vadd.f32 %v1619_v39, %v1615_v17  ;;  %v1622_v4 = vadd.f32 %v1620_v19, %v1616_v5  ;;  %v1642_v9 = vpop.permute.xlu1 %1641  ;;  %v1647_v25 = vpop.permute.xlu0 %1646 }
 0x1f6   :  { %v1644_v33 = vsel %vm1643_vm0, %v1640_v62, %v1642_v9  ;;  %v1645_v59 = vsel %vm1643_vm0, %v1642_v9, %v1640_v62 }
 0x1f7   :  { %v1635_v8 = vsel %vm1633_vm10, %v1621_v38, 0.0  ;;  %v1636_v48 = vsel %vm1634_vm15, %v1622_v4, 0.0  ;;  %v1654_v42 = vmul.f32 %v1653_v56, %v1644_v33  ;;  %v1655_v3 = vmul.f32 %v1653_v56, %v1645_v59 }
 0x1f8   :  { %v1637_v2 = vadd.f32 %v1635_v8, %v1598_v15  ;;  %v1638_v6 = vadd.f32 %v1636_v48, %v1599_v1  ;;  %vm146_vm10 = vcmp.ge.s32.totalorder %v145_v23, 0  ;;  %vm147_vm15 = vcmp.lt.s32.totalorder %v145_v23, 16 }
 0x1f9   :  { %v1649_v26 = vpop.permute.xlu1 %1648  ;;  %v1679_v16 = vpop.permute.xlu0 %1678 }
 0x1fa   :  { %v1650_v31 = vsel %vm1643_vm0, %v1647_v25, %v1649_v26  ;;  %v1651_v32 = vsel %vm1643_vm0, %v1649_v26, %v1647_v25  ;;  %vm1711_vm0 = vcmp.eq.s32.totalorder %v1706_v7, 1 }
 0x1fb   :  { %v1658_v60 = vmul.f32 %v1657_v18, %v1650_v31  ;;  %v1659_v29 = vmul.f32 %v1657_v18, %v1651_v32 }
 0x1fd   :  { %v1660_v13 = vadd.f32 %v1658_v60, %v1654_v42  ;;  %v1661_v36 = vadd.f32 %v1659_v29, %v1655_v3  ;;  %v1681_v20 = vpop.permute.xlu1 %1680  ;;  %v1686_v63 = vpop.permute.xlu0 %1685  ;;  %v1780_v60 = vsel %vm1779_vm11, 1, %v5878_v46  ;;  %v1735_v29 = vstv %s5122_s26 }
 0x1fe   :  { %v1683_v12 = vsel %vm1682_vm7, %v1679_v16, %v1681_v20  ;;  %v1684_v10 = vsel %vm1682_vm7, %v1681_v20, %v1679_v16  ;;  %v1770_v20 = vstv %s5127_s27 }
 0x1ff   :  { %v1674_v27 = vsel %vm1672_vm1, %v1660_v13, 0.0  ;;  %v1675_v41 = vsel %vm1673_vm4, %v1661_v36, 0.0  ;;  %v1693_v0 = vmul.f32 %v1692_v53, %v1683_v12  ;;  %v1694_v24 = vmul.f32 %v1692_v53, %v1684_v10  ;;  %vm5153_vm1 = vmand %vm146_vm10, %vm147_vm15 }
 0x200   :  { %v1676_v61 = vadd.f32 %v1674_v27, %v1637_v2  ;;  %v1677_v35 = vadd.f32 %v1675_v41, %v1638_v6  ;;  %vm1818_vm4 = vmand %vm4996_vm8, %vm2865_vm13  ;;  %vm1760_vm10 = vcmp.lt.s32.totalorder %v2858_v44, 94  ;;  %v1774_v12 = vstv %s5131_s29 }
 0x201   :  { %v1688_v15 = vpop.permute.xlu1 %1687  ;;  %v5092_v55 = vpop.permute.xlu0 %1717  ;;  %v5183_v16 = vsel %vm1818_vm4, 1, %v5878_v46  ;;  %vm1935_vm15 = vmand %vm5153_vm1, %vm6336_vm14  ;;  %v1784_v10 = vrot.slane %v1780_v60, %v2821_v37  ;;  %v1788_v27 = vrot.slane %v1780_v60, %v2824_v40 }
 0x202   :  { %v1689_v1 = vsel %vm1682_vm7, %v1686_v63, %v1688_v15  ;;  %v1690_v45 = vsel %vm1682_vm7, %v1688_v15, %v1686_v63  ;;  %vm1740_vm7 = vmand %vm4996_vm8, %vm2797_vm6  ;;  %vm1721_vm8 = vcmp.lt.s32.totalorder %v2858_v44, 95  ;;  %v1827_v7 = vrot.slane %v5183_v16, %v2824_v40 }
 0x203   :  { %v1697_v52 = vmul.f32 %v1696_v11, %v1689_v1  ;;  %v1698_v28 = vmul.f32 %v1696_v11, %v1690_v45  ;;  %v1741_v42 = vsel %vm1740_vm7, 1, %v5878_v46  ;;  %vm1799_vm7 = vcmp.lt.s32.totalorder %v2858_v44, 93 }
 0x204   :  { %v1745_v13 = vrot.slane %v1741_v42, %v2821_v37  ;;  %v1749_v36 = vrot.slane %v1741_v42, %v2824_v40  ;;  %v1809_v11 = vstv %s5133_s30  ;;  %v1852_v63 = vstv %s5151_s7 }
 0x205   :  { %v1699_v17 = vadd.f32 %v1697_v52, %v1693_v0  ;;  %v1700_v5 = vadd.f32 %v1698_v28, %v1694_v24  ;;  %v5094_v39 = vpop.permute.xlu1 %1719  ;;  %v5100_v9 = vpop.permute.xlu0 %1724  ;;  %v5241_v15 = vsel %vm1935_vm15, 1, %v5878_v46  ;;  %v1887_v45 = vstv %s5157_s0 }
 0x206   :  { %v1891_v0 = vstv %s5165_s12  ;;  %vm5272_vm14 = vcmp.eq.s32.totalorder %v1745_v13, 1  ;;  %vm5276_vm11 = vcmp.eq.s32.totalorder %v1749_v36, 1  ;;  %v1722_v60 = vsel %vm1721_vm8, %v5092_v55, %v5094_v39 }
 0x207   :  { %v1713_v19 = vsel %vm1711_vm0, %v1699_v17, 0.0  ;;  %v1714_v62 = vsel %vm1712_vm5, %v1700_v5, 0.0  ;;  %vm1857_vm0 = vmand %vm5153_vm1, %vm6324_vm12  ;;  %v1944_v13 = vrot.slane %v5241_v15, %v2824_v40  ;;  %vm5317_vm4 = vcmp.eq.s32.totalorder %v1788_v27, 1 }
 0x208   :  { %v5096_v38 = vadd.f32 %v1713_v19, %v1676_v61  ;;  %v5098_v4 = vadd.f32 %v1714_v62, %v1677_v35  ;;  %vm1896_vm5 = vmand %vm5153_vm1, %vm6330_vm2  ;;  %v5212_v41 = vsel %vm1857_vm0, 1, %v5878_v46  ;;  %v1813_v61 = vstv %s5135_s4 }
 0x209   :  { %v5102_v51 = vpop.permute.xlu1 %1726  ;;  %v5104_v33 = vpop.permute.xlu0 %1756  ;;  %v1823_v35 = vrot.slane %v5183_v16, %v2821_v37  ;;  %v5229_v47 = vsel %vm1896_vm5, 1, %v5878_v46  ;;  %vm1974_vm12 = vmand %vm5153_vm1, %vm6342_vm9  ;;  %v1862_v34 = vrot.slane %v5212_v41, %v2821_v37  ;;  %v1866_v1 = vrot.slane %v5212_v41, %v2824_v40 }
 0x20a   :  { %v1728_v50 = vsel %vm1721_vm8, %v5100_v9, %v5102_v51  ;;  %v1729_v52 = vsel %vm1721_vm8, %v5102_v51, %v5100_v9  ;;  %vm1838_vm2 = vcmp.lt.s32.totalorder %v2858_v44, 83  ;;  %v1901_v28 = vrot.slane %v5229_v47, %v2821_v37  ;;  %vm2013_vm0 = vmand %vm5153_vm1, %vm2797_vm6 }
 0x20b   :  { %v1905_v17 = vrot.slane %v5229_v47, %v2824_v40  ;;  %v5290_v42 = vsel %vm1974_vm12, 1, %v5878_v46  ;;  %v1723_v16 = vsel %vm1721_vm8, %v5094_v39, %v5092_v55  ;;  %v1736_v36 = vmul.f32 %v1735_v29, %v1728_v50  ;;  %vm2052_vm12 = vmand %vm5153_vm1, %vm2851_vm3 }
 0x20c   :  { %v1737_v41 = vmul.f32 %v1735_v29, %v1729_v52  ;;  %vm5313_vm9 = vcmp.eq.s32.totalorder %v1784_v10, 1  ;;  %v1733_v10 = vmul.f32 %v1731_v49, %v1723_v16  ;;  %vm1877_vm8 = vcmp.lt.s32.totalorder %v2858_v44, 82 }
 0x20d   :  { %v5106_v59 = vpop.permute.xlu1 %1758  ;;  %v5108_v8 = vpop.permute.xlu0 %1763  ;;  %vm5348_vm5 = vcmp.eq.s32.totalorder %v1823_v35, 1  ;;  %vm5352_vm15 = vcmp.eq.s32.totalorder %v1827_v7, 1  ;;  %v5373_v7 = vsel %vm2013_vm0, 1, %v5878_v46  ;;  %vm5393_vm6 = vcmp.eq.s32.totalorder %v1862_v34, 1 }
 0x20e   :  { %v1761_v27 = vsel %vm1760_vm10, %v5104_v33, %v5106_v59  ;;  %vm1955_vm3 = vcmp.lt.s32.totalorder %v2858_v44, 80  ;;  %vm5529_vm0 = vcmp.eq.s32.totalorder %v1944_v13, 1  ;;  %v6390_v31 = vrot.slane %v5290_v42, %v2821_v37 }
 0x20f   :  { %v1771_v43 = vmul.f32 %v1770_v20, %v1761_v27 }
 0x211   :  { %v5110_v48 = vpop.permute.xlu1 %1765  ;;  %v5112_v56 = vpop.permute.xlu0 %1795 }
 0x212   :  { %v1767_v23 = vsel %vm1760_vm10, %v5108_v8, %v5110_v48  ;;  %v1768_v9 = vsel %vm1760_vm10, %v5110_v48, %v5108_v8  ;;  %v1732_v48 = vmul.f32 %v1731_v49, %v1722_v60  ;;  %v1762_v8 = vsel %vm1760_vm10, %v5106_v59, %v5104_v33 }
 0x213   :  { %v1775_v50 = vmul.f32 %v1774_v12, %v1767_v23  ;;  %v1776_v60 = vmul.f32 %v1774_v12, %v1768_v9  ;;  %v1739_v23 = vadd.f32 %v1737_v41, %v1733_v10  ;;  %v2008_v9 = vstv %s5255_s14 }
 0x214   :  { %v1738_v12 = vadd.f32 %v1736_v36, %v1732_v48  ;;  %v1772_v52 = vmul.f32 %v1770_v20, %v1762_v8  ;;  %vm5397_vm10 = vcmp.eq.s32.totalorder %v1866_v1, 1  ;;  %v2018_v1 = vrot.slane %v5373_v7, %v2821_v37 }
 0x215   :  { %v5114_v18 = vpop.permute.xlu1 %1797  ;;  %v5116_v2 = vpop.permute.xlu0 %1802  ;;  %v2022_v48 = vrot.slane %v5373_v7, %v2824_v40 }
 0x216   :  { %v1778_v34 = vadd.f32 %v1776_v60, %v1772_v52  ;;  %v1753_v52 = vsel %vm5276_vm11, %v1739_v23, 0.0  ;;  %vm1994_vm11 = vcmp.lt.s32.totalorder %v2858_v44, 79 }
 0x219   :  { %v5118_v6 = vpop.permute.xlu1 %1804  ;;  %v5124_v57 = vpop.permute.xlu0 %1834 }
 0x21a   :  { %v1806_v33 = vsel %vm1799_vm7, %v5116_v2, %v5118_v6  ;;  %v1807_v59 = vsel %vm1799_vm7, %v5118_v6, %v5116_v2  ;;  %v1800_v2 = vsel %vm1799_vm7, %v5112_v56, %v5114_v18  ;;  %v1801_v6 = vsel %vm1799_vm7, %v5114_v18, %v5112_v56 }
 0x21b   :  { %v1814_v36 = vmul.f32 %v1813_v61, %v1806_v33  ;;  %v1815_v41 = vmul.f32 %v1813_v61, %v1807_v59  ;;  %v1777_v61 = vadd.f32 %v1775_v50, %v1771_v43  ;;  %vm1916_vm7 = vcmp.lt.s32.totalorder %v2858_v44, 81 }
 0x21c   :  { %v1810_v10 = vmul.f32 %v1809_v11, %v1800_v2  ;;  %v1752_v50 = vsel %vm5272_vm14, %v1738_v12, 0.0  ;;  %v2043_v2 = vstv %s5346_s15  ;;  %v1755_v12 = vadd.f32 %v1753_v52, %v5098_v4 }
 0x21d   :  { %v5129_v25 = vpop.permute.xlu1 %1836  ;;  %v5137_v26 = vpop.permute.xlu0 %1841  ;;  %v1754_v62 = vadd.f32 %v1752_v50, %v5096_v38  ;;  %v1791_v23 = vsel %vm5313_vm9, %v1777_v61, 0.0  ;;  %vm5471_vm14 = vcmp.eq.s32.totalorder %v1905_v17, 1  ;;  %vm2033_vm9 = vcmp.lt.s32.totalorder %v2858_v44, 78 }
 0x21e   :  { %v1840_v43 = vsel %vm1838_vm2, %v5129_v25, %v5124_v57  ;;  %v1816_v33 = vadd.f32 %v1814_v36, %v1810_v10  ;;  %v6383_v50 = vrot.slane %v5241_v15, %v2821_v37 }
 0x220   :  { %v1830_v55 = vsel %vm5348_vm5, %v1816_v33, 0.0  ;;  %vm2072_vm5 = vcmp.lt.s32.totalorder %v2858_v44, 77 }
 0x221   :  { %v5145_v54 = vpop.permute.xlu1 %1843  ;;  %v5163_v32 = vpop.permute.xlu0 %1873 }
 0x222   :  { %v1845_v56 = vsel %vm1838_vm2, %v5137_v26, %v5145_v54  ;;  %v1846_v18 = vsel %vm1838_vm2, %v5145_v54, %v5137_v26  ;;  %v1811_v26 = vmul.f32 %v1809_v11, %v1801_v6  ;;  %v1839_v54 = vsel %vm1838_vm2, %v5124_v57, %v5129_v25 }
 0x223   :  { %v1853_v27 = vmul.f32 %v1852_v63, %v1845_v56  ;;  %v1854_v11 = vmul.f32 %v1852_v63, %v1846_v18  ;;  %v5441_v6 = vsel %vm2052_vm12, 1, %v5878_v46  ;;  %v1849_v57 = vmul.f32 %v1848_v30, %v1839_v54 }
 0x224   :  { %v1817_v59 = vadd.f32 %v1815_v41, %v1811_v26  ;;  %v1850_v25 = vmul.f32 %v1848_v30, %v1840_v43  ;;  %v1792_v30 = vsel %vm5317_vm4, %v1778_v34, 0.0  ;;  %vm5464_vm2 = vcmp.eq.s32.totalorder %v1901_v28, 1 }
 0x225   :  { %v5168_v3 = vpop.permute.xlu1 %1875  ;;  %v5195_v21 = vpop.permute.xlu0 %1880  ;;  %v1793_v18 = vadd.f32 %v1791_v23, %v1754_v62  ;;  %v1794_v61 = vadd.f32 %v1792_v30, %v1755_v12  ;;  %vm5522_vm4 = vcmp.eq.s32.totalorder %v6383_v50, 1  ;;  %v2047_v62 = vstv %s5477_s17 }
 0x226   :  { %v1878_v28 = vsel %vm1877_vm8, %v5163_v32, %v5168_v3  ;;  %v1879_v47 = vsel %vm1877_vm8, %v5168_v3, %v5163_v32  ;;  %v1831_v39 = vsel %vm5352_vm15, %v1817_v59, 0.0  ;;  %v2057_v32 = vrot.slane %v5441_v6, %v2821_v37 }
 0x227   :  { %v2061_v3 = vrot.slane %v5441_v6, %v2824_v40  ;;  %v1888_v49 = vmul.f32 %v1887_v45, %v1878_v28  ;;  %v1889_v34 = vmul.f32 %v1887_v45, %v1879_v47  ;;  %v1832_v26 = vadd.f32 %v1830_v55, %v1793_v18 }
 0x228   :  { %v1833_v54 = vadd.f32 %v1831_v39, %v1794_v61  ;;  %v6393_v6 = vrot.slane %v5290_v42, %v2824_v40  ;;  %v6396_v23 = vstv %s5170_s28  ;;  %vm5591_vm15 = vcmp.eq.s32.totalorder %v2018_v1, 1 }
 0x229   :  { %v5214_v53 = vpop.permute.xlu1 %1882  ;;  %v5253_v24 = vpop.permute.xlu0 %1912  ;;  %v6397_v30 = vmov %v6396_v23 }
 0x22a   :  { %v1884_v19 = vsel %vm1877_vm8, %v5195_v21, %v5214_v53  ;;  %v1885_v63 = vsel %vm1877_vm8, %v5214_v53, %v5195_v21  ;;  %v1855_v21 = vadd.f32 %v1853_v27, %v1849_v57  ;;  %v1856_v53 = vadd.f32 %v1854_v11, %v1850_v25  ;;  %vm2091_vm8 = vmand %vm5153_vm1, %vm2865_vm13 }
 0x22b   :  { %v1892_v41 = vmul.f32 %v1891_v0, %v1884_v19  ;;  %v1893_v56 = vmul.f32 %v1891_v0, %v1885_v63  ;;  %v6388_v27 = vstv %s5177_s10  ;;  %vm5552_vm13 = vcmp.eq.s32.totalorder %v6390_v31, 1 }
 0x22c   :  { %v1869_v43 = vsel %vm5393_vm6, %v1855_v21, 0.0  ;;  %v1870_v45 = vsel %vm5397_vm10, %v1856_v53, 0.0  ;;  %v6389_v14 = vmov %v6388_v27  ;;  %vm5559_vm1 = vcmp.eq.s32.totalorder %v6393_v6, 1 }
 0x22d   :  { %v5270_v5 = vpop.permute.xlu1 %1914  ;;  %v5311_v51 = vpop.permute.xlu0 %1919  ;;  %v1894_v20 = vadd.f32 %v1892_v41, %v1888_v49  ;;  %v1895_v8 = vadd.f32 %v1893_v56, %v1889_v34  ;;  %v1871_v25 = vadd.f32 %v1869_v43, %v1832_v26  ;;  %v1872_v19 = vadd.f32 %v1870_v45, %v1833_v54 }
 0x22e   :  { %v1917_v15 = vsel %vm1916_vm7, %v5253_v24, %v5270_v5  ;;  %v1918_v13 = vsel %vm1916_vm7, %v5270_v5, %v5253_v24  ;;  %v5569_v12 = vsel %vm2091_vm8, 1, %v5878_v46  ;;  %v6398_v46 = vstv %s5201_s11 }
 0x22f   :  { %v1927_v42 = vmul.f32 %v6396_v23, %v1917_v15  ;;  %v1928_v21 = vmul.f32 %v6397_v30, %v1918_v13  ;;  %v6399_v47 = vmov %v6398_v46  ;;  %vm5598_vm6 = vcmp.eq.s32.totalorder %v2022_v48, 1 }
 0x230   :  { %v1908_v1 = vsel %vm5464_vm2, %v1894_v20, 0.0  ;;  %v1909_v7 = vsel %vm5471_vm14, %v1895_v8, 0.0  ;;  %vm5612_vm10 = vcmp.eq.s32.totalorder %v2057_v32, 1  ;;  %v6408_v49 = vstv %s5189_s6 }
 0x231   :  { %v5321_v29 = vpop.permute.xlu1 %1921  ;;  %v5364_v35 = vpop.permute.xlu0 %1951  ;;  %v6409_v34 = vmov %v6408_v49  ;;  %v1910_v6 = vadd.f32 %v1908_v1, %v1871_v25  ;;  %v2100_v59 = vrot.slane %v5569_v12, %v2824_v40 }
 0x232   :  { %v1923_v0 = vsel %vm1916_vm7, %v5311_v51, %v5321_v29  ;;  %v1924_v16 = vsel %vm1916_vm7, %v5321_v29, %v5311_v51  ;;  %vm5616_vm7 = vcmp.eq.s32.totalorder %v2061_v3, 1 }
 0x233   :  { %v1931_v11 = vmul.f32 %v6388_v27, %v1923_v0  ;;  %v1932_v33 = vmul.f32 %v6389_v14, %v1924_v16 }
 0x235   :  { %v5387_v22 = vpop.permute.xlu1 %1953  ;;  %v1959_v58 = vpop.permute.xlu0 %1958  ;;  %v1933_v48 = vadd.f32 %v1931_v11, %v1927_v42  ;;  %v1934_v56 = vadd.f32 %v1932_v33, %v1928_v21 }
 0x236   :  { %v1956_v53 = vsel %vm1955_vm3, %v5364_v35, %v5387_v22 }
 0x237   :  { %v1966_v36 = vmul.f32 %v6408_v49, %v1956_v53  ;;  %v1947_v27 = vsel %vm5522_vm4, %v1933_v48, 0.0  ;;  %v1948_v11 = vsel %vm5529_vm0, %v1934_v56, 0.0  ;;  %v2082_v53 = vstv %s5606_s20 }
 0x238   :  { %v1949_v30 = vadd.f32 %v1947_v27, %v1910_v6 }
 0x239   :  { %v1961_v60 = vpop.permute.xlu1 %1960  ;;  %v5475_v4 = vpop.permute.xlu0 %1990 }
 0x23a   :  { %v1962_v24 = vsel %vm1955_vm3, %v1959_v58, %v1961_v60  ;;  %v1963_v5 = vsel %vm1955_vm3, %v1961_v60, %v1959_v58  ;;  %v1957_v58 = vsel %vm1955_vm3, %v5387_v22, %v5364_v35  ;;  %vm2102_vm3 = vcmp.eq.s32.totalorder %v2100_v59, 1 }
 0x23b   :  { %v1970_v28 = vmul.f32 %v6398_v46, %v1962_v24  ;;  %v1971_v55 = vmul.f32 %v6399_v47, %v1963_v5  ;;  %v1967_v0 = vmul.f32 %v6409_v34, %v1957_v58  ;;  %v1911_v24 = vadd.f32 %v1909_v7, %v1872_v19 }
 0x23c   :  { %v2086_v58 = vstv %s5620_s3  ;;  %v2096_v19 = vrot.slane %v5569_v12, %v2821_v37 }
 0x23d   :  { %v5487_v17 = vpop.permute.xlu1 %1992  ;;  %v1998_v10 = vpop.permute.xlu0 %1997  ;;  %v1972_v45 = vadd.f32 %v1970_v28, %v1966_v36  ;;  %v1973_v50 = vadd.f32 %v1971_v55, %v1967_v0  ;;  %v1950_v21 = vadd.f32 %v1948_v11, %v1911_v24 }
 0x23e   :  { %v1995_v38 = vsel %vm1994_vm11, %v5475_v4, %v5487_v17  ;;  %v1996_v32 = vsel %vm1994_vm11, %v5487_v17, %v5475_v4  ;;  %v6410_v17 = vstv %s5216_s13  ;;  %vm2101_vm12 = vcmp.eq.s32.totalorder %v2096_v19, 1 }
 0x23f   :  { %v2005_v20 = vmul.f32 %v6410_v17, %v1995_v38  ;;  %v6411_v8 = vmov %v6410_v17  ;;  %v1987_v52 = vsel %vm5559_vm1, %v1973_v50, 0.0 }
 0x240   :  { %v2006_v15 = vmul.f32 %v6411_v8, %v1996_v32  ;;  %v1989_v46 = vadd.f32 %v1987_v52, %v1950_v21  ;;  %v6412_v8 = vld [vmem:[#allocation37_spill] sm:$0xff] }
 0x241   :  { %v2000_v29 = vpop.permute.xlu1 %1999  ;;  %v2030_v63 = vpop.permute.xlu0 %2029 }
 0x242   :  { %v2001_v22 = vsel %vm1994_vm11, %v1998_v10, %v2000_v29  ;;  %v2002_v41 = vsel %vm1994_vm11, %v2000_v29, %v1998_v10 }
 0x243   :  { %v2009_v16 = vmul.f32 %v2008_v9, %v2001_v22  ;;  %v2010_v10 = vmul.f32 %v2008_v9, %v2002_v41 }
 0x245   :  { %v2032_v60 = vpop.permute.xlu1 %2031  ;;  %v2037_v3 = vpop.permute.xlu0 %2036  ;;  %v2011_v5 = vadd.f32 %v2009_v16, %v2005_v20 }
 0x246   :  { %v2034_v26 = vsel %vm2033_vm9, %v2030_v63, %v2032_v60  ;;  %v2035_v54 = vsel %vm2033_vm9, %v2032_v60, %v2030_v63  ;;  %v2012_v63 = vadd.f32 %v2010_v10, %v2006_v15 }
 0x247   :  { %v2044_v14 = vmul.f32 %v2043_v2, %v2034_v26  ;;  %v2045_v33 = vmul.f32 %v2043_v2, %v2035_v54  ;;  %v2025_v28 = vsel %vm5591_vm15, %v2011_v5, 0.0 }
 0x248   :  { %v2026_v47 = vsel %vm5598_vm6, %v2012_v63, 0.0 }
 0x249   :  { %v2039_v43 = vpop.permute.xlu1 %2038  ;;  %v2069_v31 = vpop.permute.xlu0 %2068  ;;  %v2028_v35 = vadd.f32 %v2026_v47, %v1989_v46 }
 0x24a   :  { %v2040_v29 = vsel %vm2033_vm9, %v2037_v3, %v2039_v43  ;;  %v2041_v4 = vsel %vm2033_vm9, %v2039_v43, %v2037_v3 }
 0x24b   :  { %v2048_v9 = vmul.f32 %v2047_v62, %v2040_v29  ;;  %v2049_v13 = vmul.f32 %v2047_v62, %v2041_v4  ;;  %v1986_v62 = vsel %vm5552_vm13, %v1972_v45, 0.0  ;;  %v2487_v29 = vmov 1966171168  }
 0x24c   :  { %v1988_v60 = vadd.f32 %v1986_v62, %v1949_v30  ;;  %v2123_v4 = vunpack.c.l.s4 %v2487_v29  ;;  %v2351_v62 = vld [vmem:[#allocation2] sm:$0xff] }
 0x24d   :  { %v2071_v23 = vpop.permute.xlu1 %2070  ;;  %v2050_v51 = vadd.f32 %v2048_v9, %v2044_v14  ;;  %v2051_v42 = vadd.f32 %v2049_v13, %v2045_v33  ;;  %v2076_v57 = vpop.permute.xlu0 %2075 }
 0x24e   :  { %v2073_v2 = vsel %vm2072_vm5, %v2069_v31, %v2071_v23  ;;  %v2074_v25 = vsel %vm2072_vm5, %v2071_v23, %v2069_v31  ;;  %v2027_v49 = vadd.f32 %v2025_v28, %v1988_v60  ;;  %v2124_v17 = vunpack.c.0.s8 %v2123_v4 }
 0x24f   :  { %v2064_v22 = vsel %vm5612_vm10, %v2050_v51, 0.0  ;;  %v2065_v41 = vsel %vm5616_vm7, %v2051_v42, 0.0  ;;  %v2083_v7 = vmul.f32 %v2082_v53, %v2073_v2  ;;  %v2084_v48 = vmul.f32 %v2082_v53, %v2074_v25  ;;  %v2352_v51 = vld [vmem:[#allocation2 + $0x8] sm:$0xff] }
 0x250   :  { %v2066_v34 = vadd.f32 %v2064_v22, %v2027_v49  ;;  %v2067_v0 = vadd.f32 %v2065_v41, %v2028_v35  ;;  %v2127_v15 = vsub.s32 %v2124_v17, %v6412_v8 }
 0x251   :  { %v2078_v55 = vpop.permute.xlu1 %2077 }
 0x252   :  { %v2079_v1 = vsel %vm2072_vm5, %v2076_v57, %v2078_v55  ;;  %v2080_v12 = vsel %vm2072_vm5, %v2078_v55, %v2076_v57 }
 0x253   :  { %v2087_v39 = vmul.f32 %v2086_v58, %v2079_v1  ;;  %v2088_v56 = vmul.f32 %v2086_v58, %v2080_v12 }
 0x255   :  { %v2089_v36 = vadd.f32 %v2087_v39, %v2083_v7  ;;  %v2090_v18 = vadd.f32 %v2088_v56, %v2084_v48 }
 0x257   :  { %v2103_v61 = vsel %vm2101_vm12, %v2089_v36, 0.0  ;;  %v2104_v38 = vsel %vm2102_vm3, %v2090_v18, 0.0 }
 0x258   :  { %v2105_v32 = vadd.f32 %v2103_v61, %v2066_v34  ;;  %v2106_v3 = vadd.f32 %v2104_v38, %v2067_v0 }
 0x25a   :  { %v2107_v16 = vsub.f32 0.0, %v2105_v32  ;;  %v2108_v10 = vsub.f32 0.0, %v2106_v3 }
 0x25c   :  { %v2109_v44 = vmul.f32 1.442695, %v2107_v16  ;;  %v2111_v26 = vmul.f32 1.442695, %v2108_v10 }
 0x25e   :  { %2342 = vpow2.f32 %v2109_v44 }
 0x25f   :  { %2344 = vpow2.f32 %v2111_v26 }
 0x26b   :  { %v2343_v54 = vpop.eup %2342 }
 0x26c   :  { %v2345_v43 = vpop.eup %2344  ;;  %v2113_v45 = vadd.f32 1.0, %v2343_v54 }
 0x26d   :  { %v2114_v50 = vadd.f32 1.0, %v2345_v43 }
 0x26e   :  { %2346 = vrcp.f32 %v2113_v45 }
 0x26f   :  { %2348 = vrcp.f32 %v2114_v50 }
 0x27b   :  { %v2347_v20 = vpop.eup %2346 }
 0x27c   :  { %v2349_v9 = vpop.eup %2348 }
 0x27d   :  { %v2121_v13 = vcombine.low %v2347_v20, %v2349_v9 }
 0x27f   :  { %v2128_v27 = vrot.slane %v2121_v13, %v2127_v15 }
 0x281   :  { %v2129_v11 = vcombine.high %v2128_v27, %v2128_v27  ;;  %v2136_v14 = vrot.slane %v2128_v27, %v2127_v15 }
 0x283   :  { %v2143_v33 = vrot.slane %v2129_v11, %v2127_v15  ;;  %v2147_v31 = vrot.slane %v2136_v14, %v2821_v37  ;;  %v2151_v6 = vrot.slane %v2136_v14, %v2824_v40 }
 0x285   :  { %v2155_v24 = vrot.slane %v2143_v33, %v2821_v37  ;;  %v2159_v5 = vrot.slane %v2143_v33, %v2824_v40  ;;  %v2160_v63 = vcombine.low %v2147_v31, %v2151_v6 }
 0x287   :  { %v2161_v23 = vcombine.low %v2155_v24, %v2159_v5  ;;  %v2164_v52 = vmul.f32 %v2351_v62, %v2160_v63 }
 0x289   :  { %v2165_v42 = vmul.f32 %v2352_v51, %v2161_v23  ;;  %2166 = vst [vmem:[#allocation9] sm:$0xff] %v2164_v52 }
 0x28b   :  { %2167 = vst [vmem:[#allocation9 + $0x8] sm:$0xff] %v2165_v42 }
 0x28c   :  { %2416 = shalt.err (!%p2413_p5)
}
 0x28d   :  { %s6413_s22 = smov 8   ;;  %s6414_s2 = smov 128  }
 0x28e   :  { %s6415_s19 = sld [smem:[#allocation76_spill]] }
 0x294   :  { %2179 = dma.vmem_to_hbm [thread:$0]  %s2174_s18, 256, %s6415_s19, [#allocation4], %s6414_s2, %s6414_s2, %s6413_s22  }
 0x295   :  { %2431 = dma.done.wait [#allocation4], 256  }
 0x296   :  { %2432 = vsyncadd [#allocation4], 4294967040 }
 0x297   :  { %2183 = vsyncpa [#allocation3], 1 }
 0x298   :  { %2184 = vsyncpa [#allocation8], 1 }
 0x299   :  { %2185 = vsyncpa [#allocation4], 1 }
 0x29a   :  { %2186 = vsyncpa [#allocation5], 1 }

</bundles_post_ra>
